<compile_context>
chip_gen: v7x
topology: tpu7x:2x2x1
jax: 0.10.0
libtpu: 0.0.40
codegen_flags: <defaults>
</compile_context>

<pallas_src>
import functools
import math

import jax
import jax.numpy as jnp
from jax import lax
from jax.experimental import pallas as pl
from jax.experimental.pallas import tpu as pltpu


# ----------------------------------------------------------------------------
# Fused kernel: embeddings + concat + all encoder layers, one batch element per grid step
# ----------------------------------------------------------------------------
def _lrp_encoder_kernel(depot_ref, dp_ref, cust_ref,
                        wd_ref, bd_ref, wp_ref, bp_ref, wc_ref, bc_ref,
                        wq_ref, wk_ref, wv_ref, wo_ref, bo_ref,
                        g1_ref, be1_ref, w1_ref, b1_ref, w2_ref, b2_ref,
                        g2_ref, be2_ref,
                        out_ref, x_sc,
                        *, layer_num, head_num, qkv_dim, eps=1e-5):
    f32 = jnp.float32
    inv_sqrt_d = 1.0 / math.sqrt(qkv_dim)

    nd = depot_ref.shape[1]
    ndp = dp_ref.shape[1]
    nc = cust_ref.shape[1]
    S = nd + ndp + nc

    # --- node embeddings, assembled into a (S, E) sequence in VMEM scratch ---
    x_sc[0:nd, :] = (jnp.dot(depot_ref[0], wd_ref[...], preferred_element_type=f32)
                     + bd_ref[...]).astype(x_sc.dtype)
    x_sc[nd:nd + ndp, :] = (jnp.dot(dp_ref[0], wp_ref[...], preferred_element_type=f32)
                            + bp_ref[...]).astype(x_sc.dtype)
    x_sc[nd + ndp:S, :] = (jnp.dot(cust_ref[0], wc_ref[...], preferred_element_type=f32)
                           + bc_ref[...]).astype(x_sc.dtype)
    x = x_sc[...]                                                  # (S, E) float32

    # --- InstanceNorm1d: mean/var over the sequence dim per channel, affine ---
    def instance_norm(z, g, b):
        mean = jnp.mean(z, axis=0, keepdims=True)
        var = jnp.mean((z - mean) ** 2, axis=0, keepdims=True)
        return (z - mean) * lax.rsqrt(var + eps) * g + b

    # --- encoder layers (static unroll over layers and heads) ---
    for l in range(layer_num):
        acc = None
        for h in range(head_num):
            idx = l * head_num + h
            qh = jnp.dot(x, wq_ref[idx], preferred_element_type=f32)      # (S, d)
            kh = jnp.dot(x, wk_ref[idx], preferred_element_type=f32)      # (S, d)
            vh = jnp.dot(x, wv_ref[idx], preferred_element_type=f32)      # (S, d)
            scores = lax.dot_general(qh, kh, (((1,), (1,)), ((), ())),
                                     preferred_element_type=f32) * inv_sqrt_d  # (S, S)
            m = jnp.max(scores, axis=-1, keepdims=True)
            e = jnp.exp(scores - m)
            p = e / jnp.sum(e, axis=-1, keepdims=True)
            oh = jnp.dot(p, vh, preferred_element_type=f32)               # (S, d)
            # fold the head-concat + combine Linear into per-head (d, E) matmuls
            contrib = jnp.dot(oh, wo_ref[idx], preferred_element_type=f32)  # (S, E)
            acc = contrib if acc is None else acc + contrib
        mh = acc + bo_ref[l]                                              # (S, E)

        out1 = instance_norm(x + mh, g1_ref[l], be1_ref[l])               # (S, E)

        hidden = jnp.dot(out1, w1_ref[l], preferred_element_type=f32) + b1_ref[l]
        hidden = jnp.maximum(hidden, 0.0)
        ff = jnp.dot(hidden, w2_ref[l], preferred_element_type=f32) + b2_ref[l]

        x = instance_norm(out1 + ff, g2_ref[l], be2_ref[l])

    out_ref[0] = x.astype(out_ref.dtype)


def lrp_encoder_forward(kp, depot, dp, cust, *, head_num, qkv_dim):
    B, nd, Fin = depot.shape
    ndp = dp.shape[1]
    nc = cust.shape[1]
    S = nd + ndp + nc
    E = kp["wd"].shape[1]
    L = kp["w1"].shape[0]
    Fh = kp["w1"].shape[2]
    d = qkv_dim
    H = head_num

    c2 = lambda b: (0, 0)
    c3 = lambda b: (0, 0, 0)

    kernel = functools.partial(_lrp_encoder_kernel,
                               layer_num=L, head_num=H, qkv_dim=d)

    return pl.pallas_call(
        kernel,
        out_shape=jax.ShapeDtypeStruct((B, S, E), depot.dtype),
        grid_spec=pltpu.PrefetchScalarGridSpec(
            num_scalar_prefetch=0,
            grid=(B,),
            in_specs=[
                pl.BlockSpec((1, nd, Fin), lambda b: (b, 0, 0)),   # depot nodes
                pl.BlockSpec((1, ndp, Fin), lambda b: (b, 0, 0)),  # dp nodes
                pl.BlockSpec((1, nc, Fin), lambda b: (b, 0, 0)),   # customer nodes
                pl.BlockSpec((Fin, E), c2),                        # W_depot^T (resident)
                pl.BlockSpec((1, E), c2),                          # b_depot
                pl.BlockSpec((Fin, E), c2),                        # W_dp^T
                pl.BlockSpec((1, E), c2),                          # b_dp
                pl.BlockSpec((Fin, E), c2),                        # W_customer^T
                pl.BlockSpec((1, E), c2),                          # b_customer
                pl.BlockSpec((L * H, E, d), c3),                   # Wq per layer*head
                pl.BlockSpec((L * H, E, d), c3),                   # Wk per layer*head
                pl.BlockSpec((L * H, E, d), c3),                   # Wv per layer*head
                pl.BlockSpec((L * H, d, E), c3),                   # Wo per layer*head
                pl.BlockSpec((L, 1, E), c3),                       # bo
                pl.BlockSpec((L, 1, E), c3),                       # norm1 gamma
                pl.BlockSpec((L, 1, E), c3),                       # norm1 beta
                pl.BlockSpec((L, E, Fh), c3),                      # W1^T
                pl.BlockSpec((L, 1, Fh), c3),                      # b1
                pl.BlockSpec((L, Fh, E), c3),                      # W2^T
                pl.BlockSpec((L, 1, E), c3),                       # b2
                pl.BlockSpec((L, 1, E), c3),                       # norm2 gamma
                pl.BlockSpec((L, 1, E), c3),                       # norm2 beta
            ],
            out_specs=pl.BlockSpec((1, S, E), lambda b: (b, 0, 0)),
            scratch_shapes=[pltpu.VMEM((S, E), jnp.float32)],
        ),
        compiler_params=pltpu.CompilerParams(dimension_semantics=("parallel",)),
    )(depot, dp, cust,
      kp["wd"], kp["bd"], kp["wp"], kp["bp"], kp["wc"], kp["bc"],
      kp["wq"], kp["wk"], kp["wv"], kp["wo"], kp["bo"],
      kp["g1"], kp["be1"], kp["w1"], kp["b1"], kp["w2"], kp["b2"],
      kp["g2"], kp["be2"])


# ----------------------------------------------------------------------------
# Parameter repacking (torch layout -> kernel layout) and pure-JAX reference
# ----------------------------------------------------------------------------
def prep_kernel_params(tp, *, head_num, qkv_dim):
    """Repack PyTorch-layout params into kernel-friendly layouts: pre-transposed,
    per-head weights flattened over a leading (layer*head) axis, biases/affine params
    stacked per-layer as lane-aligned (L, 1, F) rows."""
    layers = tp["layers"]

    def per_head_in(W):            # torch (H*d, E) -> (H, E, d)
        E = W.shape[1]
        return W.T.reshape(E, head_num, qkv_dim).transpose(1, 0, 2)

    def stack_rows(key):           # per-layer vector -> (L, 1, F)
        return jnp.stack([l[key].reshape(1, -1) for l in layers])

    return {
        "wd": tp["emb_depot_w"].T, "bd": tp["emb_depot_b"].reshape(1, -1),
        "wp": tp["emb_dp_w"].T,    "bp": tp["emb_dp_b"].reshape(1, -1),
        "wc": tp["emb_cust_w"].T,  "bc": tp["emb_cust_b"].reshape(1, -1),
        "wq": jnp.concatenate([per_head_in(l["Wq"]) for l in layers], axis=0),
        "wk": jnp.concatenate([per_head_in(l["Wk"]) for l in layers], axis=0),
        "wv": jnp.concatenate([per_head_in(l["Wv"]) for l in layers], axis=0),
        "wo": jnp.concatenate(
            [l["Wo"].T.reshape(head_num, qkv_dim, -1) for l in layers], axis=0),
        "bo": stack_rows("bo"),
        "g1": stack_rows("g1"), "be1": stack_rows("bt1"),
        "w1": jnp.stack([l["W1"].T for l in layers]),
        "b1": stack_rows("b1"),
        "w2": jnp.stack([l["W2"].T for l in layers]),
        "b2": stack_rows("b2"),
        "g2": stack_rows("g2"), "be2": stack_rows("bt2"),
    }


def lrp_encoder_ref(tp, depot, dp, cust, *, head_num, qkv_dim, eps=1e-5):
    """Pure-JAX reference mirroring the PyTorch forward exactly (torch weight layout)."""
    def linear(x, W, b=None):
        y = x @ W.T
        return y if b is None else y + b

    ed = linear(depot, tp["emb_depot_w"], tp["emb_depot_b"])
    edp = linear(dp, tp["emb_dp_w"], tp["emb_dp_b"])
    ec = linear(cust, tp["emb_cust_w"], tp["emb_cust_b"])
    out = jnp.concatenate([ed, edp, ec], axis=1)
    B, S, E = out.shape

    def by_heads(t):
        return t.reshape(B, S, head_num, qkv_dim).transpose(0, 2, 1, 3)

    def inorm(z, g, b):
        mean = jnp.mean(z, axis=1, keepdims=True)
        var = jnp.mean((z - mean) ** 2, axis=1, keepdims=True)
        return (z - mean) / jnp.sqrt(var + eps) * g + b

    for lp in tp["layers"]:
        q = by_heads(linear(out, lp["Wq"]))
        k = by_heads(linear(out, lp["Wk"]))
        v = by_heads(linear(out, lp["Wv"]))
        scores = jnp.einsum("bhsd,bhtd->bhst", q, k) / jnp.sqrt(jnp.float32(qkv_dim))
        w = jax.nn.softmax(scores, axis=-1)
        o = jnp.einsum("bhst,bhtd->bhsd", w, v)
        o = o.transpose(0, 2, 1, 3).reshape(B, S, head_num * qkv_dim)
        mh = linear(o, lp["Wo"], lp["bo"])
        out1 = inorm(out + mh, lp["g1"], lp["bt1"])
        ff = linear(jax.nn.relu(linear(out1, lp["W1"], lp["b1"])), lp["W2"], lp["b2"])
        out = inorm(out1 + ff, lp["g2"], lp["bt2"])
    return out


if __name__ == "__main__":
    # Small shapes consistent with the module (raw node feature dim is 8).
    embedding_dim = 128
    head_num = 4
    qkv_dim = 32
    ff_hidden_dim = 256
    encoder_layer_num = 2
    batch = 2
    n_depot, n_dp, n_customer = 1, 2, 5

    keys = iter(jax.random.split(jax.random.PRNGKey(0), 64))

    def u(shape, bound):
        return jax.random.uniform(next(keys), shape, minval=-bound, maxval=bound,
                                  dtype=jnp.float32)

    depot_node = jax.random.normal(next(keys), (batch, n_depot, 8), dtype=jnp.float32)
    dp_node = jax.random.normal(next(keys), (batch, n_dp, 8), dtype=jnp.float32)
    customer_node = jax.random.normal(next(keys), (batch, n_customer, 8), dtype=jnp.float32)

    b8 = 1.0 / math.sqrt(8.0)
    bE = 1.0 / math.sqrt(embedding_dim)
    bHD = 1.0 / math.sqrt(head_num * qkv_dim)
    bF = 1.0 / math.sqrt(ff_hidden_dim)

    torch_params = {
        "emb_depot_w": u((embedding_dim, 8), b8), "emb_depot_b": u((embedding_dim,), b8),
        "emb_dp_w": u((embedding_dim, 8), b8),    "emb_dp_b": u((embedding_dim,), b8),
        "emb_cust_w": u((embedding_dim, 8), b8),  "emb_cust_b": u((embedding_dim,), b8),
        "layers": [],
    }
    for _ in range(encoder_layer_num):
        torch_params["layers"].append({
            "Wq": u((head_num * qkv_dim, embedding_dim), bE),
            "Wk": u((head_num * qkv_dim, embedding_dim), bE),
            "Wv": u((head_num * qkv_dim, embedding_dim), bE),
            "Wo": u((embedding_dim, head_num * qkv_dim), bHD),
            "bo": u((embedding_dim,), bHD),
            "g1": 1.0 + u((embedding_dim,), 0.1), "bt1": u((embedding_dim,), 0.1),
            "W1": u((ff_hidden_dim, embedding_dim), bE), "b1": u((ff_hidden_dim,), bE),
            "W2": u((embedding_dim, ff_hidden_dim), bF), "b2": u((embedding_dim,), bF),
            "g2": 1.0 + u((embedding_dim,), 0.1), "bt2": u((embedding_dim,), 0.1),
        })

    kparams = prep_kernel_params(torch_params, head_num=head_num, qkv_dim=qkv_dim)

    fwd = jax.jit(functools.partial(lrp_encoder_forward,
                                    head_num=head_num, qkv_dim=qkv_dim))
    out = jax.block_until_ready(fwd(kparams, depot_node, dp_node, customer_node))

    ref = lrp_encoder_ref(torch_params, depot_node, dp_node, customer_node,
                          head_num=head_num, qkv_dim=qkv_dim)

    seq = n_depot + n_dp + n_customer
    assert out.shape == (batch, seq, embedding_dim)
    max_err = float(jnp.max(jnp.abs(out - ref)))
    assert jnp.allclose(out, ref, atol=1e-3, rtol=1e-3), \
        f"mismatch vs reference (max |err| = {max_err})"

    print("KERNEL_OK")
</pallas_src>

<mosaic_0001>
module attributes {stable_mosaic.version = 11 : i64} {
  func.func @_lrp_encoder_kernel(%arg0: i32, %arg1: memref<1x1x8xf32, #tpu.memory_space<vmem>>, %arg2: memref<1x2x8xf32, #tpu.memory_space<vmem>>, %arg3: memref<1x5x8xf32, #tpu.memory_space<vmem>>, %arg4: memref<8x128xf32, #tpu.memory_space<vmem>>, %arg5: memref<1x128xf32, #tpu.memory_space<vmem>>, %arg6: memref<8x128xf32, #tpu.memory_space<vmem>>, %arg7: memref<1x128xf32, #tpu.memory_space<vmem>>, %arg8: memref<8x128xf32, #tpu.memory_space<vmem>>, %arg9: memref<1x128xf32, #tpu.memory_space<vmem>>, %arg10: memref<8x128x32xf32, #tpu.memory_space<vmem>>, %arg11: memref<8x128x32xf32, #tpu.memory_space<vmem>>, %arg12: memref<8x128x32xf32, #tpu.memory_space<vmem>>, %arg13: memref<8x32x128xf32, #tpu.memory_space<vmem>>, %arg14: memref<2x1x128xf32, #tpu.memory_space<vmem>>, %arg15: memref<2x1x128xf32, #tpu.memory_space<vmem>>, %arg16: memref<2x1x128xf32, #tpu.memory_space<vmem>>, %arg17: memref<2x128x256xf32, #tpu.memory_space<vmem>>, %arg18: memref<2x1x256xf32, #tpu.memory_space<vmem>>, %arg19: memref<2x256x128xf32, #tpu.memory_space<vmem>>, %arg20: memref<2x1x128xf32, #tpu.memory_space<vmem>>, %arg21: memref<2x1x128xf32, #tpu.memory_space<vmem>>, %arg22: memref<2x1x128xf32, #tpu.memory_space<vmem>>, %arg23: memref<1x8x128xf32, #tpu.memory_space<vmem>>, %arg24: memref<8x128xf32, #tpu.memory_space<vmem>>) attributes {dimension_semantics = [#tpu.dimension_semantics<parallel>], iteration_bounds = array<i64: 2>, scalar_prefetch = 0 : i64, scratch_operands = 1 : i64, tpu.core_type = #tpu.core_type<tc>, window_params = [{transform_indices = @transform_0, window_bounds = array<i64: 1, 1, 8>}, {transform_indices = @transform_1, window_bounds = array<i64: 1, 2, 8>}, {transform_indices = @transform_2, window_bounds = array<i64: 1, 5, 8>}, {pipeline_mode = #tpu.pipeline_mode<synchronous>, transform_indices = @transform_3, window_bounds = array<i64: 8, 128>}, {pipeline_mode = #tpu.pipeline_mode<synchronous>, transform_indices = @transform_4, window_bounds = array<i64: 1, 128>}, {pipeline_mode = #tpu.pipeline_mode<synchronous>, transform_indices = @transform_5, window_bounds = array<i64: 8, 128>}, {pipeline_mode = #tpu.pipeline_mode<synchronous>, transform_indices = @transform_6, window_bounds = array<i64: 1, 128>}, {pipeline_mode = #tpu.pipeline_mode<synchronous>, transform_indices = @transform_7, window_bounds = array<i64: 8, 128>}, {pipeline_mode = #tpu.pipeline_mode<synchronous>, transform_indices = @transform_8, window_bounds = array<i64: 1, 128>}, {pipeline_mode = #tpu.pipeline_mode<synchronous>, transform_indices = @transform_9, window_bounds = array<i64: 8, 128, 32>}, {pipeline_mode = #tpu.pipeline_mode<synchronous>, transform_indices = @transform_10, window_bounds = array<i64: 8, 128, 32>}, {pipeline_mode = #tpu.pipeline_mode<synchronous>, transform_indices = @transform_11, window_bounds = array<i64: 8, 128, 32>}, {pipeline_mode = #tpu.pipeline_mode<synchronous>, transform_indices = @transform_12, window_bounds = array<i64: 8, 32, 128>}, {pipeline_mode = #tpu.pipeline_mode<synchronous>, transform_indices = @transform_13, window_bounds = array<i64: 2, 1, 128>}, {pipeline_mode = #tpu.pipeline_mode<synchronous>, transform_indices = @transform_14, window_bounds = array<i64: 2, 1, 128>}, {pipeline_mode = #tpu.pipeline_mode<synchronous>, transform_indices = @transform_15, window_bounds = array<i64: 2, 1, 128>}, {pipeline_mode = #tpu.pipeline_mode<synchronous>, transform_indices = @transform_16, window_bounds = array<i64: 2, 128, 256>}, {pipeline_mode = #tpu.pipeline_mode<synchronous>, transform_indices = @transform_17, window_bounds = array<i64: 2, 1, 256>}, {pipeline_mode = #tpu.pipeline_mode<synchronous>, transform_indices = @transform_18, window_bounds = array<i64: 2, 256, 128>}, {pipeline_mode = #tpu.pipeline_mode<synchronous>, transform_indices = @transform_19, window_bounds = array<i64: 2, 1, 128>}, {pipeline_mode = #tpu.pipeline_mode<synchronous>, transform_indices = @transform_20, window_bounds = array<i64: 2, 1, 128>}, {pipeline_mode = #tpu.pipeline_mode<synchronous>, transform_indices = @transform_21, window_bounds = array<i64: 2, 1, 128>}, {transform_indices = @transform_22, window_bounds = array<i64: 1, 8, 128>}]} {
    %c0 = arith.constant 0 : index
    %c0_0 = arith.constant 0 : index
    %c0_1 = arith.constant 0 : index
    %0 = vector.load %arg1[%c0, %c0_0, %c0_1] : memref<1x1x8xf32, #tpu.memory_space<vmem>>, vector<1x1x8xf32>
    %1 = vector.shape_cast %0 : vector<1x1x8xf32> to vector<1x8xf32>
    %c0_2 = arith.constant 0 : index
    %c0_3 = arith.constant 0 : index
    %2 = vector.load %arg4[%c0_2, %c0_3] : memref<8x128xf32, #tpu.memory_space<vmem>>, vector<8x128xf32>
    %cst = arith.constant dense<0.000000e+00> : vector<1x128xf32>
    %3 = tpu.matmul %1, %2, %cst {dimension_numbers = #tpu.dot_dimension_numbers<[1], [0], [0], [1], [0, 0, 1, 1], [], []>} : vector<1x8xf32>, vector<8x128xf32>, vector<1x128xf32> -> vector<1x128xf32>
    %c0_4 = arith.constant 0 : index
    %c0_5 = arith.constant 0 : index
    %4 = vector.load %arg5[%c0_4, %c0_5] : memref<1x128xf32, #tpu.memory_space<vmem>>, vector<1x128xf32>
    %5 = arith.addf %3, %4 : vector<1x128xf32>
    %c0_6 = arith.constant 0 : index
    %c0_7 = arith.constant 0 : index
    %6 = vector.load %arg24[%c0_6, %c0_7] : memref<8x128xf32, #tpu.memory_space<vmem>>, vector<1x128xf32>
    tpu.vector_store %arg24[%c0_6, %c0_7], %5 {strides = array<i32>} : memref<8x128xf32, #tpu.memory_space<vmem>>, vector<1x128xf32>,
    %c0_8 = arith.constant 0 : index
    %c0_9 = arith.constant 0 : index
    %c0_10 = arith.constant 0 : index
    %7 = vector.load %arg2[%c0_8, %c0_9, %c0_10] : memref<1x2x8xf32, #tpu.memory_space<vmem>>, vector<1x2x8xf32>
    %8 = vector.shape_cast %7 : vector<1x2x8xf32> to vector<2x8xf32>
    %c0_11 = arith.constant 0 : index
    %c0_12 = arith.constant 0 : index
    %9 = vector.load %arg6[%c0_11, %c0_12] : memref<8x128xf32, #tpu.memory_space<vmem>>, vector<8x128xf32>
    %cst_13 = arith.constant dense<0.000000e+00> : vector<2x128xf32>
    %10 = tpu.matmul %8, %9, %cst_13 {dimension_numbers = #tpu.dot_dimension_numbers<[1], [0], [0], [1], [0, 0, 1, 1], [], []>} : vector<2x8xf32>, vector<8x128xf32>, vector<2x128xf32> -> vector<2x128xf32>
    %c0_14 = arith.constant 0 : index
    %c0_15 = arith.constant 0 : index
    %11 = vector.load %arg7[%c0_14, %c0_15] : memref<1x128xf32, #tpu.memory_space<vmem>>, vector<1x128xf32>
    %12 = vector.broadcast %11 : vector<1x128xf32> to vector<2x128xf32>
    %13 = arith.addf %10, %12 : vector<2x128xf32>
    %c1 = arith.constant 1 : index
    %c0_16 = arith.constant 0 : index
    %14 = vector.load %arg24[%c1, %c0_16] : memref<8x128xf32, #tpu.memory_space<vmem>>, vector<2x128xf32>
    tpu.vector_store %arg24[%c1, %c0_16], %13 {strides = array<i32>} : memref<8x128xf32, #tpu.memory_space<vmem>>, vector<2x128xf32>,
    %c0_17 = arith.constant 0 : index
    %c0_18 = arith.constant 0 : index
    %c0_19 = arith.constant 0 : index
    %15 = vector.load %arg3[%c0_17, %c0_18, %c0_19] : memref<1x5x8xf32, #tpu.memory_space<vmem>>, vector<1x5x8xf32>
    %16 = vector.shape_cast %15 : vector<1x5x8xf32> to vector<5x8xf32>
    %c0_20 = arith.constant 0 : index
    %c0_21 = arith.constant 0 : index
    %17 = vector.load %arg8[%c0_20, %c0_21] : memref<8x128xf32, #tpu.memory_space<vmem>>, vector<8x128xf32>
    %cst_22 = arith.constant dense<0.000000e+00> : vector<5x128xf32>
    %18 = tpu.matmul %16, %17, %cst_22 {dimension_numbers = #tpu.dot_dimension_numbers<[1], [0], [0], [1], [0, 0, 1, 1], [], []>} : vector<5x8xf32>, vector<8x128xf32>, vector<5x128xf32> -> vector<5x128xf32>
    %c0_23 = arith.constant 0 : index
    %c0_24 = arith.constant 0 : index
    %19 = vector.load %arg9[%c0_23, %c0_24] : memref<1x128xf32, #tpu.memory_space<vmem>>, vector<1x128xf32>
    %20 = vector.broadcast %19 : vector<1x128xf32> to vector<5x128xf32>
    %21 = arith.addf %18, %20 : vector<5x128xf32>
    %c3 = arith.constant 3 : index
    %c0_25 = arith.constant 0 : index
    %22 = vector.load %arg24[%c3, %c0_25] : memref<8x128xf32, #tpu.memory_space<vmem>>, vector<5x128xf32>
    tpu.vector_store %arg24[%c3, %c0_25], %21 {strides = array<i32>} : memref<8x128xf32, #tpu.memory_space<vmem>>, vector<5x128xf32>,
    %c0_26 = arith.constant 0 : index
    %c0_27 = arith.constant 0 : index
    %23 = vector.load %arg24[%c0_26, %c0_27] : memref<8x128xf32, #tpu.memory_space<vmem>>, vector<8x128xf32>
    %c0_28 = arith.constant 0 : index
    %c0_29 = arith.constant 0 : index
    %c0_30 = arith.constant 0 : index
    %24 = vector.load %arg10[%c0_28, %c0_29, %c0_30] : memref<8x128x32xf32, #tpu.memory_space<vmem>>, vector<1x128x32xf32>
    %25 = vector.shape_cast %24 : vector<1x128x32xf32> to vector<128x32xf32>
    %cst_31 = arith.constant dense<0.000000e+00> : vector<8x32xf32>
    %26 = tpu.matmul %23, %25, %cst_31 {dimension_numbers = #tpu.dot_dimension_numbers<[1], [0], [0], [1], [0, 0, 1, 1], [], []>} : vector<8x128xf32>, vector<128x32xf32>, vector<8x32xf32> -> vector<8x32xf32>
    %c0_32 = arith.constant 0 : index
    %c0_33 = arith.constant 0 : index
    %c0_34 = arith.constant 0 : index
    %27 = vector.load %arg11[%c0_32, %c0_33, %c0_34] : memref<8x128x32xf32, #tpu.memory_space<vmem>>, vector<1x128x32xf32>
    %28 = vector.shape_cast %27 : vector<1x128x32xf32> to vector<128x32xf32>
    %cst_35 = arith.constant dense<0.000000e+00> : vector<8x32xf32>
    %29 = tpu.matmul %23, %28, %cst_35 {dimension_numbers = #tpu.dot_dimension_numbers<[1], [0], [0], [1], [0, 0, 1, 1], [], []>} : vector<8x128xf32>, vector<128x32xf32>, vector<8x32xf32> -> vector<8x32xf32>
    %c0_36 = arith.constant 0 : index
    %c0_37 = arith.constant 0 : index
    %c0_38 = arith.constant 0 : index
    %30 = vector.load %arg12[%c0_36, %c0_37, %c0_38] : memref<8x128x32xf32, #tpu.memory_space<vmem>>, vector<1x128x32xf32>
    %31 = vector.shape_cast %30 : vector<1x128x32xf32> to vector<128x32xf32>
    %cst_39 = arith.constant dense<0.000000e+00> : vector<8x32xf32>
    %32 = tpu.matmul %23, %31, %cst_39 {dimension_numbers = #tpu.dot_dimension_numbers<[1], [0], [0], [1], [0, 0, 1, 1], [], []>} : vector<8x128xf32>, vector<128x32xf32>, vector<8x32xf32> -> vector<8x32xf32>
    %cst_40 = arith.constant dense<0.000000e+00> : vector<8x8xf32>
    %33 = tpu.matmul %26, %29, %cst_40 {dimension_numbers = #tpu.dot_dimension_numbers<[1], [1], [0], [0], [0, 0, 1, 0], [], []>} : vector<8x32xf32>, vector<8x32xf32>, vector<8x8xf32> -> vector<8x8xf32>
    %cst_41 = arith.constant 0.176776692 : f32
    %34 = vector.broadcast %cst_41 : f32 to vector<8x8xf32>
    %35 = arith.mulf %33, %34 : vector<8x8xf32>
    %cst_42 = arith.constant dense<0xFF800000> : vector<8xf32>
    %36 = vector.multi_reduction <maximumf>, %35, %cst_42 [1] : vector<8x8xf32> to vector<8xf32>
    %37 = vector.shape_cast %36 : vector<8xf32> to vector<8x1xf32>
    %38 = vector.broadcast %37 : vector<8x1xf32> to vector<8x8xf32>
    %39 = arith.subf %35, %38 : vector<8x8xf32>
    %40 = math.exp %39 : vector<8x8xf32>
    %cst_43 = arith.constant dense<0.000000e+00> : vector<8xf32>
    %41 = vector.multi_reduction <add>, %40, %cst_43 [1] : vector<8x8xf32> to vector<8xf32>
    %42 = vector.shape_cast %41 : vector<8xf32> to vector<8x1xf32>
    %43 = vector.broadcast %42 : vector<8x1xf32> to vector<8x8xf32>
    %44 = arith.divf %40, %43 : vector<8x8xf32>
    %cst_44 = arith.constant dense<0.000000e+00> : vector<8x32xf32>
    %45 = tpu.matmul %44, %32, %cst_44 {dimension_numbers = #tpu.dot_dimension_numbers<[1], [0], [0], [1], [0, 0, 1, 1], [], []>} : vector<8x8xf32>, vector<8x32xf32>, vector<8x32xf32> -> vector<8x32xf32>
    %c0_45 = arith.constant 0 : index
    %c0_46 = arith.constant 0 : index
    %c0_47 = arith.constant 0 : index
    %46 = vector.load %arg13[%c0_45, %c0_46, %c0_47] : memref<8x32x128xf32, #tpu.memory_space<vmem>>, vector<1x32x128xf32>
    %47 = vector.shape_cast %46 : vector<1x32x128xf32> to vector<32x128xf32>
    %cst_48 = arith.constant dense<0.000000e+00> : vector<8x128xf32>
    %48 = tpu.matmul %45, %47, %cst_48 {dimension_numbers = #tpu.dot_dimension_numbers<[1], [0], [0], [1], [0, 0, 1, 1], [], []>} : vector<8x32xf32>, vector<32x128xf32>, vector<8x128xf32> -> vector<8x128xf32>
    %c1_49 = arith.constant 1 : index
    %c0_50 = arith.constant 0 : index
    %c0_51 = arith.constant 0 : index
    %49 = vector.load %arg10[%c1_49, %c0_50, %c0_51] : memref<8x128x32xf32, #tpu.memory_space<vmem>>, vector<1x128x32xf32>
    %50 = vector.shape_cast %49 : vector<1x128x32xf32> to vector<128x32xf32>
    %cst_52 = arith.constant dense<0.000000e+00> : vector<8x32xf32>
    %51 = tpu.matmul %23, %50, %cst_52 {dimension_numbers = #tpu.dot_dimension_numbers<[1], [0], [0], [1], [0, 0, 1, 1], [], []>} : vector<8x128xf32>, vector<128x32xf32>, vector<8x32xf32> -> vector<8x32xf32>
    %c1_53 = arith.constant 1 : index
    %c0_54 = arith.constant 0 : index
    %c0_55 = arith.constant 0 : index
    %52 = vector.load %arg11[%c1_53, %c0_54, %c0_55] : memref<8x128x32xf32, #tpu.memory_space<vmem>>, vector<1x128x32xf32>
    %53 = vector.shape_cast %52 : vector<1x128x32xf32> to vector<128x32xf32>
    %cst_56 = arith.constant dense<0.000000e+00> : vector<8x32xf32>
    %54 = tpu.matmul %23, %53, %cst_56 {dimension_numbers = #tpu.dot_dimension_numbers<[1], [0], [0], [1], [0, 0, 1, 1], [], []>} : vector<8x128xf32>, vector<128x32xf32>, vector<8x32xf32> -> vector<8x32xf32>
    %c1_57 = arith.constant 1 : index
    %c0_58 = arith.constant 0 : index
    %c0_59 = arith.constant 0 : index
    %55 = vector.load %arg12[%c1_57, %c0_58, %c0_59] : memref<8x128x32xf32, #tpu.memory_space<vmem>>, vector<1x128x32xf32>
    %56 = vector.shape_cast %55 : vector<1x128x32xf32> to vector<128x32xf32>
    %cst_60 = arith.constant dense<0.000000e+00> : vector<8x32xf32>
    %57 = tpu.matmul %23, %56, %cst_60 {dimension_numbers = #tpu.dot_dimension_numbers<[1], [0], [0], [1], [0, 0, 1, 1], [], []>} : vector<8x128xf32>, vector<128x32xf32>, vector<8x32xf32> -> vector<8x32xf32>
    %cst_61 = arith.constant dense<0.000000e+00> : vector<8x8xf32>
    %58 = tpu.matmul %51, %54, %cst_61 {dimension_numbers = #tpu.dot_dimension_numbers<[1], [1], [0], [0], [0, 0, 1, 0], [], []>} : vector<8x32xf32>, vector<8x32xf32>, vector<8x8xf32> -> vector<8x8xf32>
    %cst_62 = arith.constant 0.176776692 : f32
    %59 = vector.broadcast %cst_62 : f32 to vector<8x8xf32>
    %60 = arith.mulf %58, %59 : vector<8x8xf32>
    %cst_63 = arith.constant dense<0xFF800000> : vector<8xf32>
    %61 = vector.multi_reduction <maximumf>, %60, %cst_63 [1] : vector<8x8xf32> to vector<8xf32>
    %62 = vector.shape_cast %61 : vector<8xf32> to vector<8x1xf32>
    %63 = vector.broadcast %62 : vector<8x1xf32> to vector<8x8xf32>
    %64 = arith.subf %60, %63 : vector<8x8xf32>
    %65 = math.exp %64 : vector<8x8xf32>
    %cst_64 = arith.constant dense<0.000000e+00> : vector<8xf32>
    %66 = vector.multi_reduction <add>, %65, %cst_64 [1] : vector<8x8xf32> to vector<8xf32>
    %67 = vector.shape_cast %66 : vector<8xf32> to vector<8x1xf32>
    %68 = vector.broadcast %67 : vector<8x1xf32> to vector<8x8xf32>
    %69 = arith.divf %65, %68 : vector<8x8xf32>
    %cst_65 = arith.constant dense<0.000000e+00> : vector<8x32xf32>
    %70 = tpu.matmul %69, %57, %cst_65 {dimension_numbers = #tpu.dot_dimension_numbers<[1], [0], [0], [1], [0, 0, 1, 1], [], []>} : vector<8x8xf32>, vector<8x32xf32>, vector<8x32xf32> -> vector<8x32xf32>
    %c1_66 = arith.constant 1 : index
    %c0_67 = arith.constant 0 : index
    %c0_68 = arith.constant 0 : index
    %71 = vector.load %arg13[%c1_66, %c0_67, %c0_68] : memref<8x32x128xf32, #tpu.memory_space<vmem>>, vector<1x32x128xf32>
    %72 = vector.shape_cast %71 : vector<1x32x128xf32> to vector<32x128xf32>
    %cst_69 = arith.constant dense<0.000000e+00> : vector<8x128xf32>
    %73 = tpu.matmul %70, %72, %cst_69 {dimension_numbers = #tpu.dot_dimension_numbers<[1], [0], [0], [1], [0, 0, 1, 1], [], []>} : vector<8x32xf32>, vector<32x128xf32>, vector<8x128xf32> -> vector<8x128xf32>
    %74 = arith.addf %48, %73 : vector<8x128xf32>
    %c2 = arith.constant 2 : index
    %c0_70 = arith.constant 0 : index
    %c0_71 = arith.constant 0 : index
    %75 = vector.load %arg10[%c2, %c0_70, %c0_71] : memref<8x128x32xf32, #tpu.memory_space<vmem>>, vector<1x128x32xf32>
    %76 = vector.shape_cast %75 : vector<1x128x32xf32> to vector<128x32xf32>
    %cst_72 = arith.constant dense<0.000000e+00> : vector<8x32xf32>
    %77 = tpu.matmul %23, %76, %cst_72 {dimension_numbers = #tpu.dot_dimension_numbers<[1], [0], [0], [1], [0, 0, 1, 1], [], []>} : vector<8x128xf32>, vector<128x32xf32>, vector<8x32xf32> -> vector<8x32xf32>
    %c2_73 = arith.constant 2 : index
    %c0_74 = arith.constant 0 : index
    %c0_75 = arith.constant 0 : index
    %78 = vector.load %arg11[%c2_73, %c0_74, %c0_75] : memref<8x128x32xf32, #tpu.memory_space<vmem>>, vector<1x128x32xf32>
    %79 = vector.shape_cast %78 : vector<1x128x32xf32> to vector<128x32xf32>
    %cst_76 = arith.constant dense<0.000000e+00> : vector<8x32xf32>
    %80 = tpu.matmul %23, %79, %cst_76 {dimension_numbers = #tpu.dot_dimension_numbers<[1], [0], [0], [1], [0, 0, 1, 1], [], []>} : vector<8x128xf32>, vector<128x32xf32>, vector<8x32xf32> -> vector<8x32xf32>
    %c2_77 = arith.constant 2 : index
    %c0_78 = arith.constant 0 : index
    %c0_79 = arith.constant 0 : index
    %81 = vector.load %arg12[%c2_77, %c0_78, %c0_79] : memref<8x128x32xf32, #tpu.memory_space<vmem>>, vector<1x128x32xf32>
    %82 = vector.shape_cast %81 : vector<1x128x32xf32> to vector<128x32xf32>
    %cst_80 = arith.constant dense<0.000000e+00> : vector<8x32xf32>
    %83 = tpu.matmul %23, %82, %cst_80 {dimension_numbers = #tpu.dot_dimension_numbers<[1], [0], [0], [1], [0, 0, 1, 1], [], []>} : vector<8x128xf32>, vector<128x32xf32>, vector<8x32xf32> -> vector<8x32xf32>
    %cst_81 = arith.constant dense<0.000000e+00> : vector<8x8xf32>
    %84 = tpu.matmul %77, %80, %cst_81 {dimension_numbers = #tpu.dot_dimension_numbers<[1], [1], [0], [0], [0, 0, 1, 0], [], []>} : vector<8x32xf32>, vector<8x32xf32>, vector<8x8xf32> -> vector<8x8xf32>
    %cst_82 = arith.constant 0.176776692 : f32
    %85 = vector.broadcast %cst_82 : f32 to vector<8x8xf32>
    %86 = arith.mulf %84, %85 : vector<8x8xf32>
    %cst_83 = arith.constant dense<0xFF800000> : vector<8xf32>
    %87 = vector.multi_reduction <maximumf>, %86, %cst_83 [1] : vector<8x8xf32> to vector<8xf32>
    %88 = vector.shape_cast %87 : vector<8xf32> to vector<8x1xf32>
    %89 = vector.broadcast %88 : vector<8x1xf32> to vector<8x8xf32>
    %90 = arith.subf %86, %89 : vector<8x8xf32>
    %91 = math.exp %90 : vector<8x8xf32>
    %cst_84 = arith.constant dense<0.000000e+00> : vector<8xf32>
    %92 = vector.multi_reduction <add>, %91, %cst_84 [1] : vector<8x8xf32> to vector<8xf32>
    %93 = vector.shape_cast %92 : vector<8xf32> to vector<8x1xf32>
    %94 = vector.broadcast %93 : vector<8x1xf32> to vector<8x8xf32>
    %95 = arith.divf %91, %94 : vector<8x8xf32>
    %cst_85 = arith.constant dense<0.000000e+00> : vector<8x32xf32>
    %96 = tpu.matmul %95, %83, %cst_85 {dimension_numbers = #tpu.dot_dimension_numbers<[1], [0], [0], [1], [0, 0, 1, 1], [], []>} : vector<8x8xf32>, vector<8x32xf32>, vector<8x32xf32> -> vector<8x32xf32>
    %c2_86 = arith.constant 2 : index
    %c0_87 = arith.constant 0 : index
    %c0_88 = arith.constant 0 : index
    %97 = vector.load %arg13[%c2_86, %c0_87, %c0_88] : memref<8x32x128xf32, #tpu.memory_space<vmem>>, vector<1x32x128xf32>
    %98 = vector.shape_cast %97 : vector<1x32x128xf32> to vector<32x128xf32>
    %cst_89 = arith.constant dense<0.000000e+00> : vector<8x128xf32>
    %99 = tpu.matmul %96, %98, %cst_89 {dimension_numbers = #tpu.dot_dimension_numbers<[1], [0], [0], [1], [0, 0, 1, 1], [], []>} : vector<8x32xf32>, vector<32x128xf32>, vector<8x128xf32> -> vector<8x128xf32>
    %100 = arith.addf %74, %99 : vector<8x128xf32>
    %c3_90 = arith.constant 3 : index
    %c0_91 = arith.constant 0 : index
    %c0_92 = arith.constant 0 : index
    %101 = vector.load %arg10[%c3_90, %c0_91, %c0_92] : memref<8x128x32xf32, #tpu.memory_space<vmem>>, vector<1x128x32xf32>
    %102 = vector.shape_cast %101 : vector<1x128x32xf32> to vector<128x32xf32>
    %cst_93 = arith.constant dense<0.000000e+00> : vector<8x32xf32>
    %103 = tpu.matmul %23, %102, %cst_93 {dimension_numbers = #tpu.dot_dimension_numbers<[1], [0], [0], [1], [0, 0, 1, 1], [], []>} : vector<8x128xf32>, vector<128x32xf32>, vector<8x32xf32> -> vector<8x32xf32>
    %c3_94 = arith.constant 3 : index
    %c0_95 = arith.constant 0 : index
    %c0_96 = arith.constant 0 : index
    %104 = vector.load %arg11[%c3_94, %c0_95, %c0_96] : memref<8x128x32xf32, #tpu.memory_space<vmem>>, vector<1x128x32xf32>
    %105 = vector.shape_cast %104 : vector<1x128x32xf32> to vector<128x32xf32>
    %cst_97 = arith.constant dense<0.000000e+00> : vector<8x32xf32>
    %106 = tpu.matmul %23, %105, %cst_97 {dimension_numbers = #tpu.dot_dimension_numbers<[1], [0], [0], [1], [0, 0, 1, 1], [], []>} : vector<8x128xf32>, vector<128x32xf32>, vector<8x32xf32> -> vector<8x32xf32>
    %c3_98 = arith.constant 3 : index
    %c0_99 = arith.constant 0 : index
    %c0_100 = arith.constant 0 : index
    %107 = vector.load %arg12[%c3_98, %c0_99, %c0_100] : memref<8x128x32xf32, #tpu.memory_space<vmem>>, vector<1x128x32xf32>
    %108 = vector.shape_cast %107 : vector<1x128x32xf32> to vector<128x32xf32>
    %cst_101 = arith.constant dense<0.000000e+00> : vector<8x32xf32>
    %109 = tpu.matmul %23, %108, %cst_101 {dimension_numbers = #tpu.dot_dimension_numbers<[1], [0], [0], [1], [0, 0, 1, 1], [], []>} : vector<8x128xf32>, vector<128x32xf32>, vector<8x32xf32> -> vector<8x32xf32>
    %cst_102 = arith.constant dense<0.000000e+00> : vector<8x8xf32>
    %110 = tpu.matmul %103, %106, %cst_102 {dimension_numbers = #tpu.dot_dimension_numbers<[1], [1], [0], [0], [0, 0, 1, 0], [], []>} : vector<8x32xf32>, vector<8x32xf32>, vector<8x8xf32> -> vector<8x8xf32>
    %cst_103 = arith.constant 0.176776692 : f32
    %111 = vector.broadcast %cst_103 : f32 to vector<8x8xf32>
    %112 = arith.mulf %110, %111 : vector<8x8xf32>
    %cst_104 = arith.constant dense<0xFF800000> : vector<8xf32>
    %113 = vector.multi_reduction <maximumf>, %112, %cst_104 [1] : vector<8x8xf32> to vector<8xf32>
    %114 = vector.shape_cast %113 : vector<8xf32> to vector<8x1xf32>
    %115 = vector.broadcast %114 : vector<8x1xf32> to vector<8x8xf32>
    %116 = arith.subf %112, %115 : vector<8x8xf32>
    %117 = math.exp %116 : vector<8x8xf32>
    %cst_105 = arith.constant dense<0.000000e+00> : vector<8xf32>
    %118 = vector.multi_reduction <add>, %117, %cst_105 [1] : vector<8x8xf32> to vector<8xf32>
    %119 = vector.shape_cast %118 : vector<8xf32> to vector<8x1xf32>
    %120 = vector.broadcast %119 : vector<8x1xf32> to vector<8x8xf32>
    %121 = arith.divf %117, %120 : vector<8x8xf32>
    %cst_106 = arith.constant dense<0.000000e+00> : vector<8x32xf32>
    %122 = tpu.matmul %121, %109, %cst_106 {dimension_numbers = #tpu.dot_dimension_numbers<[1], [0], [0], [1], [0, 0, 1, 1], [], []>} : vector<8x8xf32>, vector<8x32xf32>, vector<8x32xf32> -> vector<8x32xf32>
    %c3_107 = arith.constant 3 : index
    %c0_108 = arith.constant 0 : index
    %c0_109 = arith.constant 0 : index
    %123 = vector.load %arg13[%c3_107, %c0_108, %c0_109] : memref<8x32x128xf32, #tpu.memory_space<vmem>>, vector<1x32x128xf32>
    %124 = vector.shape_cast %123 : vector<1x32x128xf32> to vector<32x128xf32>
    %cst_110 = arith.constant dense<0.000000e+00> : vector<8x128xf32>
    %125 = tpu.matmul %122, %124, %cst_110 {dimension_numbers = #tpu.dot_dimension_numbers<[1], [0], [0], [1], [0, 0, 1, 1], [], []>} : vector<8x32xf32>, vector<32x128xf32>, vector<8x128xf32> -> vector<8x128xf32>
    %126 = arith.addf %100, %125 : vector<8x128xf32>
    %c0_111 = arith.constant 0 : index
    %c0_112 = arith.constant 0 : index
    %c0_113 = arith.constant 0 : index
    %127 = vector.load %arg14[%c0_111, %c0_112, %c0_113] : memref<2x1x128xf32, #tpu.memory_space<vmem>>, vector<1x1x128xf32>
    %128 = vector.shape_cast %127 : vector<1x1x128xf32> to vector<1x128xf32>
    %129 = vector.broadcast %128 : vector<1x128xf32> to vector<8x128xf32>
    %130 = arith.addf %126, %129 : vector<8x128xf32>
    %131 = arith.addf %23, %130 : vector<8x128xf32>
    %c0_114 = arith.constant 0 : index
    %c0_115 = arith.constant 0 : index
    %c0_116 = arith.constant 0 : index
    %132 = vector.load %arg15[%c0_114, %c0_115, %c0_116] : memref<2x1x128xf32, #tpu.memory_space<vmem>>, vector<1x1x128xf32>
    %133 = vector.shape_cast %132 : vector<1x1x128xf32> to vector<1x128xf32>
    %c0_117 = arith.constant 0 : index
    %c0_118 = arith.constant 0 : index
    %c0_119 = arith.constant 0 : index
    %134 = vector.load %arg16[%c0_117, %c0_118, %c0_119] : memref<2x1x128xf32, #tpu.memory_space<vmem>>, vector<1x1x128xf32>
    %135 = vector.shape_cast %134 : vector<1x1x128xf32> to vector<1x128xf32>
    %cst_120 = arith.constant dense<0.000000e+00> : vector<128xf32>
    %136 = vector.multi_reduction <add>, %131, %cst_120 [0] : vector<8x128xf32> to vector<128xf32>
    %137 = vector.shape_cast %136 : vector<128xf32> to vector<1x128xf32>
    %cst_121 = arith.constant 8.000000e+00 : f32
    %138 = vector.broadcast %cst_121 : f32 to vector<1x128xf32>
    %139 = arith.divf %137, %138 : vector<1x128xf32>
    %140 = vector.broadcast %139 : vector<1x128xf32> to vector<8x128xf32>
    %141 = arith.subf %131, %140 : vector<8x128xf32>
    %142 = arith.mulf %141, %141 : vector<8x128xf32>
    %cst_122 = arith.constant dense<0.000000e+00> : vector<128xf32>
    %143 = vector.multi_reduction <add>, %142, %cst_122 [0] : vector<8x128xf32> to vector<128xf32>
    %144 = vector.shape_cast %143 : vector<128xf32> to vector<1x128xf32>
    %cst_123 = arith.constant 8.000000e+00 : f32
    %145 = vector.broadcast %cst_123 : f32 to vector<1x128xf32>
    %146 = arith.divf %144, %145 : vector<1x128xf32>
    %147 = vector.broadcast %139 : vector<1x128xf32> to vector<8x128xf32>
    %148 = arith.subf %131, %147 : vector<8x128xf32>
    %cst_124 = arith.constant 9.99999974E-6 : f32
    %149 = vector.broadcast %cst_124 : f32 to vector<1x128xf32>
    %150 = arith.addf %146, %149 : vector<1x128xf32>
    %151 = math.rsqrt %150 : vector<1x128xf32>
    %152 = vector.broadcast %151 : vector<1x128xf32> to vector<8x128xf32>
    %153 = arith.mulf %148, %152 : vector<8x128xf32>
    %154 = vector.broadcast %133 : vector<1x128xf32> to vector<8x128xf32>
    %155 = arith.mulf %153, %154 : vector<8x128xf32>
    %156 = vector.broadcast %135 : vector<1x128xf32> to vector<8x128xf32>
    %157 = arith.addf %155, %156 : vector<8x128xf32>
    %c0_125 = arith.constant 0 : index
    %c0_126 = arith.constant 0 : index
    %c0_127 = arith.constant 0 : index
    %158 = vector.load %arg17[%c0_125, %c0_126, %c0_127] : memref<2x128x256xf32, #tpu.memory_space<vmem>>, vector<1x128x256xf32>
    %159 = vector.shape_cast %158 : vector<1x128x256xf32> to vector<128x256xf32>
    %cst_128 = arith.constant dense<0.000000e+00> : vector<8x256xf32>
    %160 = tpu.matmul %157, %159, %cst_128 {dimension_numbers = #tpu.dot_dimension_numbers<[1], [0], [0], [1], [0, 0, 1, 1], [], []>} : vector<8x128xf32>, vector<128x256xf32>, vector<8x256xf32> -> vector<8x256xf32>
    %c0_129 = arith.constant 0 : index
    %c0_130 = arith.constant 0 : index
    %c0_131 = arith.constant 0 : index
    %161 = vector.load %arg18[%c0_129, %c0_130, %c0_131] : memref<2x1x256xf32, #tpu.memory_space<vmem>>, vector<1x1x256xf32>
    %162 = vector.shape_cast %161 : vector<1x1x256xf32> to vector<1x256xf32>
    %163 = vector.broadcast %162 : vector<1x256xf32> to vector<8x256xf32>
    %164 = arith.addf %160, %163 : vector<8x256xf32>
    %cst_132 = arith.constant 0.000000e+00 : f32
    %165 = vector.broadcast %cst_132 : f32 to vector<8x256xf32>
    %166 = arith.maximumf %164, %165 : vector<8x256xf32>
    %c0_133 = arith.constant 0 : index
    %c0_134 = arith.constant 0 : index
    %c0_135 = arith.constant 0 : index
    %167 = vector.load %arg19[%c0_133, %c0_134, %c0_135] : memref<2x256x128xf32, #tpu.memory_space<vmem>>, vector<1x256x128xf32>
    %168 = vector.shape_cast %167 : vector<1x256x128xf32> to vector<256x128xf32>
    %cst_136 = arith.constant dense<0.000000e+00> : vector<8x128xf32>
    %169 = tpu.matmul %166, %168, %cst_136 {dimension_numbers = #tpu.dot_dimension_numbers<[1], [0], [0], [1], [0, 0, 1, 1], [], []>} : vector<8x256xf32>, vector<256x128xf32>, vector<8x128xf32> -> vector<8x128xf32>
    %c0_137 = arith.constant 0 : index
    %c0_138 = arith.constant 0 : index
    %c0_139 = arith.constant 0 : index
    %170 = vector.load %arg20[%c0_137, %c0_138, %c0_139] : memref<2x1x128xf32, #tpu.memory_space<vmem>>, vector<1x1x128xf32>
    %171 = vector.shape_cast %170 : vector<1x1x128xf32> to vector<1x128xf32>
    %172 = vector.broadcast %171 : vector<1x128xf32> to vector<8x128xf32>
    %173 = arith.addf %169, %172 : vector<8x128xf32>
    %174 = arith.addf %157, %173 : vector<8x128xf32>
    %c0_140 = arith.constant 0 : index
    %c0_141 = arith.constant 0 : index
    %c0_142 = arith.constant 0 : index
    %175 = vector.load %arg21[%c0_140, %c0_141, %c0_142] : memref<2x1x128xf32, #tpu.memory_space<vmem>>, vector<1x1x128xf32>
    %176 = vector.shape_cast %175 : vector<1x1x128xf32> to vector<1x128xf32>
    %c0_143 = arith.constant 0 : index
    %c0_144 = arith.constant 0 : index
    %c0_145 = arith.constant 0 : index
    %177 = vector.load %arg22[%c0_143, %c0_144, %c0_145] : memref<2x1x128xf32, #tpu.memory_space<vmem>>, vector<1x1x128xf32>
    %178 = vector.shape_cast %177 : vector<1x1x128xf32> to vector<1x128xf32>
    %cst_146 = arith.constant dense<0.000000e+00> : vector<128xf32>
    %179 = vector.multi_reduction <add>, %174, %cst_146 [0] : vector<8x128xf32> to vector<128xf32>
    %180 = vector.shape_cast %179 : vector<128xf32> to vector<1x128xf32>
    %cst_147 = arith.constant 8.000000e+00 : f32
    %181 = vector.broadcast %cst_147 : f32 to vector<1x128xf32>
    %182 = arith.divf %180, %181 : vector<1x128xf32>
    %183 = vector.broadcast %182 : vector<1x128xf32> to vector<8x128xf32>
    %184 = arith.subf %174, %183 : vector<8x128xf32>
    %185 = arith.mulf %184, %184 : vector<8x128xf32>
    %cst_148 = arith.constant dense<0.000000e+00> : vector<128xf32>
    %186 = vector.multi_reduction <add>, %185, %cst_148 [0] : vector<8x128xf32> to vector<128xf32>
    %187 = vector.shape_cast %186 : vector<128xf32> to vector<1x128xf32>
    %cst_149 = arith.constant 8.000000e+00 : f32
    %188 = vector.broadcast %cst_149 : f32 to vector<1x128xf32>
    %189 = arith.divf %187, %188 : vector<1x128xf32>
    %190 = vector.broadcast %182 : vector<1x128xf32> to vector<8x128xf32>
    %191 = arith.subf %174, %190 : vector<8x128xf32>
    %cst_150 = arith.constant 9.99999974E-6 : f32
    %192 = vector.broadcast %cst_150 : f32 to vector<1x128xf32>
    %193 = arith.addf %189, %192 : vector<1x128xf32>
    %194 = math.rsqrt %193 : vector<1x128xf32>
    %195 = vector.broadcast %194 : vector<1x128xf32> to vector<8x128xf32>
    %196 = arith.mulf %191, %195 : vector<8x128xf32>
    %197 = vector.broadcast %176 : vector<1x128xf32> to vector<8x128xf32>
    %198 = arith.mulf %196, %197 : vector<8x128xf32>
    %199 = vector.broadcast %178 : vector<1x128xf32> to vector<8x128xf32>
    %200 = arith.addf %198, %199 : vector<8x128xf32>
    %c4 = arith.constant 4 : index
    %c0_151 = arith.constant 0 : index
    %c0_152 = arith.constant 0 : index
    %201 = vector.load %arg10[%c4, %c0_151, %c0_152] : memref<8x128x32xf32, #tpu.memory_space<vmem>>, vector<1x128x32xf32>
    %202 = vector.shape_cast %201 : vector<1x128x32xf32> to vector<128x32xf32>
    %cst_153 = arith.constant dense<0.000000e+00> : vector<8x32xf32>
    %203 = tpu.matmul %200, %202, %cst_153 {dimension_numbers = #tpu.dot_dimension_numbers<[1], [0], [0], [1], [0, 0, 1, 1], [], []>} : vector<8x128xf32>, vector<128x32xf32>, vector<8x32xf32> -> vector<8x32xf32>
    %c4_154 = arith.constant 4 : index
    %c0_155 = arith.constant 0 : index
    %c0_156 = arith.constant 0 : index
    %204 = vector.load %arg11[%c4_154, %c0_155, %c0_156] : memref<8x128x32xf32, #tpu.memory_space<vmem>>, vector<1x128x32xf32>
    %205 = vector.shape_cast %204 : vector<1x128x32xf32> to vector<128x32xf32>
    %cst_157 = arith.constant dense<0.000000e+00> : vector<8x32xf32>
    %206 = tpu.matmul %200, %205, %cst_157 {dimension_numbers = #tpu.dot_dimension_numbers<[1], [0], [0], [1], [0, 0, 1, 1], [], []>} : vector<8x128xf32>, vector<128x32xf32>, vector<8x32xf32> -> vector<8x32xf32>
    %c4_158 = arith.constant 4 : index
    %c0_159 = arith.constant 0 : index
    %c0_160 = arith.constant 0 : index
    %207 = vector.load %arg12[%c4_158, %c0_159, %c0_160] : memref<8x128x32xf32, #tpu.memory_space<vmem>>, vector<1x128x32xf32>
    %208 = vector.shape_cast %207 : vector<1x128x32xf32> to vector<128x32xf32>
    %cst_161 = arith.constant dense<0.000000e+00> : vector<8x32xf32>
    %209 = tpu.matmul %200, %208, %cst_161 {dimension_numbers = #tpu.dot_dimension_numbers<[1], [0], [0], [1], [0, 0, 1, 1], [], []>} : vector<8x128xf32>, vector<128x32xf32>, vector<8x32xf32> -> vector<8x32xf32>
    %cst_162 = arith.constant dense<0.000000e+00> : vector<8x8xf32>
    %210 = tpu.matmul %203, %206, %cst_162 {dimension_numbers = #tpu.dot_dimension_numbers<[1], [1], [0], [0], [0, 0, 1, 0], [], []>} : vector<8x32xf32>, vector<8x32xf32>, vector<8x8xf32> -> vector<8x8xf32>
    %cst_163 = arith.constant 0.176776692 : f32
    %211 = vector.broadcast %cst_163 : f32 to vector<8x8xf32>
    %212 = arith.mulf %210, %211 : vector<8x8xf32>
    %cst_164 = arith.constant dense<0xFF800000> : vector<8xf32>
    %213 = vector.multi_reduction <maximumf>, %212, %cst_164 [1] : vector<8x8xf32> to vector<8xf32>
    %214 = vector.shape_cast %213 : vector<8xf32> to vector<8x1xf32>
    %215 = vector.broadcast %214 : vector<8x1xf32> to vector<8x8xf32>
    %216 = arith.subf %212, %215 : vector<8x8xf32>
    %217 = math.exp %216 : vector<8x8xf32>
    %cst_165 = arith.constant dense<0.000000e+00> : vector<8xf32>
    %218 = vector.multi_reduction <add>, %217, %cst_165 [1] : vector<8x8xf32> to vector<8xf32>
    %219 = vector.shape_cast %218 : vector<8xf32> to vector<8x1xf32>
    %220 = vector.broadcast %219 : vector<8x1xf32> to vector<8x8xf32>
    %221 = arith.divf %217, %220 : vector<8x8xf32>
    %cst_166 = arith.constant dense<0.000000e+00> : vector<8x32xf32>
    %222 = tpu.matmul %221, %209, %cst_166 {dimension_numbers = #tpu.dot_dimension_numbers<[1], [0], [0], [1], [0, 0, 1, 1], [], []>} : vector<8x8xf32>, vector<8x32xf32>, vector<8x32xf32> -> vector<8x32xf32>
    %c4_167 = arith.constant 4 : index
    %c0_168 = arith.constant 0 : index
    %c0_169 = arith.constant 0 : index
    %223 = vector.load %arg13[%c4_167, %c0_168, %c0_169] : memref<8x32x128xf32, #tpu.memory_space<vmem>>, vector<1x32x128xf32>
    %224 = vector.shape_cast %223 : vector<1x32x128xf32> to vector<32x128xf32>
    %cst_170 = arith.constant dense<0.000000e+00> : vector<8x128xf32>
    %225 = tpu.matmul %222, %224, %cst_170 {dimension_numbers = #tpu.dot_dimension_numbers<[1], [0], [0], [1], [0, 0, 1, 1], [], []>} : vector<8x32xf32>, vector<32x128xf32>, vector<8x128xf32> -> vector<8x128xf32>
    %c5 = arith.constant 5 : index
    %c0_171 = arith.constant 0 : index
    %c0_172 = arith.constant 0 : index
    %226 = vector.load %arg10[%c5, %c0_171, %c0_172] : memref<8x128x32xf32, #tpu.memory_space<vmem>>, vector<1x128x32xf32>
    %227 = vector.shape_cast %226 : vector<1x128x32xf32> to vector<128x32xf32>
    %cst_173 = arith.constant dense<0.000000e+00> : vector<8x32xf32>
    %228 = tpu.matmul %200, %227, %cst_173 {dimension_numbers = #tpu.dot_dimension_numbers<[1], [0], [0], [1], [0, 0, 1, 1], [], []>} : vector<8x128xf32>, vector<128x32xf32>, vector<8x32xf32> -> vector<8x32xf32>
    %c5_174 = arith.constant 5 : index
    %c0_175 = arith.constant 0 : index
    %c0_176 = arith.constant 0 : index
    %229 = vector.load %arg11[%c5_174, %c0_175, %c0_176] : memref<8x128x32xf32, #tpu.memory_space<vmem>>, vector<1x128x32xf32>
    %230 = vector.shape_cast %229 : vector<1x128x32xf32> to vector<128x32xf32>
    %cst_177 = arith.constant dense<0.000000e+00> : vector<8x32xf32>
    %231 = tpu.matmul %200, %230, %cst_177 {dimension_numbers = #tpu.dot_dimension_numbers<[1], [0], [0], [1], [0, 0, 1, 1], [], []>} : vector<8x128xf32>, vector<128x32xf32>, vector<8x32xf32> -> vector<8x32xf32>
    %c5_178 = arith.constant 5 : index
    %c0_179 = arith.constant 0 : index
    %c0_180 = arith.constant 0 : index
    %232 = vector.load %arg12[%c5_178, %c0_179, %c0_180] : memref<8x128x32xf32, #tpu.memory_space<vmem>>, vector<1x128x32xf32>
    %233 = vector.shape_cast %232 : vector<1x128x32xf32> to vector<128x32xf32>
    %cst_181 = arith.constant dense<0.000000e+00> : vector<8x32xf32>
    %234 = tpu.matmul %200, %233, %cst_181 {dimension_numbers = #tpu.dot_dimension_numbers<[1], [0], [0], [1], [0, 0, 1, 1], [], []>} : vector<8x128xf32>, vector<128x32xf32>, vector<8x32xf32> -> vector<8x32xf32>
    %cst_182 = arith.constant dense<0.000000e+00> : vector<8x8xf32>
    %235 = tpu.matmul %228, %231, %cst_182 {dimension_numbers = #tpu.dot_dimension_numbers<[1], [1], [0], [0], [0, 0, 1, 0], [], []>} : vector<8x32xf32>, vector<8x32xf32>, vector<8x8xf32> -> vector<8x8xf32>
    %cst_183 = arith.constant 0.176776692 : f32
    %236 = vector.broadcast %cst_183 : f32 to vector<8x8xf32>
    %237 = arith.mulf %235, %236 : vector<8x8xf32>
    %cst_184 = arith.constant dense<0xFF800000> : vector<8xf32>
    %238 = vector.multi_reduction <maximumf>, %237, %cst_184 [1] : vector<8x8xf32> to vector<8xf32>
    %239 = vector.shape_cast %238 : vector<8xf32> to vector<8x1xf32>
    %240 = vector.broadcast %239 : vector<8x1xf32> to vector<8x8xf32>
    %241 = arith.subf %237, %240 : vector<8x8xf32>
    %242 = math.exp %241 : vector<8x8xf32>
    %cst_185 = arith.constant dense<0.000000e+00> : vector<8xf32>
    %243 = vector.multi_reduction <add>, %242, %cst_185 [1] : vector<8x8xf32> to vector<8xf32>
    %244 = vector.shape_cast %243 : vector<8xf32> to vector<8x1xf32>
    %245 = vector.broadcast %244 : vector<8x1xf32> to vector<8x8xf32>
    %246 = arith.divf %242, %245 : vector<8x8xf32>
    %cst_186 = arith.constant dense<0.000000e+00> : vector<8x32xf32>
    %247 = tpu.matmul %246, %234, %cst_186 {dimension_numbers = #tpu.dot_dimension_numbers<[1], [0], [0], [1], [0, 0, 1, 1], [], []>} : vector<8x8xf32>, vector<8x32xf32>, vector<8x32xf32> -> vector<8x32xf32>
    %c5_187 = arith.constant 5 : index
    %c0_188 = arith.constant 0 : index
    %c0_189 = arith.constant 0 : index
    %248 = vector.load %arg13[%c5_187, %c0_188, %c0_189] : memref<8x32x128xf32, #tpu.memory_space<vmem>>, vector<1x32x128xf32>
    %249 = vector.shape_cast %248 : vector<1x32x128xf32> to vector<32x128xf32>
    %cst_190 = arith.constant dense<0.000000e+00> : vector<8x128xf32>
    %250 = tpu.matmul %247, %249, %cst_190 {dimension_numbers = #tpu.dot_dimension_numbers<[1], [0], [0], [1], [0, 0, 1, 1], [], []>} : vector<8x32xf32>, vector<32x128xf32>, vector<8x128xf32> -> vector<8x128xf32>
    %251 = arith.addf %225, %250 : vector<8x128xf32>
    %c6 = arith.constant 6 : index
    %c0_191 = arith.constant 0 : index
    %c0_192 = arith.constant 0 : index
    %252 = vector.load %arg10[%c6, %c0_191, %c0_192] : memref<8x128x32xf32, #tpu.memory_space<vmem>>, vector<1x128x32xf32>
    %253 = vector.shape_cast %252 : vector<1x128x32xf32> to vector<128x32xf32>
    %cst_193 = arith.constant dense<0.000000e+00> : vector<8x32xf32>
    %254 = tpu.matmul %200, %253, %cst_193 {dimension_numbers = #tpu.dot_dimension_numbers<[1], [0], [0], [1], [0, 0, 1, 1], [], []>} : vector<8x128xf32>, vector<128x32xf32>, vector<8x32xf32> -> vector<8x32xf32>
    %c6_194 = arith.constant 6 : index
    %c0_195 = arith.constant 0 : index
    %c0_196 = arith.constant 0 : index
    %255 = vector.load %arg11[%c6_194, %c0_195, %c0_196] : memref<8x128x32xf32, #tpu.memory_space<vmem>>, vector<1x128x32xf32>
    %256 = vector.shape_cast %255 : vector<1x128x32xf32> to vector<128x32xf32>
    %cst_197 = arith.constant dense<0.000000e+00> : vector<8x32xf32>
    %257 = tpu.matmul %200, %256, %cst_197 {dimension_numbers = #tpu.dot_dimension_numbers<[1], [0], [0], [1], [0, 0, 1, 1], [], []>} : vector<8x128xf32>, vector<128x32xf32>, vector<8x32xf32> -> vector<8x32xf32>
    %c6_198 = arith.constant 6 : index
    %c0_199 = arith.constant 0 : index
    %c0_200 = arith.constant 0 : index
    %258 = vector.load %arg12[%c6_198, %c0_199, %c0_200] : memref<8x128x32xf32, #tpu.memory_space<vmem>>, vector<1x128x32xf32>
    %259 = vector.shape_cast %258 : vector<1x128x32xf32> to vector<128x32xf32>
    %cst_201 = arith.constant dense<0.000000e+00> : vector<8x32xf32>
    %260 = tpu.matmul %200, %259, %cst_201 {dimension_numbers = #tpu.dot_dimension_numbers<[1], [0], [0], [1], [0, 0, 1, 1], [], []>} : vector<8x128xf32>, vector<128x32xf32>, vector<8x32xf32> -> vector<8x32xf32>
    %cst_202 = arith.constant dense<0.000000e+00> : vector<8x8xf32>
    %261 = tpu.matmul %254, %257, %cst_202 {dimension_numbers = #tpu.dot_dimension_numbers<[1], [1], [0], [0], [0, 0, 1, 0], [], []>} : vector<8x32xf32>, vector<8x32xf32>, vector<8x8xf32> -> vector<8x8xf32>
    %cst_203 = arith.constant 0.176776692 : f32
    %262 = vector.broadcast %cst_203 : f32 to vector<8x8xf32>
    %263 = arith.mulf %261, %262 : vector<8x8xf32>
    %cst_204 = arith.constant dense<0xFF800000> : vector<8xf32>
    %264 = vector.multi_reduction <maximumf>, %263, %cst_204 [1] : vector<8x8xf32> to vector<8xf32>
    %265 = vector.shape_cast %264 : vector<8xf32> to vector<8x1xf32>
    %266 = vector.broadcast %265 : vector<8x1xf32> to vector<8x8xf32>
    %267 = arith.subf %263, %266 : vector<8x8xf32>
    %268 = math.exp %267 : vector<8x8xf32>
    %cst_205 = arith.constant dense<0.000000e+00> : vector<8xf32>
    %269 = vector.multi_reduction <add>, %268, %cst_205 [1] : vector<8x8xf32> to vector<8xf32>
    %270 = vector.shape_cast %269 : vector<8xf32> to vector<8x1xf32>
    %271 = vector.broadcast %270 : vector<8x1xf32> to vector<8x8xf32>
    %272 = arith.divf %268, %271 : vector<8x8xf32>
    %cst_206 = arith.constant dense<0.000000e+00> : vector<8x32xf32>
    %273 = tpu.matmul %272, %260, %cst_206 {dimension_numbers = #tpu.dot_dimension_numbers<[1], [0], [0], [1], [0, 0, 1, 1], [], []>} : vector<8x8xf32>, vector<8x32xf32>, vector<8x32xf32> -> vector<8x32xf32>
    %c6_207 = arith.constant 6 : index
    %c0_208 = arith.constant 0 : index
    %c0_209 = arith.constant 0 : index
    %274 = vector.load %arg13[%c6_207, %c0_208, %c0_209] : memref<8x32x128xf32, #tpu.memory_space<vmem>>, vector<1x32x128xf32>
    %275 = vector.shape_cast %274 : vector<1x32x128xf32> to vector<32x128xf32>
    %cst_210 = arith.constant dense<0.000000e+00> : vector<8x128xf32>
    %276 = tpu.matmul %273, %275, %cst_210 {dimension_numbers = #tpu.dot_dimension_numbers<[1], [0], [0], [1], [0, 0, 1, 1], [], []>} : vector<8x32xf32>, vector<32x128xf32>, vector<8x128xf32> -> vector<8x128xf32>
    %277 = arith.addf %251, %276 : vector<8x128xf32>
    %c7 = arith.constant 7 : index
    %c0_211 = arith.constant 0 : index
    %c0_212 = arith.constant 0 : index
    %278 = vector.load %arg10[%c7, %c0_211, %c0_212] : memref<8x128x32xf32, #tpu.memory_space<vmem>>, vector<1x128x32xf32>
    %279 = vector.shape_cast %278 : vector<1x128x32xf32> to vector<128x32xf32>
    %cst_213 = arith.constant dense<0.000000e+00> : vector<8x32xf32>
    %280 = tpu.matmul %200, %279, %cst_213 {dimension_numbers = #tpu.dot_dimension_numbers<[1], [0], [0], [1], [0, 0, 1, 1], [], []>} : vector<8x128xf32>, vector<128x32xf32>, vector<8x32xf32> -> vector<8x32xf32>
    %c7_214 = arith.constant 7 : index
    %c0_215 = arith.constant 0 : index
    %c0_216 = arith.constant 0 : index
    %281 = vector.load %arg11[%c7_214, %c0_215, %c0_216] : memref<8x128x32xf32, #tpu.memory_space<vmem>>, vector<1x128x32xf32>
    %282 = vector.shape_cast %281 : vector<1x128x32xf32> to vector<128x32xf32>
    %cst_217 = arith.constant dense<0.000000e+00> : vector<8x32xf32>
    %283 = tpu.matmul %200, %282, %cst_217 {dimension_numbers = #tpu.dot_dimension_numbers<[1], [0], [0], [1], [0, 0, 1, 1], [], []>} : vector<8x128xf32>, vector<128x32xf32>, vector<8x32xf32> -> vector<8x32xf32>
    %c7_218 = arith.constant 7 : index
    %c0_219 = arith.constant 0 : index
    %c0_220 = arith.constant 0 : index
    %284 = vector.load %arg12[%c7_218, %c0_219, %c0_220] : memref<8x128x32xf32, #tpu.memory_space<vmem>>, vector<1x128x32xf32>
    %285 = vector.shape_cast %284 : vector<1x128x32xf32> to vector<128x32xf32>
    %cst_221 = arith.constant dense<0.000000e+00> : vector<8x32xf32>
    %286 = tpu.matmul %200, %285, %cst_221 {dimension_numbers = #tpu.dot_dimension_numbers<[1], [0], [0], [1], [0, 0, 1, 1], [], []>} : vector<8x128xf32>, vector<128x32xf32>, vector<8x32xf32> -> vector<8x32xf32>
    %cst_222 = arith.constant dense<0.000000e+00> : vector<8x8xf32>
    %287 = tpu.matmul %280, %283, %cst_222 {dimension_numbers = #tpu.dot_dimension_numbers<[1], [1], [0], [0], [0, 0, 1, 0], [], []>} : vector<8x32xf32>, vector<8x32xf32>, vector<8x8xf32> -> vector<8x8xf32>
    %cst_223 = arith.constant 0.176776692 : f32
    %288 = vector.broadcast %cst_223 : f32 to vector<8x8xf32>
    %289 = arith.mulf %287, %288 : vector<8x8xf32>
    %cst_224 = arith.constant dense<0xFF800000> : vector<8xf32>
    %290 = vector.multi_reduction <maximumf>, %289, %cst_224 [1] : vector<8x8xf32> to vector<8xf32>
    %291 = vector.shape_cast %290 : vector<8xf32> to vector<8x1xf32>
    %292 = vector.broadcast %291 : vector<8x1xf32> to vector<8x8xf32>
    %293 = arith.subf %289, %292 : vector<8x8xf32>
    %294 = math.exp %293 : vector<8x8xf32>
    %cst_225 = arith.constant dense<0.000000e+00> : vector<8xf32>
    %295 = vector.multi_reduction <add>, %294, %cst_225 [1] : vector<8x8xf32> to vector<8xf32>
    %296 = vector.shape_cast %295 : vector<8xf32> to vector<8x1xf32>
    %297 = vector.broadcast %296 : vector<8x1xf32> to vector<8x8xf32>
    %298 = arith.divf %294, %297 : vector<8x8xf32>
    %cst_226 = arith.constant dense<0.000000e+00> : vector<8x32xf32>
    %299 = tpu.matmul %298, %286, %cst_226 {dimension_numbers = #tpu.dot_dimension_numbers<[1], [0], [0], [1], [0, 0, 1, 1], [], []>} : vector<8x8xf32>, vector<8x32xf32>, vector<8x32xf32> -> vector<8x32xf32>
    %c7_227 = arith.constant 7 : index
    %c0_228 = arith.constant 0 : index
    %c0_229 = arith.constant 0 : index
    %300 = vector.load %arg13[%c7_227, %c0_228, %c0_229] : memref<8x32x128xf32, #tpu.memory_space<vmem>>, vector<1x32x128xf32>
    %301 = vector.shape_cast %300 : vector<1x32x128xf32> to vector<32x128xf32>
    %cst_230 = arith.constant dense<0.000000e+00> : vector<8x128xf32>
    %302 = tpu.matmul %299, %301, %cst_230 {dimension_numbers = #tpu.dot_dimension_numbers<[1], [0], [0], [1], [0, 0, 1, 1], [], []>} : vector<8x32xf32>, vector<32x128xf32>, vector<8x128xf32> -> vector<8x128xf32>
    %303 = arith.addf %277, %302 : vector<8x128xf32>
    %c1_231 = arith.constant 1 : index
    %c0_232 = arith.constant 0 : index
    %c0_233 = arith.constant 0 : index
    %304 = vector.load %arg14[%c1_231, %c0_232, %c0_233] : memref<2x1x128xf32, #tpu.memory_space<vmem>>, vector<1x1x128xf32>
    %305 = vector.shape_cast %304 : vector<1x1x128xf32> to vector<1x128xf32>
    %306 = vector.broadcast %305 : vector<1x128xf32> to vector<8x128xf32>
    %307 = arith.addf %303, %306 : vector<8x128xf32>
    %308 = arith.addf %200, %307 : vector<8x128xf32>
    %c1_234 = arith.constant 1 : index
    %c0_235 = arith.constant 0 : index
    %c0_236 = arith.constant 0 : index
    %309 = vector.load %arg15[%c1_234, %c0_235, %c0_236] : memref<2x1x128xf32, #tpu.memory_space<vmem>>, vector<1x1x128xf32>
    %310 = vector.shape_cast %309 : vector<1x1x128xf32> to vector<1x128xf32>
    %c1_237 = arith.constant 1 : index
    %c0_238 = arith.constant 0 : index
    %c0_239 = arith.constant 0 : index
    %311 = vector.load %arg16[%c1_237, %c0_238, %c0_239] : memref<2x1x128xf32, #tpu.memory_space<vmem>>, vector<1x1x128xf32>
    %312 = vector.shape_cast %311 : vector<1x1x128xf32> to vector<1x128xf32>
    %cst_240 = arith.constant dense<0.000000e+00> : vector<128xf32>
    %313 = vector.multi_reduction <add>, %308, %cst_240 [0] : vector<8x128xf32> to vector<128xf32>
    %314 = vector.shape_cast %313 : vector<128xf32> to vector<1x128xf32>
    %cst_241 = arith.constant 8.000000e+00 : f32
    %315 = vector.broadcast %cst_241 : f32 to vector<1x128xf32>
    %316 = arith.divf %314, %315 : vector<1x128xf32>
    %317 = vector.broadcast %316 : vector<1x128xf32> to vector<8x128xf32>
    %318 = arith.subf %308, %317 : vector<8x128xf32>
    %319 = arith.mulf %318, %318 : vector<8x128xf32>
    %cst_242 = arith.constant dense<0.000000e+00> : vector<128xf32>
    %320 = vector.multi_reduction <add>, %319, %cst_242 [0] : vector<8x128xf32> to vector<128xf32>
    %321 = vector.shape_cast %320 : vector<128xf32> to vector<1x128xf32>
    %cst_243 = arith.constant 8.000000e+00 : f32
    %322 = vector.broadcast %cst_243 : f32 to vector<1x128xf32>
    %323 = arith.divf %321, %322 : vector<1x128xf32>
    %324 = vector.broadcast %316 : vector<1x128xf32> to vector<8x128xf32>
    %325 = arith.subf %308, %324 : vector<8x128xf32>
    %cst_244 = arith.constant 9.99999974E-6 : f32
    %326 = vector.broadcast %cst_244 : f32 to vector<1x128xf32>
    %327 = arith.addf %323, %326 : vector<1x128xf32>
    %328 = math.rsqrt %327 : vector<1x128xf32>
    %329 = vector.broadcast %328 : vector<1x128xf32> to vector<8x128xf32>
    %330 = arith.mulf %325, %329 : vector<8x128xf32>
    %331 = vector.broadcast %310 : vector<1x128xf32> to vector<8x128xf32>
    %332 = arith.mulf %330, %331 : vector<8x128xf32>
    %333 = vector.broadcast %312 : vector<1x128xf32> to vector<8x128xf32>
    %334 = arith.addf %332, %333 : vector<8x128xf32>
    %c1_245 = arith.constant 1 : index
    %c0_246 = arith.constant 0 : index
    %c0_247 = arith.constant 0 : index
    %335 = vector.load %arg17[%c1_245, %c0_246, %c0_247] : memref<2x128x256xf32, #tpu.memory_space<vmem>>, vector<1x128x256xf32>
    %336 = vector.shape_cast %335 : vector<1x128x256xf32> to vector<128x256xf32>
    %cst_248 = arith.constant dense<0.000000e+00> : vector<8x256xf32>
    %337 = tpu.matmul %334, %336, %cst_248 {dimension_numbers = #tpu.dot_dimension_numbers<[1], [0], [0], [1], [0, 0, 1, 1], [], []>} : vector<8x128xf32>, vector<128x256xf32>, vector<8x256xf32> -> vector<8x256xf32>
    %c1_249 = arith.constant 1 : index
    %c0_250 = arith.constant 0 : index
    %c0_251 = arith.constant 0 : index
    %338 = vector.load %arg18[%c1_249, %c0_250, %c0_251] : memref<2x1x256xf32, #tpu.memory_space<vmem>>, vector<1x1x256xf32>
    %339 = vector.shape_cast %338 : vector<1x1x256xf32> to vector<1x256xf32>
    %340 = vector.broadcast %339 : vector<1x256xf32> to vector<8x256xf32>
    %341 = arith.addf %337, %340 : vector<8x256xf32>
    %cst_252 = arith.constant 0.000000e+00 : f32
    %342 = vector.broadcast %cst_252 : f32 to vector<8x256xf32>
    %343 = arith.maximumf %341, %342 : vector<8x256xf32>
    %c1_253 = arith.constant 1 : index
    %c0_254 = arith.constant 0 : index
    %c0_255 = arith.constant 0 : index
    %344 = vector.load %arg19[%c1_253, %c0_254, %c0_255] : memref<2x256x128xf32, #tpu.memory_space<vmem>>, vector<1x256x128xf32>
    %345 = vector.shape_cast %344 : vector<1x256x128xf32> to vector<256x128xf32>
    %cst_256 = arith.constant dense<0.000000e+00> : vector<8x128xf32>
    %346 = tpu.matmul %343, %345, %cst_256 {dimension_numbers = #tpu.dot_dimension_numbers<[1], [0], [0], [1], [0, 0, 1, 1], [], []>} : vector<8x256xf32>, vector<256x128xf32>, vector<8x128xf32> -> vector<8x128xf32>
    %c1_257 = arith.constant 1 : index
    %c0_258 = arith.constant 0 : index
    %c0_259 = arith.constant 0 : index
    %347 = vector.load %arg20[%c1_257, %c0_258, %c0_259] : memref<2x1x128xf32, #tpu.memory_space<vmem>>, vector<1x1x128xf32>
    %348 = vector.shape_cast %347 : vector<1x1x128xf32> to vector<1x128xf32>
    %349 = vector.broadcast %348 : vector<1x128xf32> to vector<8x128xf32>
    %350 = arith.addf %346, %349 : vector<8x128xf32>
    %351 = arith.addf %334, %350 : vector<8x128xf32>
    %c1_260 = arith.constant 1 : index
    %c0_261 = arith.constant 0 : index
    %c0_262 = arith.constant 0 : index
    %352 = vector.load %arg21[%c1_260, %c0_261, %c0_262] : memref<2x1x128xf32, #tpu.memory_space<vmem>>, vector<1x1x128xf32>
    %353 = vector.shape_cast %352 : vector<1x1x128xf32> to vector<1x128xf32>
    %c1_263 = arith.constant 1 : index
    %c0_264 = arith.constant 0 : index
    %c0_265 = arith.constant 0 : index
    %354 = vector.load %arg22[%c1_263, %c0_264, %c0_265] : memref<2x1x128xf32, #tpu.memory_space<vmem>>, vector<1x1x128xf32>
    %355 = vector.shape_cast %354 : vector<1x1x128xf32> to vector<1x128xf32>
    %cst_266 = arith.constant dense<0.000000e+00> : vector<128xf32>
    %356 = vector.multi_reduction <add>, %351, %cst_266 [0] : vector<8x128xf32> to vector<128xf32>
    %357 = vector.shape_cast %356 : vector<128xf32> to vector<1x128xf32>
    %cst_267 = arith.constant 8.000000e+00 : f32
    %358 = vector.broadcast %cst_267 : f32 to vector<1x128xf32>
    %359 = arith.divf %357, %358 : vector<1x128xf32>
    %360 = vector.broadcast %359 : vector<1x128xf32> to vector<8x128xf32>
    %361 = arith.subf %351, %360 : vector<8x128xf32>
    %362 = arith.mulf %361, %361 : vector<8x128xf32>
    %cst_268 = arith.constant dense<0.000000e+00> : vector<128xf32>
    %363 = vector.multi_reduction <add>, %362, %cst_268 [0] : vector<8x128xf32> to vector<128xf32>
    %364 = vector.shape_cast %363 : vector<128xf32> to vector<1x128xf32>
    %cst_269 = arith.constant 8.000000e+00 : f32
    %365 = vector.broadcast %cst_269 : f32 to vector<1x128xf32>
    %366 = arith.divf %364, %365 : vector<1x128xf32>
    %367 = vector.broadcast %359 : vector<1x128xf32> to vector<8x128xf32>
    %368 = arith.subf %351, %367 : vector<8x128xf32>
    %cst_270 = arith.constant 9.99999974E-6 : f32
    %369 = vector.broadcast %cst_270 : f32 to vector<1x128xf32>
    %370 = arith.addf %366, %369 : vector<1x128xf32>
    %371 = math.rsqrt %370 : vector<1x128xf32>
    %372 = vector.broadcast %371 : vector<1x128xf32> to vector<8x128xf32>
    %373 = arith.mulf %368, %372 : vector<8x128xf32>
    %374 = vector.broadcast %353 : vector<1x128xf32> to vector<8x128xf32>
    %375 = arith.mulf %373, %374 : vector<8x128xf32>
    %376 = vector.broadcast %355 : vector<1x128xf32> to vector<8x128xf32>
    %377 = arith.addf %375, %376 : vector<8x128xf32>
    %c0_271 = arith.constant 0 : index
    %c0_272 = arith.constant 0 : index
    %c0_273 = arith.constant 0 : index
    %378 = vector.load %arg23[%c0_271, %c0_272, %c0_273] : memref<1x8x128xf32, #tpu.memory_space<vmem>>, vector<1x8x128xf32>
    %379 = vector.shape_cast %378 : vector<1x8x128xf32> to vector<8x128xf32>
    %380 = vector.shape_cast %377 : vector<8x128xf32> to vector<1x8x128xf32>
    tpu.vector_store %arg23[%c0_271, %c0_272, %c0_273], %380 {strides = array<i32>} : memref<1x8x128xf32, #tpu.memory_space<vmem>>, vector<1x8x128xf32>,
    return
  }
  func.func @transform_0(%arg0: i32) -> (i32, i32, i32) {
    %c0_i32 = arith.constant 0 : i32
    %c0_i32_0 = arith.constant 0 : i32
    %c0_i32_1 = arith.constant 0 : i32
    return %arg0, %c0_i32, %c0_i32_0 : i32, i32, i32
  }
  func.func @transform_1(%arg0: i32) -> (i32, i32, i32) {
    %c0_i32 = arith.constant 0 : i32
    %c0_i32_0 = arith.constant 0 : i32
    %c0_i32_1 = arith.constant 0 : i32
    return %arg0, %c0_i32, %c0_i32_0 : i32, i32, i32
  }
  func.func @transform_2(%arg0: i32) -> (i32, i32, i32) {
    %c0_i32 = arith.constant 0 : i32
    %c0_i32_0 = arith.constant 0 : i32
    %c0_i32_1 = arith.constant 0 : i32
    return %arg0, %c0_i32, %c0_i32_0 : i32, i32, i32
  }
  func.func @transform_3(%arg0: i32) -> (i32, i32) {
    %c0_i32 = arith.constant 0 : i32
    %c0_i32_0 = arith.constant 0 : i32
    %c0_i32_1 = arith.constant 0 : i32
    return %c0_i32, %c0_i32_0 : i32, i32
  }
  func.func @transform_4(%arg0: i32) -> (i32, i32) {
    %c0_i32 = arith.constant 0 : i32
    %c0_i32_0 = arith.constant 0 : i32
    %c0_i32_1 = arith.constant 0 : i32
    return %c0_i32, %c0_i32_0 : i32, i32
  }
  func.func @transform_5(%arg0: i32) -> (i32, i32) {
    %c0_i32 = arith.constant 0 : i32
    %c0_i32_0 = arith.constant 0 : i32
    %c0_i32_1 = arith.constant 0 : i32
    return %c0_i32, %c0_i32_0 : i32, i32
  }
  func.func @transform_6(%arg0: i32) -> (i32, i32) {
    %c0_i32 = arith.constant 0 : i32
    %c0_i32_0 = arith.constant 0 : i32
    %c0_i32_1 = arith.constant 0 : i32
    return %c0_i32, %c0_i32_0 : i32, i32
  }
  func.func @transform_7(%arg0: i32) -> (i32, i32) {
    %c0_i32 = arith.constant 0 : i32
    %c0_i32_0 = arith.constant 0 : i32
    %c0_i32_1 = arith.constant 0 : i32
    return %c0_i32, %c0_i32_0 : i32, i32
  }
  func.func @transform_8(%arg0: i32) -> (i32, i32) {
    %c0_i32 = arith.constant 0 : i32
    %c0_i32_0 = arith.constant 0 : i32
    %c0_i32_1 = arith.constant 0 : i32
    return %c0_i32, %c0_i32_0 : i32, i32
  }
  func.func @transform_9(%arg0: i32) -> (i32, i32, i32) {
    %c0_i32 = arith.constant 0 : i32
    %c0_i32_0 = arith.constant 0 : i32
    %c0_i32_1 = arith.constant 0 : i32
    %c0_i32_2 = arith.constant 0 : i32
    return %c0_i32, %c0_i32_0, %c0_i32_1 : i32, i32, i32
  }
  func.func @transform_10(%arg0: i32) -> (i32, i32, i32) {
    %c0_i32 = arith.constant 0 : i32
    %c0_i32_0 = arith.constant 0 : i32
    %c0_i32_1 = arith.constant 0 : i32
    %c0_i32_2 = arith.constant 0 : i32
    return %c0_i32, %c0_i32_0, %c0_i32_1 : i32, i32, i32
  }
  func.func @transform_11(%arg0: i32) -> (i32, i32, i32) {
    %c0_i32 = arith.constant 0 : i32
    %c0_i32_0 = arith.constant 0 : i32
    %c0_i32_1 = arith.constant 0 : i32
    %c0_i32_2 = arith.constant 0 : i32
    return %c0_i32, %c0_i32_0, %c0_i32_1 : i32, i32, i32
  }
  func.func @transform_12(%arg0: i32) -> (i32, i32, i32) {
    %c0_i32 = arith.constant 0 : i32
    %c0_i32_0 = arith.constant 0 : i32
    %c0_i32_1 = arith.constant 0 : i32
    %c0_i32_2 = arith.constant 0 : i32
    return %c0_i32, %c0_i32_0, %c0_i32_1 : i32, i32, i32
  }
  func.func @transform_13(%arg0: i32) -> (i32, i32, i32) {
    %c0_i32 = arith.constant 0 : i32
    %c0_i32_0 = arith.constant 0 : i32
    %c0_i32_1 = arith.constant 0 : i32
    %c0_i32_2 = arith.constant 0 : i32
    return %c0_i32, %c0_i32_0, %c0_i32_1 : i32, i32, i32
  }
  func.func @transform_14(%arg0: i32) -> (i32, i32, i32) {
    %c0_i32 = arith.constant 0 : i32
    %c0_i32_0 = arith.constant 0 : i32
    %c0_i32_1 = arith.constant 0 : i32
    %c0_i32_2 = arith.constant 0 : i32
    return %c0_i32, %c0_i32_0, %c0_i32_1 : i32, i32, i32
  }
  func.func @transform_15(%arg0: i32) -> (i32, i32, i32) {
    %c0_i32 = arith.constant 0 : i32
    %c0_i32_0 = arith.constant 0 : i32
    %c0_i32_1 = arith.constant 0 : i32
    %c0_i32_2 = arith.constant 0 : i32
    return %c0_i32, %c0_i32_0, %c0_i32_1 : i32, i32, i32
  }
  func.func @transform_16(%arg0: i32) -> (i32, i32, i32) {
    %c0_i32 = arith.constant 0 : i32
    %c0_i32_0 = arith.constant 0 : i32
    %c0_i32_1 = arith.constant 0 : i32
    %c0_i32_2 = arith.constant 0 : i32
    return %c0_i32, %c0_i32_0, %c0_i32_1 : i32, i32, i32
  }
  func.func @transform_17(%arg0: i32) -> (i32, i32, i32) {
    %c0_i32 = arith.constant 0 : i32
    %c0_i32_0 = arith.constant 0 : i32
    %c0_i32_1 = arith.constant 0 : i32
    %c0_i32_2 = arith.constant 0 : i32
    return %c0_i32, %c0_i32_0, %c0_i32_1 : i32, i32, i32
  }
  func.func @transform_18(%arg0: i32) -> (i32, i32, i32) {
    %c0_i32 = arith.constant 0 : i32
    %c0_i32_0 = arith.constant 0 : i32
    %c0_i32_1 = arith.constant 0 : i32
    %c0_i32_2 = arith.constant 0 : i32
    return %c0_i32, %c0_i32_0, %c0_i32_1 : i32, i32, i32
  }
  func.func @transform_19(%arg0: i32) -> (i32, i32, i32) {
    %c0_i32 = arith.constant 0 : i32
    %c0_i32_0 = arith.constant 0 : i32
    %c0_i32_1 = arith.constant 0 : i32
    %c0_i32_2 = arith.constant 0 : i32
    return %c0_i32, %c0_i32_0, %c0_i32_1 : i32, i32, i32
  }
  func.func @transform_20(%arg0: i32) -> (i32, i32, i32) {
    %c0_i32 = arith.constant 0 : i32
    %c0_i32_0 = arith.constant 0 : i32
    %c0_i32_1 = arith.constant 0 : i32
    %c0_i32_2 = arith.constant 0 : i32
    return %c0_i32, %c0_i32_0, %c0_i32_1 : i32, i32, i32
  }
  func.func @transform_21(%arg0: i32) -> (i32, i32, i32) {
    %c0_i32 = arith.constant 0 : i32
    %c0_i32_0 = arith.constant 0 : i32
    %c0_i32_1 = arith.constant 0 : i32
    %c0_i32_2 = arith.constant 0 : i32
    return %c0_i32, %c0_i32_0, %c0_i32_1 : i32, i32, i32
  }
  func.func @transform_22(%arg0: i32) -> (i32, i32, i32) {
    %c0_i32 = arith.constant 0 : i32
    %c0_i32_0 = arith.constant 0 : i32
    %c0_i32_1 = arith.constant 0 : i32
    return %arg0, %c0_i32, %c0_i32_0 : i32, i32, i32
  }
}

</mosaic_0001>

<bundles_post_ra>
// kernel: lrp_encoder_forward.1
= control target key start
LH: loop header
LB: loop body
LE: loop exit
PB: predicated region body
PF: predicated region fallthrough
CT: control target
= control target key end

     0   :  { %s11011_s0 = inlined_call_operand.vmem [shape: f32[2,1,8], index: 0, kind: input, shape index: {}]   ;;  %s11012_s1 = inlined_call_operand.vmem [shape: f32[2,2,8], index: 1, kind: input, shape index: {}]   ;;  %s11013_s2 = inlined_call_operand.vmem [shape: f32[2,5,8], index: 2, kind: input, shape index: {}]   ;;  %s11014_s3 = inlined_call_operand.vmem [shape: f32[8,128], index: 3, kind: input, shape index: {}]   ;;  %s11015_s4 = inlined_call_operand.vmem [shape: f32[1,128], index: 4, kind: input, shape index: {}]   ;;  %s11016_s5 = inlined_call_operand.vmem [shape: f32[8,128], index: 5, kind: input, shape index: {}]   ;;  %s11017_s6 = inlined_call_operand.vmem [shape: f32[1,128], index: 6, kind: input, shape index: {}]   ;;  %s11018_s7 = inlined_call_operand.vmem [shape: f32[8,128], index: 7, kind: input, shape index: {}]   ;;  %s11019_s8 = inlined_call_operand.vmem [shape: f32[1,128], index: 8, kind: input, shape index: {}]   ;;  %s11020_s9 = inlined_call_operand.vmem [shape: f32[8,128,32], index: 9, kind: input, shape index: {}]   ;;  %s11021_s10 = inlined_call_operand.vmem [shape: f32[8,128,32], index: 10, kind: input, shape index: {}]   ;;  %s11022_s11 = inlined_call_operand.vmem [shape: f32[8,128,32], index: 11, kind: input, shape index: {}]   ;;  %s11023_s12 = inlined_call_operand.vmem [shape: f32[8,32,128], index: 12, kind: input, shape index: {}]   ;;  %s11024_s13 = inlined_call_operand.vmem [shape: f32[2,1,128], index: 13, kind: input, shape index: {}]   ;;  %s11025_s14 = inlined_call_operand.vmem [shape: f32[2,1,128], index: 14, kind: input, shape index: {}]   ;;  %s11026_s15 = inlined_call_operand.vmem [shape: f32[2,1,128], index: 15, kind: input, shape index: {}]   ;;  %s11027_s16 = inlined_call_operand.vmem [shape: f32[2,128,256], index: 16, kind: input, shape index: {}]   ;;  %s11028_s17 = inlined_call_operand.vmem [shape: f32[2,1,256], index: 17, kind: input, shape index: {}]   ;;  %s11029_s18 = inlined_call_operand.vmem [shape: f32[2,256,128], index: 18, kind: input, shape index: {}]   ;;  %s11030_s19 = inlined_call_operand.vmem [shape: f32[2,1,128], index: 19, kind: input, shape index: {}]   ;;  %s11031_s20 = inlined_call_operand.vmem [shape: f32[2,1,128], index: 20, kind: input, shape index: {}]   ;;  %s11032_s21 = inlined_call_operand.vmem [shape: f32[2,1,128], index: 21, kind: input, shape index: {}]   ;;  %s11033_s22 = inlined_call_operand.hbm [shape: f32[2,8,128], index: 22, kind: output, shape index: {}]  }
   0x1   :  { %11044 = sst [smem:[#allocation14_spill]] %s11011_s0 }
   0x2   :  { %11045 = sst [smem:[#allocation15_spill]] %s11012_s1 }
   0x3   :  { %11046 = sst [smem:[#allocation16_spill]] %s11013_s2 }
   0x4   :  { %11047 = sst [smem:[#allocation17_spill]] %s11014_s3 }
   0x5   :  { %11048 = sst [smem:[#allocation18_spill]] %s11015_s4 }
   0x6   :  { %11049 = sst [smem:[#allocation19_spill]] %s11016_s5 }
   0x7   :  { %11050 = sst [smem:[#allocation20_spill]] %s11017_s6 }
   0x8   :  { %11051 = sst [smem:[#allocation21_spill]] %s11018_s7 }
   0x9   :  { %11052 = sst [smem:[#allocation22_spill]] %s11033_s22 }
   0xa   :  { %27 = vsyncpa [#allocation4], 0 }
   0xb   :  { %29 = vsyncpa [#allocation4 + $0x1], 0  ;;  %s8765_s3 = smov 0   ;;  %s8767_s28 = smov 0  }
   0xc   :  { %s8769_s29 = smov 0   ;;  %s8771_s30 = smov 0  }
   0xd LB: > { %11053 = sst [smem:[#allocation6_spill]] %s8632_s3  ;;  %s8786_s4 = sadd.s32 4294967295, %s8644_s30   ;;  %s8644_s30 = sphi %s8771_s30, %s11077_s30   ;;  %s8640_s29 = sphi %s8769_s29, %s11082_s29   ;;  %s8636_s28 = sphi %s8767_s28, %s11081_s28   ;;  %s8632_s3 = sphi %s8765_s3, %s11080_s3  }
   0xe   : > { %11054 = sst [smem:[#allocation7_spill]] %s8640_s29  ;;  %s5673_s0 = sadd.s32 4294967294, %s8644_s30  }
   0xf   : > { %11055 = sst [smem:[#allocation8_spill]] %s8644_s30  ;;  %s8790_s23 = sadd.s32 1, %s8644_s30  }
  0x10   : > { %11056 = sst [smem:[#allocation9_spill]] %s8786_s4  ;;  %s519_s1 = sadd.s32 1, %s8640_s29 }
  0x11   : > { %11057 = sst [smem:[#allocation10_spill]] %s8790_s23  ;;  %s516_s5 = ssub.s32 %s8644_s30, %s8790_s23 }
  0x12   : > { %p529_p0 = scmp.ne.s32.totalorder %s8640_s29, %s8636_s28  ;;  %p517_p1 = scmp.eq.s32.totalorder %s516_s5, 0 }
  0x13   : > { %p530_p2 = scmp.eq.s32.totalorder %s8786_s4, 1  ;;  %p535_p3 = scmp.ne.s32.totalorder %s8636_s28, %s8632_s3 }
  0x14   : > { %p536_p4 = scmp.eq.s32.totalorder %s5673_s0, 1  ;;  %p5676_p7 = scmp.ge.s32.totalorder %s8644_s30, 1 }
  0x15   : > { %s8801_s24 = scalar_select %p517_p1, %s8640_s29, %s519_s1  }
  0x16   : > { %p8803_p5 = por %p530_p2, %p529_p0  ;;  %p8807_p6 = por %p536_p4, %p535_p3 }
  0x17   : > { %11058 = sst [smem:[#allocation11_spill]] %s8801_s24  ;;  %p631_p8 = scmp.lt.s32.totalorder %s8644_s30, 3 }
  0x18   : > { %s11059_s6 = scalar_select %p8803_p5, 1, 0 }
  0x19   : > { %s11061_s25 = scalar_select %p8807_p6, 1, 0 }
  0x1a   : > { %11060 = sst [smem:[#allocation12_spill]] %s11059_s6  ;;  %p632_p9 = pnand %p5676_p7, %p631_p8 }
  0x1b   : > { %11062 = sst [smem:[#allocation13_spill]] %s11061_s25  ;;  %s11063_s27 = sld [smem:[#allocation17_spill]] (!%p632_p9)  ;;  %v8646_v1 = vmov (!%p632_p9), 0.0   ;;  %vm8647_vm0 = vmmov (!%p632_p9), 0   ;;  %v955_v3 = vld [vmem:[%s11020_s9] sm:$0xff] (!%p632_p9)  ;;  %v956_v4 = vld [vmem:[%s11020_s9 + $0x8] sm:$0xff] (!%p632_p9) }
  0x1c   : > { %635 = sbr.rel (%p632_p9) target bundleno = 9183 (0x23df), region = 108  ;;  %p699_p10 = scmp.lt.s32.totalorder (!%p632_p9), %s8786_s4, 1  ;;  %6724 = vmatprep.subr.mxu0 (!%p632_p9), %v8646_v1  ;;  %6726 = vmatprep.mubr.msk.f32.mxu0 (!%p632_p9), %vm8647_vm0, %v8646_v1  ;;  %vm713_vm1 = vcmask (!%p632_p9), 64512   ;;  %v8648_v6 = vmov (!%p632_p9), 0.0|0.0   ;;  %v7748_v7 = vpack.c.bf16 (!%p632_p9), %v956_v4, %v955_v3  ;;  %v1041_v8 = vld [vmem:[%s11021_s10] sm:$0xff] (!%p632_p9)  ;;  %v1042_v9 = vld [vmem:[%s11021_s10 + $0x8] sm:$0xff] (!%p632_p9) }
  0x1d   : > { %s11064_s5 = sld [smem:[#allocation19_spill]] (!%p632_p9)  ;;  %6729 = vmatprep.subr.mxu1 (!%p632_p9), %v8646_v1  ;;  %s11065_s0 = sld [smem:[#allocation14_spill]] (!%p632_p9)  ;;  %6731 = vmatprep.mubr.msk.f32.mxu1 (!%p632_p9), %vm8647_vm0, %v8646_v1  ;;  %v957_v11 = vld [vmem:[%s11020_s9 + $0x10] sm:$0xff] (!%p632_p9)  ;;  %v958_v12 = vld [vmem:[%s11020_s9 + $0x18] sm:$0xff] (!%p632_p9)  ;;  %v7772_v15 = vpack.c.bf16 (!%p632_p9), %v1042_v9, %v1041_v8  ;;  %v959_v19 = vld [vmem:[%s11020_s9 + $0x20] sm:$0xff] (!%p632_p9)  ;;  %vm1213_vm2 = vcmask (!%p632_p9), 261120  }
  0x1e   : > { %s11066_s7 = sld [smem:[#allocation21_spill]] (!%p632_p9)  ;;  %s11067_s25 = sld [smem:[#allocation15_spill]] (!%p632_p9)  ;;  %v7751_v16 = vpack.c.bf16 (!%p632_p9), %v958_v12, %v957_v11  ;;  %v1043_v17 = vld [vmem:[%s11021_s10 + $0x10] sm:$0xff] (!%p632_p9)  ;;  %v1044_v18 = vld [vmem:[%s11021_s10 + $0x18] sm:$0xff] (!%p632_p9)  ;;  %v960_v20 = vld [vmem:[%s11020_s9 + $0x28] sm:$0xff] (!%p632_p9) }
  0x1f   : > { %s11068_s26 = sld [smem:[#allocation16_spill]] (!%p632_p9)  ;;  %v7775_v21 = vpack.c.bf16 (!%p632_p9), %v1044_v18, %v1043_v17  ;;  %v7754_v22 = vpack.c.bf16 (!%p632_p9), %v960_v20, %v959_v19  ;;  %v1045_v23 = vld [vmem:[%s11021_s10 + $0x20] sm:$0xff] (!%p632_p9)  ;;  %v1046_v24 = vld [vmem:[%s11021_s10 + $0x28] sm:$0xff] (!%p632_p9)  ;;  %v961_v25 = vld [vmem:[%s11020_s9 + $0x30] sm:$0xff] (!%p632_p9)  ;;  %s11069_s2 = sld [smem:[#allocation18_spill]] (!%p632_p9) }
  0x20   : > { %v962_v26 = vld [vmem:[%s11020_s9 + $0x38] sm:$0xff] (!%p632_p9)  ;;  %v7778_v27 = vpack.c.bf16 (!%p632_p9), %v1046_v24, %v1045_v23  ;;  %v1047_v29 = vld [vmem:[%s11021_s10 + $0x30] sm:$0xff] (!%p632_p9)  ;;  %v963_v31 = vld [vmem:[%s11020_s9 + $0x40] sm:$0xff] (!%p632_p9)  ;;  %s11073_s22 = sld [smem:[#allocation22_spill]] (!%p632_p9) }
  0x21   : > { %v711_v0 = vld [vmem:[%s11063_s27] sm:$0xff] (!%p632_p9)  ;;  %v7757_v28 = vpack.c.bf16 (!%p632_p9), %v962_v26, %v961_v25  ;;  %v1048_v30 = vld [vmem:[%s11021_s10 + $0x38] sm:$0xff] (!%p632_p9)  ;;  %v964_v32 = vld [vmem:[%s11020_s9 + $0x48] sm:$0xff] (!%p632_p9) }
  0x22   : > { %6725 = vmatpush3.msra.mxu0 (!%p632_p9), %v711_v0  ;;  %v7781_v33 = vpack.c.bf16 (!%p632_p9), %v1048_v30, %v1047_v29  ;;  %v7760_v34 = vpack.c.bf16 (!%p632_p9), %v964_v32, %v963_v31  ;;  %v1049_v35 = vld [vmem:[%s11021_s10 + $0x40] sm:$0xff] (!%p632_p9)  ;;  %v1050_v36 = vld [vmem:[%s11021_s10 + $0x48] sm:$0xff] (!%p632_p9)  ;;  %v965_v38 = vld [vmem:[%s11020_s9 + $0x50] sm:$0xff] (!%p632_p9) }
  0x23   : > { %v789_v2 = vld [vmem:[%s11064_s5] sm:$0xff]  ;;  %s700_s27 = scalar_select %p699_p10, %s8786_s4, 1  ;;  %6734 = vmatprep.subr.mxu0 %v8646_v1  ;;  %v7784_v37 = vpack.c.bf16 %v1050_v36, %v1049_v35  ;;  %v966_v39 = vld [vmem:[%s11020_s9 + $0x58] sm:$0xff]  ;;  %v1051_v41 = vld [vmem:[%s11021_s10 + $0x50] sm:$0xff] }
  0x24   : > { %6730 = vmatpush3.msra.mxu1 %v789_v2  ;;  %v872_v5 = vld [vmem:[%s11066_s7] sm:$0xff]  ;;  %v7763_v40 = vpack.c.bf16 %v966_v39, %v965_v38  ;;  %v1052_v42 = vld [vmem:[%s11021_s10 + $0x58] sm:$0xff]  ;;  %v968_v45 = vld [vmem:[%s11020_s9 + $0x68] sm:$0xff] }
  0x25   : > { %s701_s1 = scalar_lea.vmem %s11065_s0, %s700_s27  ;;  %s5678_s29 = sshll.u32 %s700_s27, 1  ;;  %7747 = vmatprep.subr.bf16.mxu1 %v8648_v6  ;;  %v7787_v43 = vpack.c.bf16 %v1052_v42, %v1051_v41  ;;  %v967_v44 = vld [vmem:[%s11020_s9 + $0x60] sm:$0xff]  ;;  %v1054_v48 = vld [vmem:[%s11021_s10 + $0x68] sm:$0xff]  ;;  %v969_v50 = vld [vmem:[%s11020_s9 + $0x70] sm:$0xff] }
  0x26   : > { %v710_v10 = vld [vmem:[%s701_s1] sm:$0x1]  ;;  %s705_s0 = scalar_lea.vmem %s11067_s25, %s5678_s29  ;;  %s5679_s5 = sshll.u32 %s700_s27, 3  ;;  %v7766_v46 = vpack.c.bf16 %v968_v45, %v967_v44  ;;  %v970_v51 = vld [vmem:[%s11020_s9 + $0x78] sm:$0xff]  ;;  %v1055_v53 = vld [vmem:[%s11021_s10 + $0x70] sm:$0xff] }
  0x27   : > { %6727 = vmatmul.mubr.msk.f32.vlgmr.msra.gmra.mrb[0].mxu0 %vm713_vm1, %v710_v10  ;;  %v788_v13 = vld [vmem:[%s705_s0] sm:$0x3]  ;;  %s709_s1 = scalar_lea.vmem %s11068_s26, %s5679_s5  ;;  %v7769_v52 = vpack.c.bf16 %v970_v51, %v969_v50  ;;  %v1056_v54 = vld [vmem:[%s11021_s10 + $0x78] sm:$0xff]  ;;  %s11070_s25 = sld [smem:[#allocation20_spill]]  ;;  %v1129_v9 = vld [vmem:[%s11022_s11 + $0x10] sm:$0xff] }
  0x28   : > { %6735 = vmatpush3.msra.mxu0 %v872_v5  ;;  %6732 = vmatmul.mubr.msk.f32.vlgmr.msra.gmra.mrb[0].mxu1 %vm713_vm1, %v788_v13  ;;  %v871_v14 = vld [vmem:[%s709_s1] sm:$0x1f]  ;;  %v7793_v55 = vpack.c.bf16 %v1056_v54, %v1055_v53  ;;  %v1130_v10 = vld [vmem:[%s11022_s11 + $0x18] sm:$0xff]  ;;  %v1136_v20 = vld [vmem:[%s11022_s11 + $0x48] sm:$0xff]  ;;  %s11071_s27 = sld [smem:[#allocation9_spill]]  ;;  %s696_s29 = sand.u32 1, %s8636_s28  }
  0x29   : > { %6736 = vmatprep.mubr.msk.f32.mxu0 %vm8647_vm0, %v8646_v1  ;;  %7749 = vmatpush3.bf16.msra.mxu1 %v7748_v7  ;;  %v1053_v47 = vld [vmem:[%s11021_s10 + $0x60] sm:$0xff]  ;;  %v1128_v7 = vld [vmem:[%s11022_s11 + $0x8] sm:$0xff]  ;;  %v7799_v12 = vpack.c.bf16 %v1130_v10, %v1129_v9  ;;  %v1134_v17 = vld [vmem:[%s11022_s11 + $0x38] sm:$0xff]  ;;  %s5580_s6 = scalar_lea.sflag [#allocation4], %s696_s29 }
  0x2a   : > { %7771 = vmatprep.subr.bf16.mxu0 %v8648_v6  ;;  %7750 = vmatprep.subr.bf16.mxu1 %v8648_v6  ;;  %v7790_v49 = vpack.c.bf16 %v1054_v48, %v1053_v47  ;;  %v712_v56 = vld [vmem:[%s11069_s2] sm:$0x1]  ;;  %v1138_v23 = vld [vmem:[%s11022_s11 + $0x58] sm:$0xff]  ;;  %v1140_v26 = vld [vmem:[%s11022_s11 + $0x68] sm:$0xff]  ;;  %s5677_s2 = sshll.u32 %s696_s29, 3 }
  0x2b   : > { %6737 = vmatmul.mubr.msk.f32.vlgmr.msra.gmra.mrb[2].mxu0 %vm713_vm1, %v871_v14  ;;  %6771 = vmatprep.mubr.msk.f32.mxu1 %vm8647_vm0, %v8646_v1  ;;  %v5683_v0 = vld [vmem:[%s11019_s8] ss:$0 sm:$0xff]  ;;  %v1132_v14 = vld [vmem:[%s11022_s11 + $0x28] sm:$0xff]  ;;  %v1142_v29 = vld [vmem:[%s11022_s11 + $0x78] sm:$0xff]  ;;  %s698_s30 = scalar_lea.vmem [#allocation3], %s5677_s2 }
  0x2c   : > { %7773 = vmatpush3.bf16.msra.mxu0 %v7772_v15  ;;  %6806 = vmatprep.mubr.msk.f32.mxu0 %vm8647_vm0, %v8646_v1  ;;  %v1127_v5 = vld [vmem:[%s11022_s11] sm:$0xff]  ;;  %v5705_v32 = vld [vmem:[%s11021_s10 + $0x88] sm:$0xff]  ;;  %v5707_v35 = vld [vmem:[%s11021_s10 + $0x98] sm:$0xff]  ;;  %s5593_s26 = sshll.u32 %s698_s30, 4  ;;  %s10971_s26 = int_to_ptr.vmem [resolvable:$true] %s5593_s26 }
  0x2d   : > { %7752 = vmatpush3.bf16.msra.mxu1 %v7751_v16  ;;  %7774 = vmatprep.subr.bf16.mxu0 %v8648_v6  ;;  %v5681_v57 = vld [vmem:[%s11070_s25] ss:$0 sm:$0xff]  ;;  %v7796_v8 = vpack.c.bf16 %v1128_v7, %v1127_v5  ;;  %v1133_v16 = vld [vmem:[%s11022_s11 + $0x30] sm:$0xff]  ;;  %v5709_v38 = vld [vmem:[%s11021_s10 + $0xa8] sm:$0xff]  ;;  %s8582_s3 = scalar_lea.vmem %s10971_s26, 128 }
  0x2e   : > { %7753 = vmatprep.subr.bf16.mxu1 %v8648_v6  ;;  %v1131_v13 = vld [vmem:[%s11022_s11 + $0x20] sm:$0xff]  ;;  %v7805_v18 = vpack.c.bf16 %v1134_v17, %v1133_v16  ;;  %v5711_v41 = vld [vmem:[%s11021_s10 + $0xb8] sm:$0xff]  ;;  %v5713_v44 = vld [vmem:[%s11021_s10 + $0xc8] sm:$0xff]  ;;  %s6165_s24 = sshll.u32 %s11071_s27, 7  ;;  %p8583_p11 = scmp.ne.s32.totalorder %s10971_s26, %s8582_s3 }
  0x2f   : > { %v7802_v15 = vpack.c.bf16 %v1132_v14, %v1131_v13  ;;  %v1135_v19 = vld [vmem:[%s11022_s11 + $0x40] sm:$0xff]  ;;  %v5715_v47 = vld [vmem:[%s11021_s10 + $0xd8] sm:$0xff]  ;;  %v5717_v50 = vld [vmem:[%s11021_s10 + $0xe8] sm:$0xff]  ;;  %s10969_s4 = scalar_lea.hbm %s11073_s22, %s6165_s24  ;;  %s8649_s27 = smov [#allocation3]  }
  0x30   : > { %7776 = vmatpush3.bf16.msra.mxu0 %v7775_v21  ;;  %v7808_v21 = vpack.c.bf16 %v1136_v20, %v1135_v19  ;;  %v1139_v25 = vld [vmem:[%s11022_s11 + $0x60] sm:$0xff]  ;;  %v5719_v53 = vld [vmem:[%s11021_s10 + $0xf8] sm:$0xff]  ;;  %v5689_v13 = vld [vmem:[%s11020_s9 + $0x88] sm:$0xff]  ;;  %p8584_p12 = pnand %p8583_p11, %p8803_p5  ;;  %s8586_s2 = sshll.u32 %s8649_s27, 4  ;;  %s8587_s2 = int_to_ptr.vmem [resolvable:$false] %s8586_s2 }
  0x31   : > { %7755 = vmatpush3.bf16.msra.mxu1 %v7754_v22  ;;  %7777 = vmatprep.subr.bf16.mxu0 %v8648_v6  ;;  %v1137_v22 = vld [vmem:[%s11022_s11 + $0x50] sm:$0xff]  ;;  %v5704_v31 = vld [vmem:[%s11021_s10 + $0x80] sm:$0xff]  ;;  %s8588_s25 = scalar_lea.vmem %s8587_s2, 256  ;;  %p8589_p0 = scmp.lt.s32.totalorder %s10971_s26, %s8587_s2 }
  0x32   : > { %7756 = vmatprep.subr.bf16.mxu1 %v8648_v6  ;;  %v7811_v24 = vpack.c.bf16 %v1138_v23, %v1137_v22  ;;  %v5690_v17 = vld [vmem:[%s11020_s9 + $0x90] sm:$0xff]  ;;  %v5692_v20 = vld [vmem:[%s11020_s9 + $0xa0] sm:$0xff]  ;;  %p8585_p13 = pneg %p8584_p12  ;;  %p8590_p1 = scmp.lt.s32.totalorder %s8588_s25, %s8582_s3 }
  0x33   : > { %v5694_v23 = vld [vmem:[%s11020_s9 + $0xb0] sm:$0xff] }
  0x34   : > { %7779 = vmatpush3.bf16.msra.mxu0 %v7778_v27  ;;  %v7814_v27 = vpack.c.bf16 %v1140_v26, %v1139_v25  ;;  %v5696_v26 = vld [vmem:[%s11020_s9 + $0xc0] sm:$0xff]  ;;  %p8591_p2 = por %p8590_p1, %p8589_p0 }
  0x35   : > { %7758 = vmatpush3.bf16.msra.mxu1 %v7757_v28  ;;  %7780 = vmatprep.subr.bf16.mxu0 %v8648_v6  ;;  %v1141_v28 = vld [vmem:[%s11022_s11 + $0x70] sm:$0xff] }
  0x36   : > { %7759 = vmatprep.subr.bf16.mxu1 %v8648_v6  ;;  %v7817_v30 = vpack.c.bf16 %v1142_v29, %v1141_v28  ;;  %v5698_v29 = vld [vmem:[%s11020_s9 + $0xd0] sm:$0xff]  ;;  %p8592_p3 = pnand %p8591_p2, %p8585_p13 }
  0x38   : > { %7782 = vmatpush3.bf16.msra.mxu0 %v7781_v33  ;;  %v7844_v33 = vpack.c.bf16 %v5705_v32, %v5704_v31  ;;  %v5700_v32 = vld [vmem:[%s11020_s9 + $0xe0] sm:$0xff] }
  0x39   : > { %7761 = vmatpush3.bf16.msra.mxu1 %v7760_v34  ;;  %7783 = vmatprep.subr.bf16.mxu0 %v8648_v6  ;;  %v5706_v34 = vld [vmem:[%s11021_s10 + $0x90] sm:$0xff] }
  0x3a   : > { %7762 = vmatprep.subr.bf16.mxu1 %v8648_v6  ;;  %v7847_v36 = vpack.c.bf16 %v5707_v35, %v5706_v34  ;;  %v5702_v35 = vld [vmem:[%s11020_s9 + $0xf0] sm:$0xff] }
  0x3c   : > { %7785 = vmatpush3.bf16.msra.mxu0 %v7784_v37  ;;  %v5708_v37 = vld [vmem:[%s11021_s10 + $0xa0] sm:$0xff] }
  0x3d   : > { %7786 = vmatprep.subr.bf16.mxu0 %v8648_v6  ;;  %7764 = vmatpush3.bf16.msra.mxu1 %v7763_v40  ;;  %v7850_v39 = vpack.c.bf16 %v5709_v38, %v5708_v37  ;;  %v5710_v40 = vld [vmem:[%s11021_s10 + $0xb0] sm:$0xff]  ;;  %v5720_v38 = vld [vmem:[%s11022_s11 + $0x80] sm:$0xff] }
  0x3e   : > { %7765 = vmatprep.subr.bf16.mxu1 %v8648_v6  ;;  %v7853_v42 = vpack.c.bf16 %v5711_v41, %v5710_v40  ;;  %v5722_v41 = vld [vmem:[%s11022_s11 + $0x90] sm:$0xff] }
  0x40   : > { %7788 = vmatpush3.bf16.msra.mxu0 %v7787_v43  ;;  %v5712_v43 = vld [vmem:[%s11021_s10 + $0xc0] sm:$0xff] }
  0x41   : > { %7789 = vmatprep.subr.bf16.mxu0 %v8648_v6  ;;  %7767 = vmatpush3.bf16.msra.mxu1 %v7766_v46  ;;  %v7856_v45 = vpack.c.bf16 %v5713_v44, %v5712_v43  ;;  %v5714_v46 = vld [vmem:[%s11021_s10 + $0xd0] sm:$0xff]  ;;  %v5724_v44 = vld [vmem:[%s11022_s11 + $0xa0] sm:$0xff] }
  0x42   : > { %7768 = vmatprep.subr.bf16.mxu1 %v8648_v6  ;;  %v7859_v48 = vpack.c.bf16 %v5715_v47, %v5714_v46  ;;  %v5726_v47 = vld [vmem:[%s11022_s11 + $0xb0] sm:$0xff] }
  0x44   : > { %7791 = vmatpush3.bf16.msra.mxu0 %v7790_v49  ;;  %v5716_v49 = vld [vmem:[%s11021_s10 + $0xe0] sm:$0xff] }
  0x45   : > { %7792 = vmatprep.subr.bf16.mxu0 %v8648_v6  ;;  %7770 = vmatpush3.bf16.msra.mxu1 %v7769_v52  ;;  %v7862_v51 = vpack.c.bf16 %v5717_v50, %v5716_v49  ;;  %v5718_v52 = vld [vmem:[%s11021_s10 + $0xf0] sm:$0xff]  ;;  %v5728_v50 = vld [vmem:[%s11022_s11 + $0xc0] sm:$0xff] }
  0x46   : > { %7795 = vmatprep.subr.bf16.mxu1 %v8648_v6  ;;  %v7865_v54 = vpack.c.bf16 %v5719_v53, %v5718_v52  ;;  %v5730_v53 = vld [vmem:[%s11022_s11 + $0xd0] sm:$0xff] }
  0x48   : > { %7794 = vmatpush3.bf16.msra.mxu0 %v7793_v55 }
  0x49   : > { %6844 = vmatprep.subr.mxu0 %v8646_v1 }
  0xfa   : > { %v783_v58 = vpop.f32.mrb[0].mxu0 }
  0xfb   : > { %v784_v59 = vadd.f32 %v783_v58, %v712_v56  ;;  %v6728_v60 = vpop.f32.mrb[1].mxu0  ;;  %v866_v61 = vpop.f32.mrb[0].mxu1 }
  0xfc   : > { %v867_v62 = vadd.f32 %v5681_v57, %v866_v61  ;;  %v6733_v63 = vpop.f32.mrb[1].mxu1 }
  0xfd   : > { %787 = vst [vmem:[#allocation2] sm:$0x1] %v784_v59 }
  0xfe   : > { %870 = vst [vmem:[#allocation2 + $0x1] sm:$0x3] %v867_v62  ;;  %v949_v2 = vpop.f32.mrb[2].mxu0 }
  0xff   : > { %v950_v3 = vadd.f32 %v5683_v0, %v949_v2  ;;  %v6738_v4 = vpop.f32.mrb[3].mxu0 }
 0x101   : > { %953 = vst [vmem:[#allocation2 + $0x3] sm:$0x1f] %v950_v3 }
 0x108   : > { %v8984_v11 = vld [vmem:[#allocation2] sm:$0xff] }
 0x109   : > { %6772 = vmatmul.mubr.f32.vlgmr.msra.gmra.mrb[2].mxu1 %v8984_v11  ;;  %6807 = vmatmul.mubr.f32.vlgmr.msra.gmra.mrb[4].mxu0 %v8984_v11 }
 0x10a   : > { %7797 = vmatpush3.bf16.msra.mxu1 %v7796_v8  ;;  %6841 = vmatprep.mubr.msk.f32.mxu1 %vm8647_vm0, %v8646_v1 }
 0x10b   : > { %7798 = vmatprep.subr.bf16.mxu1 %v8648_v6  ;;  %6846 = vmatprep.mubr.msk.f32.mxu0 %vm8647_vm0, %v8646_v1 }
 0x10e   : > { %7800 = vmatpush3.bf16.msra.mxu1 %v7799_v12  ;;  %v5688_v12 = vld [vmem:[%s11020_s9 + $0x80] sm:$0xff] }
 0x10f   : > { %7801 = vmatprep.subr.bf16.mxu1 %v8648_v6 }
 0x112   : > { %7803 = vmatpush3.bf16.msra.mxu1 %v7802_v15  ;;  %v7820_v15 = vpack.c.bf16 %v5689_v13, %v5688_v12 }
 0x113   : > { %7804 = vmatprep.subr.bf16.mxu1 %v8648_v6 }
 0x116   : > { %7806 = vmatpush3.bf16.msra.mxu1 %v7805_v18  ;;  %v5691_v18 = vld [vmem:[%s11020_s9 + $0x98] sm:$0xff] }
 0x117   : > { %7807 = vmatprep.subr.bf16.mxu1 %v8648_v6  ;;  %v7823_v19 = vpack.c.bf16 %v5691_v18, %v5690_v17  ;;  %v5767_v18 = vld [vmem:[%s11021_s10 + $0x130] sm:$0xff] }
 0x11a   : > { %7809 = vmatpush3.bf16.msra.mxu1 %v7808_v21  ;;  %v5693_v21 = vld [vmem:[%s11020_s9 + $0xa8] sm:$0xff] }
 0x11b   : > { %7810 = vmatprep.subr.bf16.mxu1 %v8648_v6  ;;  %v7826_v22 = vpack.c.bf16 %v5693_v21, %v5692_v20  ;;  %v5769_v21 = vld [vmem:[%s11021_s10 + $0x140] sm:$0xff] }
 0x11e   : > { %7812 = vmatpush3.bf16.msra.mxu1 %v7811_v24  ;;  %v5695_v24 = vld [vmem:[%s11020_s9 + $0xb8] sm:$0xff] }
 0x11f   : > { %7813 = vmatprep.subr.bf16.mxu1 %v8648_v6  ;;  %v7829_v25 = vpack.c.bf16 %v5695_v24, %v5694_v23  ;;  %v5771_v24 = vld [vmem:[%s11021_s10 + $0x150] sm:$0xff] }
 0x122   : > { %7815 = vmatpush3.bf16.msra.mxu1 %v7814_v27  ;;  %v5697_v27 = vld [vmem:[%s11020_s9 + $0xc8] sm:$0xff] }
 0x123   : > { %7816 = vmatprep.subr.bf16.mxu1 %v8648_v6  ;;  %v7832_v28 = vpack.c.bf16 %v5697_v27, %v5696_v26  ;;  %v5773_v27 = vld [vmem:[%s11021_s10 + $0x160] sm:$0xff] }
 0x126   : > { %7818 = vmatpush3.bf16.msra.mxu1 %v7817_v30  ;;  %v5699_v30 = vld [vmem:[%s11020_s9 + $0xd8] sm:$0xff] }
 0x127   : > { %7843 = vmatprep.subr.bf16.mxu1 %v8648_v6  ;;  %v7835_v31 = vpack.c.bf16 %v5699_v30, %v5698_v29  ;;  %v5775_v30 = vld [vmem:[%s11021_s10 + $0x170] sm:$0xff] }
 0x129   : > { %6842 = vmatmul.mubr.f32.vlgmr.msra.gmra.mrb[4].mxu1 %v8984_v11 }
 0x12a   : > { %7845 = vmatpush3.bf16.msra.mxu1 %v7844_v33  ;;  %6921 = vmatprep.mubr.msk.f32.mxu1 %vm8647_vm0, %v8646_v1  ;;  %v5701_v33 = vld [vmem:[%s11020_s9 + $0xe8] sm:$0xff] }
 0x12b   : > { %7846 = vmatprep.subr.bf16.mxu1 %v8648_v6  ;;  %v7838_v34 = vpack.c.bf16 %v5701_v33, %v5700_v32 }
 0x12e   : > { %7848 = vmatpush3.bf16.msra.mxu1 %v7847_v36  ;;  %v5703_v36 = vld [vmem:[%s11020_s9 + $0xf8] sm:$0xff] }
 0x12f   : > { %7849 = vmatprep.subr.bf16.mxu1 %v8648_v6  ;;  %v7841_v37 = vpack.c.bf16 %v5703_v36, %v5702_v35 }
 0x132   : > { %7851 = vmatpush3.bf16.msra.mxu1 %v7850_v39  ;;  %v5721_v39 = vld [vmem:[%s11022_s11 + $0x88] sm:$0xff] }
 0x133   : > { %7852 = vmatprep.subr.bf16.mxu1 %v8648_v6  ;;  %v7868_v40 = vpack.c.bf16 %v5721_v39, %v5720_v38 }
 0x136   : > { %7854 = vmatpush3.bf16.msra.mxu1 %v7853_v42  ;;  %v5723_v42 = vld [vmem:[%s11022_s11 + $0x98] sm:$0xff] }
 0x137   : > { %7855 = vmatprep.subr.bf16.mxu1 %v8648_v6  ;;  %v7871_v43 = vpack.c.bf16 %v5723_v42, %v5722_v41 }
 0x13a   : > { %7857 = vmatpush3.bf16.msra.mxu1 %v7856_v45  ;;  %v5725_v45 = vld [vmem:[%s11022_s11 + $0xa8] sm:$0xff] }
 0x13b   : > { %7858 = vmatprep.subr.bf16.mxu1 %v8648_v6  ;;  %v7874_v46 = vpack.c.bf16 %v5725_v45, %v5724_v44 }
 0x13e   : > { %7860 = vmatpush3.bf16.msra.mxu1 %v7859_v48  ;;  %v5727_v48 = vld [vmem:[%s11022_s11 + $0xb8] sm:$0xff] }
 0x13f   : > { %7861 = vmatprep.subr.bf16.mxu1 %v8648_v6  ;;  %v7877_v49 = vpack.c.bf16 %v5727_v48, %v5726_v47 }
 0x142   : > { %7863 = vmatpush3.bf16.msra.mxu1 %v7862_v51  ;;  %v5729_v51 = vld [vmem:[%s11022_s11 + $0xc8] sm:$0xff] }
 0x143   : > { %7864 = vmatprep.subr.bf16.mxu1 %v8648_v6  ;;  %v7880_v52 = vpack.c.bf16 %v5729_v51, %v5728_v50  ;;  %v5739_v51 = vld [vmem:[%s11023_s12 + $0x20] sm:$0xff] }
 0x146   : > { %7866 = vmatpush3.bf16.msra.mxu1 %v7865_v54  ;;  %v5731_v54 = vld [vmem:[%s11022_s11 + $0xd8] sm:$0xff] }
 0x147   : > { %6959 = vmatprep.subr.mxu1 %v8646_v1 }
 0x149   : > { %6922 = vmatmul.mubr.f32.vlgmr.msra.gmra.mrb[6].mxu1 %v8984_v11 }
 0x14a   : > { %6961 = vmatprep.mubr.msk.f32.mxu1 %vm8647_vm0, %v8646_v1 }
 0x1dc   : > { %v1037_v55 = vpop.f32.mrb[2].mxu1  ;;  %v1123_v56 = vpop.f32.mrb[4].mxu0 }
 0x1dd   : > { %v6773_v57 = vpop.f32.mrb[3].mxu1  ;;  %v6808_v58 = vpop.f32.mrb[5].mxu0  ;;  %6845 = vmatpush3.xpose.msk.msra.mxu0 %vm1213_vm2, %v1123_v56  ;;  %v5732_v56 = vld [vmem:[%s11022_s11 + $0xe0] sm:$0xff] }
 0x1de   : > { %6849 = vmatprep.subr.mxu0 %v8646_v1  ;;  %v5733_v57 = vld [vmem:[%s11022_s11 + $0xe8] sm:$0xff] }
 0x1df   : > { %v7886_v58 = vpack.c.bf16 %v5733_v57, %v5732_v56  ;;  %v5741_v56 = vld [vmem:[%s11023_s12 + $0x30] sm:$0xff]  ;;  %v5742_v57 = vld [vmem:[%s11023_s12 + $0x38] sm:$0xff] }
 0x1e0   : > { %6847 = vmatmul.mubr.msk.f32.vlgmr.msra.gmra.mrb[6].mxu0 %vm1213_vm2, %v1037_v55  ;;  %v7883_v55 = vpack.c.bf16 %v5731_v54, %v5730_v53 }
 0x1e1   : > { %6851 = vmatprep.mubr.msk.f32.mxu0 %vm8647_vm0, %v8646_v1 }
 0x1fc   : > { %v1209_v59 = vpop.f32.mrb[4].mxu1 }
 0x1fd   : > { %v6843_v60 = vpop.f32.mrb[5].mxu1  ;;  %6850 = vmatpush3.msra.mxu0 %v1209_v59  ;;  %v5734_v59 = vld [vmem:[%s11022_s11 + $0xf0] sm:$0xff] }
 0x1fe   : > { %7819 = vmatprep.subr.bf16.mxu0 %v8648_v6  ;;  %v5735_v60 = vld [vmem:[%s11022_s11 + $0xf8] sm:$0xff] }
 0x21c   : > { %v1549_v61 = vpop.f32.mrb[6].mxu1 }
 0x21d   : > { %v6923_v62 = vpop.f32.mrb[7].mxu1  ;;  %6960 = vmatpush3.xpose.msk.msra.mxu1 %vm1213_vm2, %v1549_v61  ;;  %v7889_v61 = vpack.c.bf16 %v5735_v60, %v5734_v59  ;;  %v5745_v59 = vld [vmem:[%s11020_s9 + $0x100] sm:$0xff]  ;;  %v5746_v60 = vld [vmem:[%s11020_s9 + $0x108] sm:$0xff] }
 0x21e   : > { %6964 = vmatprep.subr.mxu1 %v8646_v1  ;;  %v1375_v62 = vld [vmem:[%s11023_s12] sm:$0xff] }
 0x2b3   : > { %v1286_v63 = vpop.f32.mrb[6].mxu0 }
 0x2b4   : > { %v1290_v0 = vmul.f32 0.17677669, %v1286_v63  ;;  %v6848_v2 = vpop.f32.mrb[7].mxu0  ;;  %v1376_v63 = vld [vmem:[%s11023_s12 + $0x8] sm:$0xff] }
 0x2b5   : > { %v1377_v2 = vld [vmem:[%s11023_s12 + $0x10] sm:$0xff] }
 0x2b6   : > { %v1291_v3 = vsel %vm713_vm1, %v1290_v0, -inf }
 0x2b7   : > { %1292 = vmax.xlane.f32.xlu0 %v1291_v3  ;;  %v1378_v3 = vld [vmem:[%s11023_s12 + $0x18] sm:$0xff] }
 0x344   : > { %v1293_v4 = vpop.xlane.xlu0 %1292 }
 0x345   : > { %v1294_v5 = vsub.f32 %v1290_v0, %v1293_v4  ;;  %v7898_v0 = vpack.c.bf16 %v1376_v63, %v1375_v62  ;;  %v7901_v4 = vpack.c.bf16 %v1378_v3, %v1377_v2  ;;  %v5747_v62 = vld [vmem:[%s11020_s9 + $0x110] sm:$0xff]  ;;  %v5748_v63 = vld [vmem:[%s11020_s9 + $0x118] sm:$0xff] }
 0x346   : > { %v7907_v3 = vpack.c.bf16 %v5748_v63, %v5747_v62  ;;  %v5826_v62 = vld [vmem:[%s11021_s10 + $0x1c8] sm:$0xff] }
 0x347   : > { %v1295_v7 = vmul.f32 1.442695, %v1294_v5  ;;  %v5761_v5 = vld [vmem:[%s11021_s10 + $0x100] sm:$0xff] }
 0x349   : > { %8541 = vpow2.f32 %v1295_v7  ;;  %v5762_v7 = vld [vmem:[%s11021_s10 + $0x108] sm:$0xff] }
 0x353   : > { %v8542_v8 = vpop.eup %8541 }
 0x354   : > { %v1297_v9 = vsel %vm713_vm1, %v8542_v8, 0.0 }
 0x355   : > { %1298 = vadd.xlane.f32.xlu0 %v1297_v9  ;;  %v5763_v9 = vld [vmem:[%s11021_s10 + $0x110] sm:$0xff] }
 0x3e2   : > { %v1299_v10 = vpop.xlane.xlu0 %1298 }
 0x3e3   : > { %8543 = vrcp.f32 %v1299_v10  ;;  %v5764_v10 = vld [vmem:[%s11021_s10 + $0x118] sm:$0xff] }
 0x3ed   : > { %v8544_v14 = vpop.eup %8543 }
 0x3ee   : > { %v1301_v16 = vmul.f32 %v8544_v14, %v8542_v8  ;;  %v7928_v8 = vpack.c.bf16 %v5762_v7, %v5761_v5  ;;  %v7931_v14 = vpack.c.bf16 %v5764_v10, %v5763_v9  ;;  %v5750_v5 = vld [vmem:[%s11020_s9 + $0x128] sm:$0xff]  ;;  %v5752_v9 = vld [vmem:[%s11020_s9 + $0x138] sm:$0xff] }
 0x3f0   : > { %6852 = vmatmul.mubr.msk.f32.vlgmr.msra.gmra.mrb[8].mxu0 %vm713_vm1, %v1301_v16  ;;  %v5766_v16 = vld [vmem:[%s11021_s10 + $0x128] sm:$0xff] }
 0x3f1   : > { %7821 = vmatpush3.bf16.msra.mxu0 %v7820_v15  ;;  %6886 = vmatprep.mubr.msk.f32.mxu0 %vm8647_vm0, %v8646_v1  ;;  %v5765_v15 = vld [vmem:[%s11021_s10 + $0x120] sm:$0xff] }
 0x3f2   : > { %7822 = vmatprep.subr.bf16.mxu0 %v8648_v6  ;;  %v7934_v17 = vpack.c.bf16 %v5766_v16, %v5765_v15  ;;  %v5755_v15 = vld [vmem:[%s11020_s9 + $0x150] sm:$0xff]  ;;  %v5756_v16 = vld [vmem:[%s11020_s9 + $0x158] sm:$0xff] }
 0x3f5   : > { %7824 = vmatpush3.bf16.msra.mxu0 %v7823_v19  ;;  %v5768_v19 = vld [vmem:[%s11021_s10 + $0x138] sm:$0xff] }
 0x3f6   : > { %7825 = vmatprep.subr.bf16.mxu0 %v8648_v6  ;;  %v7937_v20 = vpack.c.bf16 %v5768_v19, %v5767_v18  ;;  %v5757_v18 = vld [vmem:[%s11020_s9 + $0x160] sm:$0xff]  ;;  %v5758_v19 = vld [vmem:[%s11020_s9 + $0x168] sm:$0xff] }
 0x3f9   : > { %7827 = vmatpush3.bf16.msra.mxu0 %v7826_v22  ;;  %v5770_v22 = vld [vmem:[%s11021_s10 + $0x148] sm:$0xff] }
 0x3fa   : > { %7828 = vmatprep.subr.bf16.mxu0 %v8648_v6  ;;  %v7940_v23 = vpack.c.bf16 %v5770_v22, %v5769_v21  ;;  %v5759_v21 = vld [vmem:[%s11020_s9 + $0x170] sm:$0xff]  ;;  %v5760_v22 = vld [vmem:[%s11020_s9 + $0x178] sm:$0xff] }
 0x3fd   : > { %7830 = vmatpush3.bf16.msra.mxu0 %v7829_v25  ;;  %v5772_v25 = vld [vmem:[%s11021_s10 + $0x158] sm:$0xff] }
 0x3fe   : > { %7831 = vmatprep.subr.bf16.mxu0 %v8648_v6  ;;  %v7943_v26 = vpack.c.bf16 %v5772_v25, %v5771_v24  ;;  %v5777_v24 = vld [vmem:[%s11022_s11 + $0x100] sm:$0xff]  ;;  %v5778_v25 = vld [vmem:[%s11022_s11 + $0x108] sm:$0xff] }
 0x401   : > { %7833 = vmatpush3.bf16.msra.mxu0 %v7832_v28  ;;  %v5774_v28 = vld [vmem:[%s11021_s10 + $0x168] sm:$0xff] }
 0x402   : > { %7834 = vmatprep.subr.bf16.mxu0 %v8648_v6  ;;  %v7946_v29 = vpack.c.bf16 %v5774_v28, %v5773_v27  ;;  %v5779_v27 = vld [vmem:[%s11022_s11 + $0x110] sm:$0xff]  ;;  %v5780_v28 = vld [vmem:[%s11022_s11 + $0x118] sm:$0xff] }
 0x405   : > { %7836 = vmatpush3.bf16.msra.mxu0 %v7835_v31  ;;  %v5776_v31 = vld [vmem:[%s11021_s10 + $0x178] sm:$0xff] }
 0x406   : > { %7837 = vmatprep.subr.bf16.mxu0 %v8648_v6  ;;  %v7949_v32 = vpack.c.bf16 %v5776_v31, %v5775_v30  ;;  %v5781_v30 = vld [vmem:[%s11022_s11 + $0x120] sm:$0xff]  ;;  %v5782_v31 = vld [vmem:[%s11022_s11 + $0x128] sm:$0xff] }
 0x409   : > { %7839 = vmatpush3.bf16.msra.mxu0 %v7838_v34 }
 0x40a   : > { %7840 = vmatprep.subr.bf16.mxu0 %v8648_v6 }
 0x40d   : > { %7842 = vmatpush3.bf16.msra.mxu0 %v7841_v37 }
 0x40e   : > { %7867 = vmatprep.subr.bf16.mxu0 %v8648_v6 }
 0x410   : > { %6887 = vmatmul.mubr.f32.vlgmr.msra.gmra.mrb[10].mxu0 %v8984_v11 }
 0x411   : > { %7869 = vmatpush3.bf16.msra.mxu0 %v7868_v40  ;;  %6956 = vmatprep.mubr.msk.f32.mxu0 %vm8647_vm0, %v8646_v1 }
 0x412   : > { %7870 = vmatprep.subr.bf16.mxu0 %v8648_v6 }
 0x415   : > { %7872 = vmatpush3.bf16.msra.mxu0 %v7871_v43 }
 0x416   : > { %7873 = vmatprep.subr.bf16.mxu0 %v8648_v6 }
 0x419   : > { %7875 = vmatpush3.bf16.msra.mxu0 %v7874_v46 }
 0x41a   : > { %7876 = vmatprep.subr.bf16.mxu0 %v8648_v6 }
 0x41d   : > { %7878 = vmatpush3.bf16.msra.mxu0 %v7877_v49 }
 0x41e   : > { %7879 = vmatprep.subr.bf16.mxu0 %v8648_v6 }
 0x421   : > { %7881 = vmatpush3.bf16.msra.mxu0 %v7880_v52  ;;  %v5740_v52 = vld [vmem:[%s11023_s12 + $0x28] sm:$0xff] }
 0x422   : > { %7882 = vmatprep.subr.bf16.mxu0 %v8648_v6  ;;  %v7892_v54 = vpack.c.bf16 %v5740_v52, %v5739_v51  ;;  %v5819_v52 = vld [vmem:[%s11021_s10 + $0x190] sm:$0xff] }
 0x425   : > { %7884 = vmatpush3.bf16.msra.mxu0 %v7883_v55 }
 0x426   : > { %7885 = vmatprep.subr.bf16.mxu0 %v8648_v6 }
 0x429   : > { %7887 = vmatpush3.bf16.msra.mxu0 %v7886_v58  ;;  %v7895_v58 = vpack.c.bf16 %v5742_v57, %v5741_v56  ;;  %v5822_v56 = vld [vmem:[%s11021_s10 + $0x1a8] sm:$0xff] }
 0x42a   : > { %7888 = vmatprep.subr.bf16.mxu0 %v8648_v6 }
 0x42d   : > { %7890 = vmatpush3.bf16.msra.mxu0 %v7889_v61  ;;  %v7904_v61 = vpack.c.bf16 %v5746_v60, %v5745_v59  ;;  %v5824_v59 = vld [vmem:[%s11021_s10 + $0x1b8] sm:$0xff] }
 0x42e   : > { %7897 = vmatprep.subr.bf16.mxu0 %v8648_v6 }
 0x430   : > { %6957 = vmatmul.mubr.f32.vlgmr.msra.gmra.mrb[12].mxu0 %v8984_v11 }
 0x431   : > { %7899 = vmatpush3.bf16.msra.mxu0 %v7898_v0  ;;  %6988 = vmatprep.mubr.msk.f32.mxu0 %vm8647_vm0, %v8646_v1 }
 0x432   : > { %7900 = vmatprep.subr.bf16.mxu0 %v8648_v6 }
 0x435   : > { %7902 = vmatpush3.bf16.msra.mxu0 %v7901_v4  ;;  %v5749_v4 = vld [vmem:[%s11020_s9 + $0x120] sm:$0xff] }
 0x436   : > { %7927 = vmatprep.subr.bf16.mxu0 %v8648_v6  ;;  %v7910_v7 = vpack.c.bf16 %v5750_v5, %v5749_v4  ;;  %v5829_v4 = vld [vmem:[%s11021_s10 + $0x1e0] sm:$0xff]  ;;  %v5830_v5 = vld [vmem:[%s11021_s10 + $0x1e8] sm:$0xff] }
 0x4c3   : > { %v1371_v12 = vpop.f32.mrb[8].mxu0 }
 0x4c4   : > { %v6853_v13 = vpop.f32.mrb[9].mxu0  ;;  %6989 = vmatmul.mubr.msk.f32.vlgmr.msra.gmra.mrb[14].mxu0 %vm1213_vm2, %v1371_v12  ;;  %v5753_v12 = vld [vmem:[%s11020_s9 + $0x140] sm:$0xff] }
 0x4c5   : > { %7929 = vmatpush3.bf16.msra.mxu0 %v7928_v8  ;;  %7058 = vmatprep.mubr.msk.f32.mxu0 %vm8647_vm0, %v8646_v1  ;;  %v5751_v8 = vld [vmem:[%s11020_s9 + $0x130] sm:$0xff]  ;;  %v5754_v13 = vld [vmem:[%s11020_s9 + $0x148] sm:$0xff] }
 0x4c6   : > { %7930 = vmatprep.subr.bf16.mxu0 %v8648_v6  ;;  %v7913_v10 = vpack.c.bf16 %v5752_v9, %v5751_v8  ;;  %v5831_v8 = vld [vmem:[%s11021_s10 + $0x1f0] sm:$0xff]  ;;  %v5832_v9 = vld [vmem:[%s11021_s10 + $0x1f8] sm:$0xff] }
 0x4c9   : > { %7932 = vmatpush3.bf16.msra.mxu0 %v7931_v14  ;;  %v7916_v14 = vpack.c.bf16 %v5754_v13, %v5753_v12 }
 0x4ca   : > { %7933 = vmatprep.subr.bf16.mxu0 %v8648_v6 }
 0x4cd   : > { %7935 = vmatpush3.bf16.msra.mxu0 %v7934_v17  ;;  %v7919_v17 = vpack.c.bf16 %v5756_v16, %v5755_v15 }
 0x4ce   : > { %7936 = vmatprep.subr.bf16.mxu0 %v8648_v6 }
 0x4d1   : > { %7938 = vmatpush3.bf16.msra.mxu0 %v7937_v20  ;;  %v7922_v20 = vpack.c.bf16 %v5758_v19, %v5757_v18 }
 0x4d2   : > { %7939 = vmatprep.subr.bf16.mxu0 %v8648_v6 }
 0x4d5   : > { %7941 = vmatpush3.bf16.msra.mxu0 %v7940_v23  ;;  %v7925_v23 = vpack.c.bf16 %v5760_v22, %v5759_v21 }
 0x4d6   : > { %7942 = vmatprep.subr.bf16.mxu0 %v8648_v6 }
 0x4d9   : > { %7944 = vmatpush3.bf16.msra.mxu0 %v7943_v26  ;;  %v7952_v26 = vpack.c.bf16 %v5778_v25, %v5777_v24 }
 0x4da   : > { %7945 = vmatprep.subr.bf16.mxu0 %v8648_v6 }
 0x4dd   : > { %7947 = vmatpush3.bf16.msra.mxu0 %v7946_v29  ;;  %v7955_v29 = vpack.c.bf16 %v5780_v28, %v5779_v27 }
 0x4de   : > { %7948 = vmatprep.subr.bf16.mxu0 %v8648_v6 }
 0x4e1   : > { %7950 = vmatpush3.bf16.msra.mxu0 %v7949_v32  ;;  %v7958_v32 = vpack.c.bf16 %v5782_v31, %v5781_v30  ;;  %v5797_v30 = vld [vmem:[%s11023_s12 + $0x48] sm:$0xff] }
 0x4e2   : > { %7096 = vmatprep.subr.mxu0 %v8646_v1 }
 0x4e3   : > { %v1462_v33 = vpop.f32.mrb[10].mxu0 }
 0x4e4   : > { %v6888_v34 = vpop.f32.mrb[11].mxu0  ;;  %6962 = vmatmul.mubr.msk.f32.vlgmr.msra.gmra.mrb[8].mxu1 %vm1213_vm2, %v1462_v33  ;;  %7059 = vmatmul.mubr.f32.vlgmr.msra.gmra.mrb[16].mxu0 %v8984_v11  ;;  %v5783_v33 = vld [vmem:[%s11022_s11 + $0x130] sm:$0xff] }
 0x4e5   : > { %6966 = vmatprep.mubr.msk.f32.mxu1 %vm8647_vm0, %v8646_v1  ;;  %7098 = vmatprep.mubr.msk.f32.mxu0 %vm8647_vm0, %v8646_v1  ;;  %v5784_v34 = vld [vmem:[%s11022_s11 + $0x138] sm:$0xff] }
 0x503   : > { %v1636_v35 = vpop.f32.mrb[12].mxu0 }
 0x504   : > { %v6958_v36 = vpop.f32.mrb[13].mxu0  ;;  %6965 = vmatpush3.msra.mxu1 %v1636_v35  ;;  %v7961_v35 = vpack.c.bf16 %v5784_v34, %v5783_v33  ;;  %v5798_v34 = vld [vmem:[%s11023_s12 + $0x50] sm:$0xff] }
 0x505   : > { %7891 = vmatprep.subr.bf16.mxu1 %v8648_v6  ;;  %v5785_v36 = vld [vmem:[%s11022_s11 + $0x140] sm:$0xff] }
 0x597   : > { %v9309_v37 = vpop.f32.mrb[14].mxu0 }
 0x598   : > { %v6990_v38 = vpop.f32.mrb[15].mxu0 }
 0x599   : > { %v5786_v38 = vld [vmem:[%s11022_s11 + $0x148] sm:$0xff] }
 0x5b7   : > { %v1712_v39 = vpop.f32.mrb[8].mxu1  ;;  %v2122_v40 = vpop.f32.mrb[16].mxu0 }
 0x5b8   : > { %v1716_v41 = vmul.f32 0.17677669, %v1712_v39  ;;  %v6963_v42 = vpop.f32.mrb[9].mxu1  ;;  %v7060_v43 = vpop.f32.mrb[17].mxu0  ;;  %7097 = vmatpush3.xpose.msk.msra.mxu0 %vm1213_vm2, %v2122_v40  ;;  %v7964_v39 = vpack.c.bf16 %v5786_v38, %v5785_v36  ;;  %v5787_v40 = vld [vmem:[%s11022_s11 + $0x150] sm:$0xff]  ;;  %v5801_v38 = vld [vmem:[%s11020_s9 + $0x180] sm:$0xff] }
 0x5b9   : > { %7101 = vmatprep.subr.mxu0 %v8646_v1  ;;  %v5789_v43 = vld [vmem:[%s11022_s11 + $0x160] sm:$0xff] }
 0x5ba   : > { %v1717_v44 = vsel %vm713_vm1, %v1716_v41, -inf }
 0x5bb   : > { %1718 = vmax.xlane.f32.xlu1 %v1717_v44  ;;  %v5790_v44 = vld [vmem:[%s11022_s11 + $0x168] sm:$0xff] }
 0x648   : > { %v1719_v45 = vpop.xlane.xlu1 %1718 }
 0x649   : > { %v1720_v46 = vsub.f32 %v1716_v41, %v1719_v45  ;;  %v5788_v41 = vld [vmem:[%s11022_s11 + $0x158] sm:$0xff]  ;;  %v7970_v45 = vpack.c.bf16 %v5790_v44, %v5789_v43 }
 0x64a   : > { %v7967_v42 = vpack.c.bf16 %v5788_v41, %v5787_v40  ;;  %v5803_v41 = vld [vmem:[%s11020_s9 + $0x190] sm:$0xff] }
 0x64b   : > { %v1721_v47 = vmul.f32 1.442695, %v1720_v46  ;;  %v5791_v46 = vld [vmem:[%s11022_s11 + $0x170] sm:$0xff] }
 0x64d   : > { %8545 = vpow2.f32 %v1721_v47  ;;  %v5792_v47 = vld [vmem:[%s11022_s11 + $0x178] sm:$0xff] }
 0x657   : > { %v8546_v48 = vpop.eup %8545 }
 0x658   : > { %v1723_v49 = vsel %vm713_vm1, %v8546_v48, 0.0 }
 0x659   : > { %1724 = vadd.xlane.f32.xlu1 %v1723_v49  ;;  %v5817_v49 = vld [vmem:[%s11021_s10 + $0x180] sm:$0xff] }
 0x6e6   : > { %v1725_v50 = vpop.xlane.xlu1 %1724 }
 0x6e7   : > { %8547 = vrcp.f32 %v1725_v50  ;;  %v5818_v50 = vld [vmem:[%s11021_s10 + $0x188] sm:$0xff] }
 0x6e8   : > { %v8006_v51 = vpack.c.bf16 %v5818_v50, %v5817_v49  ;;  %v5807_v49 = vld [vmem:[%s11020_s9 + $0x1b0] sm:$0xff]  ;;  %v5808_v50 = vld [vmem:[%s11020_s9 + $0x1b8] sm:$0xff] }
 0x6f1   : > { %v8548_v53 = vpop.eup %8547 }
 0x6f2   : > { %v1727_v55 = vmul.f32 %v8548_v53, %v8546_v48  ;;  %v7973_v48 = vpack.c.bf16 %v5792_v47, %v5791_v46  ;;  %v5820_v53 = vld [vmem:[%s11021_s10 + $0x198] sm:$0xff]  ;;  %v5805_v46 = vld [vmem:[%s11020_s9 + $0x1a0] sm:$0xff]  ;;  %v5806_v47 = vld [vmem:[%s11020_s9 + $0x1a8] sm:$0xff] }
 0x6f4   : > { %6967 = vmatmul.mubr.msk.f32.vlgmr.msra.gmra.mrb[10].mxu1 %vm713_vm1, %v1727_v55  ;;  %v5821_v55 = vld [vmem:[%s11021_s10 + $0x1a0] sm:$0xff] }
 0x6f5   : > { %7893 = vmatpush3.bf16.msra.mxu1 %v7892_v54  ;;  %6977 = vmatprep.mubr.msk.f32.mxu1 %vm8647_vm0, %v8646_v1  ;;  %v8009_v54 = vpack.c.bf16 %v5820_v53, %v5819_v52  ;;  %v8012_v57 = vpack.c.bf16 %v5822_v56, %v5821_v55  ;;  %v5809_v52 = vld [vmem:[%s11020_s9 + $0x1c0] sm:$0xff]  ;;  %v5810_v53 = vld [vmem:[%s11020_s9 + $0x1c8] sm:$0xff]  ;;  %v5811_v55 = vld [vmem:[%s11020_s9 + $0x1d0] sm:$0xff] }
 0x6f6   : > { %7894 = vmatprep.subr.bf16.mxu1 %v8648_v6  ;;  %v5812_v56 = vld [vmem:[%s11020_s9 + $0x1d8] sm:$0xff] }
 0x6f9   : > { %7896 = vmatpush3.bf16.msra.mxu1 %v7895_v58  ;;  %v5823_v58 = vld [vmem:[%s11021_s10 + $0x1b0] sm:$0xff] }
 0x6fa   : > { %7903 = vmatprep.subr.bf16.mxu1 %v8648_v6  ;;  %v8015_v60 = vpack.c.bf16 %v5824_v59, %v5823_v58  ;;  %v5813_v58 = vld [vmem:[%s11020_s9 + $0x1e0] sm:$0xff]  ;;  %v5814_v59 = vld [vmem:[%s11020_s9 + $0x1e8] sm:$0xff] }
 0x7c7   : > { %v1797_v0 = vpop.f32.mrb[10].mxu1 }
 0x7c8   : > { %v6968_v2 = vpop.f32.mrb[11].mxu1  ;;  %6978 = vmatmul.mubr.msk.f32.vlgmr.msra.gmra.mrb[12].mxu1 %vm1213_vm2, %v1797_v0  ;;  %v5827_v0 = vld [vmem:[%s11021_s10 + $0x1d0] sm:$0xff] }
 0x7c9   : > { %7905 = vmatpush3.bf16.msra.mxu1 %v7904_v61  ;;  %7023 = vmatprep.mubr.msk.f32.mxu1 %vm8647_vm0, %v8646_v1  ;;  %v5825_v61 = vld [vmem:[%s11021_s10 + $0x1c0] sm:$0xff]  ;;  %v5828_v2 = vld [vmem:[%s11021_s10 + $0x1d8] sm:$0xff] }
 0x7ca   : > { %7906 = vmatprep.subr.bf16.mxu1 %v8648_v6  ;;  %v8018_v63 = vpack.c.bf16 %v5826_v62, %v5825_v61  ;;  %v5815_v61 = vld [vmem:[%s11020_s9 + $0x1f0] sm:$0xff]  ;;  %v5816_v62 = vld [vmem:[%s11020_s9 + $0x1f8] sm:$0xff] }
 0x7cd   : > { %7908 = vmatpush3.bf16.msra.mxu1 %v7907_v3  ;;  %v8021_v3 = vpack.c.bf16 %v5828_v2, %v5827_v0  ;;  %v5833_v0 = vld [vmem:[%s11022_s11 + $0x180] sm:$0xff]  ;;  %v5834_v2 = vld [vmem:[%s11022_s11 + $0x188] sm:$0xff] }
 0x7ce   : > { %7909 = vmatprep.subr.bf16.mxu1 %v8648_v6 }
 0x7d1   : > { %7911 = vmatpush3.bf16.msra.mxu1 %v7910_v7  ;;  %v8024_v7 = vpack.c.bf16 %v5830_v5, %v5829_v4  ;;  %v5835_v4 = vld [vmem:[%s11022_s11 + $0x190] sm:$0xff]  ;;  %v5836_v5 = vld [vmem:[%s11022_s11 + $0x198] sm:$0xff] }
 0x7d2   : > { %7912 = vmatprep.subr.bf16.mxu1 %v8648_v6 }
 0x7d5   : > { %7914 = vmatpush3.bf16.msra.mxu1 %v7913_v10  ;;  %v8027_v10 = vpack.c.bf16 %v5832_v9, %v5831_v8  ;;  %v8033_v8 = vpack.c.bf16 %v5836_v5, %v5835_v4  ;;  %v5837_v9 = vld [vmem:[%s11022_s11 + $0x1a0] sm:$0xff]  ;;  %v3010_v4 = vld [vmem:[%s11027_s16 + $0x58] sm:$0xff] }
 0x7d6   : > { %7915 = vmatprep.subr.bf16.mxu1 %v8648_v6 }
 0x7d9   : > { %7917 = vmatpush3.bf16.msra.mxu1 %v7916_v14 }
 0x7da   : > { %7918 = vmatprep.subr.bf16.mxu1 %v8648_v6 }
 0x7dd   : > { %7920 = vmatpush3.bf16.msra.mxu1 %v7919_v17 }
 0x7de   : > { %7921 = vmatprep.subr.bf16.mxu1 %v8648_v6 }
 0x7e1   : > { %7923 = vmatpush3.bf16.msra.mxu1 %v7922_v20 }
 0x7e2   : > { %7924 = vmatprep.subr.bf16.mxu1 %v8648_v6 }
 0x7e5   : > { %7926 = vmatpush3.bf16.msra.mxu1 %v7925_v23 }
 0x7e6   : > { %7951 = vmatprep.subr.bf16.mxu1 %v8648_v6 }
 0x7e8   : > { %7024 = vmatmul.mubr.f32.vlgmr.msra.gmra.mrb[14].mxu1 %v8984_v11 }
 0x7e9   : > { %7953 = vmatpush3.bf16.msra.mxu1 %v7952_v26  ;;  %7093 = vmatprep.mubr.msk.f32.mxu1 %vm8647_vm0, %v8646_v1 }
 0x7ea   : > { %7954 = vmatprep.subr.bf16.mxu1 %v8648_v6 }
 0x7ed   : > { %7956 = vmatpush3.bf16.msra.mxu1 %v7955_v29  ;;  %v5796_v29 = vld [vmem:[%s11023_s12 + $0x40] sm:$0xff] }
 0x7ee   : > { %7957 = vmatprep.subr.bf16.mxu1 %v8648_v6 }
 0x7f1   : > { %7959 = vmatpush3.bf16.msra.mxu1 %v7958_v32  ;;  %v7976_v32 = vpack.c.bf16 %v5797_v30, %v5796_v29 }
 0x7f2   : > { %7960 = vmatprep.subr.bf16.mxu1 %v8648_v6 }
 0x7f5   : > { %7962 = vmatpush3.bf16.msra.mxu1 %v7961_v35  ;;  %v5799_v35 = vld [vmem:[%s11023_s12 + $0x58] sm:$0xff] }
 0x7f6   : > { %7963 = vmatprep.subr.bf16.mxu1 %v8648_v6  ;;  %v7979_v36 = vpack.c.bf16 %v5799_v35, %v5798_v34 }
 0x7f9   : > { %7965 = vmatpush3.bf16.msra.mxu1 %v7964_v39  ;;  %v5802_v39 = vld [vmem:[%s11020_s9 + $0x188] sm:$0xff] }
 0x7fa   : > { %7966 = vmatprep.subr.bf16.mxu1 %v8648_v6  ;;  %v7982_v40 = vpack.c.bf16 %v5802_v39, %v5801_v38 }
 0x7fd   : > { %7968 = vmatpush3.bf16.msra.mxu1 %v7967_v42  ;;  %v5804_v42 = vld [vmem:[%s11020_s9 + $0x198] sm:$0xff] }
 0x7fe   : > { %7969 = vmatprep.subr.bf16.mxu1 %v8648_v6 }
 0x801   : > { %7971 = vmatpush3.bf16.msra.mxu1 %v7970_v45  ;;  %v7985_v45 = vpack.c.bf16 %v5804_v42, %v5803_v41 }
 0x802   : > { %7972 = vmatprep.subr.bf16.mxu1 %v8648_v6 }
 0x805   : > { %7974 = vmatpush3.bf16.msra.mxu1 %v7973_v48  ;;  %v7988_v48 = vpack.c.bf16 %v5806_v47, %v5805_v46 }
 0x806   : > { %8005 = vmatprep.subr.bf16.mxu1 %v8648_v6 }
 0x808   : > { %7094 = vmatmul.mubr.f32.vlgmr.msra.gmra.mrb[16].mxu1 %v8984_v11 }
 0x809   : > { %8007 = vmatpush3.bf16.msra.mxu1 %v8006_v51  ;;  %7184 = vmatprep.mubr.msk.f32.mxu1 %vm8647_vm0, %v8646_v1  ;;  %v7991_v51 = vpack.c.bf16 %v5808_v50, %v5807_v49  ;;  %v5854_v49 = vld [vmem:[%s11023_s12 + $0x70] sm:$0xff]  ;;  %v5855_v50 = vld [vmem:[%s11023_s12 + $0x78] sm:$0xff] }
 0x80a   : > { %8008 = vmatprep.subr.bf16.mxu1 %v8648_v6 }
 0x80d   : > { %8010 = vmatpush3.bf16.msra.mxu1 %v8009_v54  ;;  %v7994_v54 = vpack.c.bf16 %v5810_v53, %v5809_v52 }
 0x80e   : > { %8011 = vmatprep.subr.bf16.mxu1 %v8648_v6 }
 0x811   : > { %8013 = vmatpush3.bf16.msra.mxu1 %v8012_v57  ;;  %v7997_v57 = vpack.c.bf16 %v5812_v56, %v5811_v55  ;;  %v3002_v55 = vld [vmem:[%s11027_s16 + $0x18] sm:$0xff] }
 0x812   : > { %8014 = vmatprep.subr.bf16.mxu1 %v8648_v6 }
 0x815   : > { %8016 = vmatpush3.bf16.msra.mxu1 %v8015_v60  ;;  %v8000_v60 = vpack.c.bf16 %v5814_v59, %v5813_v58  ;;  %v3001_v58 = vld [vmem:[%s11027_s16 + $0x10] sm:$0xff] }
 0x816   : > { %8017 = vmatprep.subr.bf16.mxu1 %v8648_v6 }
 0x819   : > { %8019 = vmatpush3.bf16.msra.mxu1 %v8018_v63  ;;  %v8003_v63 = vpack.c.bf16 %v5816_v62, %v5815_v61  ;;  %v3006_v61 = vld [vmem:[%s11027_s16 + $0x38] sm:$0xff] }
 0x81a   : > { %8020 = vmatprep.subr.bf16.mxu1 %v8648_v6 }
 0x81d   : > { %8022 = vmatpush3.bf16.msra.mxu1 %v8021_v3  ;;  %v8030_v3 = vpack.c.bf16 %v5834_v2, %v5833_v0  ;;  %v3005_v0 = vld [vmem:[%s11027_s16 + $0x30] sm:$0xff] }
 0x81e   : > { %8023 = vmatprep.subr.bf16.mxu1 %v8648_v6 }
 0x821   : > { %8025 = vmatpush3.bf16.msra.mxu1 %v8024_v7  ;;  %v9611_v7 = vld [vmem:[#allocation2] sm:$0xff] }
 0x822   : > { %8026 = vmatprep.subr.bf16.mxu1 %v8648_v6 }
 0x825   : > { %8028 = vmatpush3.bf16.msra.mxu1 %v8027_v10  ;;  %v5838_v10 = vld [vmem:[%s11022_s11 + $0x1a8] sm:$0xff] }
 0x826   : > { %7222 = vmatprep.subr.mxu1 %v8646_v1 }
 0x828   : > { %7185 = vmatmul.mubr.f32.vlgmr.msra.gmra.mrb[18].mxu1 %v8984_v11 }
 0x829   : > { %7224 = vmatprep.mubr.msk.f32.mxu1 %vm8647_vm0, %v8646_v1 }
 0x89b   : > { %v1875_v12 = vpop.f32.mrb[12].mxu1 }
 0x89c   : > { %v9513_v13 = vadd.f32 %v9309_v37, %v1875_v12  ;;  %v6979_v14 = vpop.f32.mrb[13].mxu1  ;;  %v8036_v12 = vpack.c.bf16 %v5838_v10, %v5837_v9  ;;  %v3009_v9 = vld [vmem:[%s11027_s16 + $0x50] sm:$0xff] }
 0x89d   : > { %v5839_v14 = vld [vmem:[%s11022_s11 + $0x1b0] sm:$0xff] }
 0x8bb   : > { %v2035_v15 = vpop.f32.mrb[14].mxu1 }
 0x8bc   : > { %v7025_v16 = vpop.f32.mrb[15].mxu1  ;;  %7099 = vmatmul.mubr.msk.f32.vlgmr.msra.gmra.mrb[18].mxu0 %vm1213_vm2, %v2035_v15  ;;  %v5840_v15 = vld [vmem:[%s11022_s11 + $0x1b8] sm:$0xff] }
 0x8bd   : > { %7103 = vmatprep.mubr.msk.f32.mxu0 %vm8647_vm0, %v8646_v1  ;;  %v8039_v16 = vpack.c.bf16 %v5840_v15, %v5839_v14  ;;  %v3014_v14 = vld [vmem:[%s11027_s16 + $0x78] sm:$0xff] }
 0x8db   : > { %v2209_v17 = vpop.f32.mrb[16].mxu1 }
 0x8dc   : > { %v7095_v18 = vpop.f32.mrb[17].mxu1  ;;  %7102 = vmatpush3.msra.mxu0 %v2209_v17  ;;  %v5841_v17 = vld [vmem:[%s11022_s11 + $0x1c0] sm:$0xff] }
 0x8dd   : > { %7975 = vmatprep.subr.bf16.mxu0 %v8648_v6  ;;  %v5842_v18 = vld [vmem:[%s11022_s11 + $0x1c8] sm:$0xff] }
 0x8fb   : > { %v2623_v11 = vpop.f32.mrb[18].mxu1 }
 0x8fc   : > { %v7186_v19 = vpop.f32.mrb[19].mxu1  ;;  %7223 = vmatpush3.xpose.msk.msra.mxu1 %vm1213_vm2, %v2623_v11  ;;  %v8042_v11 = vpack.c.bf16 %v5842_v18, %v5841_v17  ;;  %v3013_v17 = vld [vmem:[%s11027_s16 + $0x70] sm:$0xff] }
 0x8fd   : > { %7227 = vmatprep.subr.mxu1 %v8646_v1  ;;  %v5843_v19 = vld [vmem:[%s11022_s11 + $0x1d0] sm:$0xff] }
 0x98f   : > { %v2285_v37 = vpop.f32.mrb[18].mxu0 }
 0x990   : > { %v2289_v20 = vmul.f32 0.17677669, %v2285_v37  ;;  %v7100_v21 = vpop.f32.mrb[19].mxu0  ;;  %v5844_v37 = vld [vmem:[%s11022_s11 + $0x1d8] sm:$0xff] }
 0x991   : > { %v5845_v21 = vld [vmem:[%s11022_s11 + $0x1e0] sm:$0xff] }
 0x992   : > { %v2290_v22 = vsel %vm713_vm1, %v2289_v20, -inf }
 0x993   : > { %2291 = vmax.xlane.f32.xlu0 %v2290_v22  ;;  %v5846_v22 = vld [vmem:[%s11022_s11 + $0x1e8] sm:$0xff] }
 0xa20   : > { %v2292_v23 = vpop.xlane.xlu0 %2291 }
 0xa21   : > { %v2293_v24 = vsub.f32 %v2289_v20, %v2292_v23  ;;  %v8045_v20 = vpack.c.bf16 %v5844_v37, %v5843_v19  ;;  %v8048_v23 = vpack.c.bf16 %v5846_v22, %v5845_v21  ;;  %v3018_v19 = vld [vmem:[%s11027_s16 + $0x98] sm:$0xff]  ;;  %v3017_v21 = vld [vmem:[%s11027_s16 + $0x90] sm:$0xff] }
 0xa23   : > { %v2294_v25 = vmul.f32 1.442695, %v2293_v24  ;;  %v5847_v24 = vld [vmem:[%s11022_s11 + $0x1f0] sm:$0xff] }
 0xa25   : > { %8549 = vpow2.f32 %v2294_v25  ;;  %v5848_v25 = vld [vmem:[%s11022_s11 + $0x1f8] sm:$0xff] }
 0xa2f   : > { %v8550_v26 = vpop.eup %8549 }
 0xa30   : > { %v2296_v27 = vsel %vm713_vm1, %v8550_v26, 0.0 }
 0xa31   : > { %2297 = vadd.xlane.f32.xlu1 %v2296_v27 }
 0xabe   : > { %v2298_v28 = vpop.xlane.xlu1 %2297 }
 0xabf   : > { %8551 = vrcp.f32 %v2298_v28 }
 0xac9   : > { %v8552_v31 = vpop.eup %8551 }
 0xaca   : > { %v2300_v33 = vmul.f32 %v8552_v31, %v8550_v26  ;;  %v8051_v26 = vpack.c.bf16 %v5848_v25, %v5847_v24  ;;  %v3022_v24 = vld [vmem:[%s11027_s16 + $0xb8] sm:$0xff] }
 0xacc   : > { %7104 = vmatmul.mubr.msk.f32.vlgmr.msra.gmra.mrb[20].mxu0 %vm713_vm1, %v2300_v33 }
 0xacd   : > { %7977 = vmatpush3.bf16.msra.mxu0 %v7976_v32  ;;  %7114 = vmatprep.mubr.msk.f32.mxu0 %vm8647_vm0, %v8646_v1 }
 0xace   : > { %7978 = vmatprep.subr.bf16.mxu0 %v8648_v6 }
 0xad1   : > { %7980 = vmatpush3.bf16.msra.mxu0 %v7979_v36 }
 0xad2   : > { %7981 = vmatprep.subr.bf16.mxu0 %v8648_v6 }
 0xb9f   : > { %v2370_v43 = vpop.f32.mrb[20].mxu0 }
 0xba0   : > { %v7105_v44 = vpop.f32.mrb[21].mxu0  ;;  %7115 = vmatmul.mubr.msk.f32.vlgmr.msra.gmra.mrb[22].mxu0 %vm1213_vm2, %v2370_v43 }
 0xba1   : > { %7983 = vmatpush3.bf16.msra.mxu0 %v7982_v40  ;;  %7149 = vmatprep.mubr.msk.f32.mxu0 %vm8647_vm0, %v8646_v1  ;;  %v5852_v44 = vld [vmem:[%s11023_s12 + $0x60] sm:$0xff] }
 0xba2   : > { %7984 = vmatprep.subr.bf16.mxu0 %v8648_v6 }
 0xba5   : > { %7986 = vmatpush3.bf16.msra.mxu0 %v7985_v45  ;;  %v5853_v45 = vld [vmem:[%s11023_s12 + $0x68] sm:$0xff] }
 0xba6   : > { %7987 = vmatprep.subr.bf16.mxu0 %v8648_v6  ;;  %v8054_v47 = vpack.c.bf16 %v5853_v45, %v5852_v44  ;;  %v3116_v44 = vld [vmem:[%s11029_s18] sm:$0xff] }
 0xba9   : > { %7989 = vmatpush3.bf16.msra.mxu0 %v7988_v48 }
 0xbaa   : > { %7990 = vmatprep.subr.bf16.mxu0 %v8648_v6 }
 0xbad   : > { %7992 = vmatpush3.bf16.msra.mxu0 %v7991_v51  ;;  %v8057_v51 = vpack.c.bf16 %v5855_v50, %v5854_v49 }
 0xbae   : > { %7993 = vmatprep.subr.bf16.mxu0 %v8648_v6 }
 0xbb1   : > { %7995 = vmatpush3.bf16.msra.mxu0 %v7994_v54  ;;  %v3000_v54 = vld [vmem:[%s11027_s16 + $0x8] sm:$0xff] }
 0xbb2   : > { %7996 = vmatprep.subr.bf16.mxu0 %v8648_v6  ;;  %v8059_v56 = vpack.c.bf16 %v3002_v55, %v3000_v54  ;;  %v3137_v54 = vld [vmem:[%s11029_s18 + $0xa8] sm:$0xff] }
 0xbb5   : > { %7998 = vmatpush3.bf16.msra.mxu0 %v7997_v57  ;;  %v2999_v57 = vld [vmem:[%s11027_s16] sm:$0xff] }
 0xbb6   : > { %7999 = vmatprep.subr.bf16.mxu0 %v8648_v6  ;;  %v8061_v59 = vpack.c.bf16 %v3001_v58, %v2999_v57  ;;  %v3120_v57 = vld [vmem:[%s11029_s18 + $0x20] sm:$0xff]  ;;  %v3121_v58 = vld [vmem:[%s11029_s18 + $0x28] sm:$0xff] }
 0xbb9   : > { %8001 = vmatpush3.bf16.msra.mxu0 %v8000_v60  ;;  %v3004_v60 = vld [vmem:[%s11027_s16 + $0x28] sm:$0xff] }
 0xbba   : > { %8002 = vmatprep.subr.bf16.mxu0 %v8648_v6  ;;  %v8063_v62 = vpack.c.bf16 %v3006_v61, %v3004_v60  ;;  %v3139_v60 = vld [vmem:[%s11029_s18 + $0xb8] sm:$0xff]  ;;  %v8101_v61 = vpack.c.bf16 %v3121_v58, %v3120_v57  ;;  %v3033_v57 = vlaneseq }
 0xbbc   : > { %v9897_v58 = vshrl.u32 %v3033_v57, 7 }
 0xbbd   : > { %8004 = vmatpush3.bf16.msra.mxu0 %v8003_v63  ;;  %v3003_v63 = vld [vmem:[%s11027_s16 + $0x20] sm:$0xff] }
 0xbbe   : > { %8029 = vmatprep.subr.bf16.mxu0 %v8648_v6  ;;  %v8065_v2 = vpack.c.bf16 %v3005_v0, %v3003_v63  ;;  %v3122_v63 = vld [vmem:[%s11029_s18 + $0x30] sm:$0xff]  ;;  %v3123_v0 = vld [vmem:[%s11029_s18 + $0x38] sm:$0xff] }
 0xbc0   : > { %7150 = vmatmul.mubr.f32.vlgmr.msra.gmra.mrb[24].mxu0 %v9611_v7 }
 0xbc1   : > { %8031 = vmatpush3.bf16.msra.mxu0 %v8030_v3  ;;  %7219 = vmatprep.mubr.msk.f32.mxu0 %vm8647_vm0, %v8646_v1  ;;  %v3008_v3 = vld [vmem:[%s11027_s16 + $0x48] sm:$0xff] }
 0xbc2   : > { %8032 = vmatprep.subr.bf16.mxu0 %v8648_v6  ;;  %v8067_v5 = vpack.c.bf16 %v3010_v4, %v3008_v3  ;;  %v3141_v3 = vld [vmem:[%s11029_s18 + $0xc8] sm:$0xff]  ;;  %v8105_v4 = vpack.c.bf16 %v3123_v0, %v3122_v63 }
 0xbc5   : > { %8034 = vmatpush3.bf16.msra.mxu0 %v8033_v8  ;;  %v3007_v8 = vld [vmem:[%s11027_s16 + $0x40] sm:$0xff] }
 0xbc6   : > { %8035 = vmatprep.subr.bf16.mxu0 %v8648_v6  ;;  %v8069_v10 = vpack.c.bf16 %v3009_v9, %v3007_v8  ;;  %v3124_v8 = vld [vmem:[%s11029_s18 + $0x40] sm:$0xff]  ;;  %v3125_v9 = vld [vmem:[%s11029_s18 + $0x48] sm:$0xff] }
 0xbc9   : > { %8037 = vmatpush3.bf16.msra.mxu0 %v8036_v12  ;;  %v3012_v12 = vld [vmem:[%s11027_s16 + $0x68] sm:$0xff] }
 0xbca   : > { %8038 = vmatprep.subr.bf16.mxu0 %v8648_v6  ;;  %v8071_v15 = vpack.c.bf16 %v3014_v14, %v3012_v12  ;;  %v3143_v12 = vld [vmem:[%s11029_s18 + $0xd8] sm:$0xff]  ;;  %v8109_v14 = vpack.c.bf16 %v3125_v9, %v3124_v8  ;;  %v5863_v9 = vld [vmem:[%s11020_s9 + $0x200] sm:$0xff] }
 0xbcd   : > { %8040 = vmatpush3.bf16.msra.mxu0 %v8039_v16  ;;  %v3011_v16 = vld [vmem:[%s11027_s16 + $0x60] sm:$0xff] }
 0xbce   : > { %8041 = vmatprep.subr.bf16.mxu0 %v8648_v6  ;;  %v8073_v18 = vpack.c.bf16 %v3013_v17, %v3011_v16  ;;  %v3126_v16 = vld [vmem:[%s11029_s18 + $0x50] sm:$0xff]  ;;  %v3127_v17 = vld [vmem:[%s11029_s18 + $0x58] sm:$0xff] }
 0xbd1   : > { %8043 = vmatpush3.bf16.msra.mxu0 %v8042_v11  ;;  %v3016_v11 = vld [vmem:[%s11027_s16 + $0x88] sm:$0xff] }
 0xbd2   : > { %8044 = vmatprep.subr.bf16.mxu0 %v8648_v6  ;;  %v8075_v37 = vpack.c.bf16 %v3018_v19, %v3016_v11  ;;  %v3145_v11 = vld [vmem:[%s11029_s18 + $0xe8] sm:$0xff]  ;;  %v8113_v19 = vpack.c.bf16 %v3127_v17, %v3126_v16  ;;  %v5865_v17 = vld [vmem:[%s11020_s9 + $0x210] sm:$0xff] }
 0xbd5   : > { %8046 = vmatpush3.bf16.msra.mxu0 %v8045_v20  ;;  %v3015_v20 = vld [vmem:[%s11027_s16 + $0x80] sm:$0xff] }
 0xbd6   : > { %8047 = vmatprep.subr.bf16.mxu0 %v8648_v6  ;;  %v8077_v22 = vpack.c.bf16 %v3017_v21, %v3015_v20  ;;  %v5857_v21 = vld [vmem:[%s11024_s13] ss:$0 sm:$0xff] }
 0xbd9   : > { %8049 = vmatpush3.bf16.msra.mxu0 %v8048_v23  ;;  %v3020_v23 = vld [vmem:[%s11027_s16 + $0xa8] sm:$0xff] }
 0xbda   : > { %8050 = vmatprep.subr.bf16.mxu0 %v8648_v6  ;;  %v8079_v25 = vpack.c.bf16 %v3022_v24, %v3020_v23 }
 0xbdd   : > { %8052 = vmatpush3.bf16.msra.mxu0 %v8051_v26  ;;  %v3019_v26 = vld [vmem:[%s11027_s16 + $0xa0] sm:$0xff] }
 0xbe0   : > { %7220 = vmatmul.mubr.f32.vlgmr.msra.gmra.mrb[26].mxu0 %v9611_v7 }
 0xc73   : > { %v2448_v27 = vpop.f32.mrb[22].mxu0 }
 0xc74   : > { %v9661_v28 = vadd.f32 %v2448_v27, %v9513_v13  ;;  %v7116_v29 = vpop.f32.mrb[23].mxu0  ;;  %v3021_v27 = vld [vmem:[%s11027_s16 + $0xb0] sm:$0xff] }
 0xc75   : > { %v8081_v29 = vpack.c.bf16 %v3021_v27, %v3019_v26 }
 0xc93   : > { %v2536_v30 = vpop.f32.mrb[24].mxu0 }
 0xc94   : > { %v7151_v31 = vpop.f32.mrb[25].mxu0  ;;  %7225 = vmatmul.mubr.msk.f32.vlgmr.msra.gmra.mrb[20].mxu1 %vm1213_vm2, %v2536_v30  ;;  %v3024_v30 = vld [vmem:[%s11027_s16 + $0xc8] sm:$0xff] }
 0xc95   : > { %7229 = vmatprep.mubr.msk.f32.mxu1 %vm8647_vm0, %v8646_v1  ;;  %v3026_v31 = vld [vmem:[%s11027_s16 + $0xd8] sm:$0xff] }
 0xcb3   : > { %v2710_v32 = vpop.f32.mrb[26].mxu0 }
 0xcb4   : > { %v7221_v33 = vpop.f32.mrb[27].mxu0  ;;  %7228 = vmatpush3.msra.mxu1 %v2710_v32  ;;  %v8083_v32 = vpack.c.bf16 %v3026_v31, %v3024_v30 }
 0xcb5   : > { %8053 = vmatprep.subr.bf16.mxu1 %v8648_v6  ;;  %v3023_v33 = vld [vmem:[%s11027_s16 + $0xc0] sm:$0xff] }
 0xd67   : > { %v2786_v34 = vpop.f32.mrb[20].mxu1 }
 0xd68   : > { %v2790_v35 = vmul.f32 0.17677669, %v2786_v34  ;;  %v7226_v36 = vpop.f32.mrb[21].mxu1  ;;  %v3025_v34 = vld [vmem:[%s11027_s16 + $0xd0] sm:$0xff] }
 0xd69   : > { %v3028_v36 = vld [vmem:[%s11027_s16 + $0xe8] sm:$0xff] }
 0xd6a   : > { %v2791_v38 = vsel %vm713_vm1, %v2790_v35, -inf }
 0xd6b   : > { %2792 = vmax.xlane.f32.xlu0 %v2791_v38  ;;  %v3030_v38 = vld [vmem:[%s11027_s16 + $0xf8] sm:$0xff] }
 0xdf8   : > { %v2793_v13 = vpop.xlane.xlu0 %2792 }
 0xdf9   : > { %v2794_v39 = vsub.f32 %v2790_v35, %v2793_v13  ;;  %v8085_v35 = vpack.c.bf16 %v3025_v34, %v3023_v33  ;;  %v8087_v13 = vpack.c.bf16 %v3030_v38, %v3028_v36 }
 0xdfb   : > { %v2795_v40 = vmul.f32 1.442695, %v2794_v39  ;;  %v3027_v39 = vld [vmem:[%s11027_s16 + $0xe0] sm:$0xff] }
 0xdfd   : > { %8553 = vpow2.f32 %v2795_v40  ;;  %v3029_v40 = vld [vmem:[%s11027_s16 + $0xf0] sm:$0xff] }
 0xe07   : > { %v8554_v41 = vpop.eup %8553 }
 0xe08   : > { %v2797_v42 = vsel %vm713_vm1, %v8554_v41, 0.0 }
 0xe09   : > { %2798 = vadd.xlane.f32.xlu1 %v2797_v42  ;;  %v3132_v42 = vld [vmem:[%s11029_s18 + $0x80] sm:$0xff] }
 0xe96   : > { %v2799_v43 = vpop.xlane.xlu1 %2798 }
 0xe97   : > { %8555 = vrcp.f32 %v2799_v43  ;;  %v3133_v43 = vld [vmem:[%s11029_s18 + $0x88] sm:$0xff] }
 0xe98   : > { %v8091_v45 = vpack.c.bf16 %v3133_v43, %v3132_v42 }
 0xe9a   : > { %8092 = vmatprep.subr.bf16.mxu0 %v8091_v45  ;;  %v5859_v45 = vld [vmem:[%s11026_s15] ss:$0 sm:$0xff] }
 0xea1   : > { %v8556_v46 = vpop.eup %8555 }
 0xea2   : > { %v2801_v48 = vmul.f32 %v8556_v46, %v8554_v41  ;;  %v8089_v41 = vpack.c.bf16 %v3029_v40, %v3027_v39  ;;  %v3117_v46 = vld [vmem:[%s11029_s18 + $0x8] sm:$0xff] }
 0xea3   : > { %v8093_v49 = vpack.c.bf16 %v3117_v46, %v3116_v44 }
 0xea4   : > { %7230 = vmatmul.mubr.msk.f32.vlgmr.msra.gmra.mrb[22].mxu1 %vm713_vm1, %v2801_v48  ;;  %v3135_v48 = vld [vmem:[%s11029_s18 + $0x98] sm:$0xff] }
 0xea5   : > { %8055 = vmatpush3.bf16.msra.mxu1 %v8054_v47  ;;  %7240 = vmatprep.mubr.msk.f32.mxu1 %vm8647_vm0, %v8646_v1  ;;  %v3134_v47 = vld [vmem:[%s11029_s18 + $0x90] sm:$0xff] }
 0xea6   : > { %8056 = vmatprep.subr.bf16.mxu1 %v8648_v6  ;;  %v8095_v50 = vpack.c.bf16 %v3135_v48, %v3134_v47  ;;  %8094 = vmatpush3.bf16.msra.mxu0 %v8093_v49  ;;  %v3128_v48 = vld [vmem:[%s11029_s18 + $0x60] sm:$0xff]  ;;  %v3129_v49 = vld [vmem:[%s11029_s18 + $0x68] sm:$0xff] }
 0xea8   : > { %8096 = vmatprep.subr.bf16.mxu0 %v8095_v50  ;;  %v8117_v50 = vpack.c.bf16 %v3129_v49, %v3128_v48  ;;  %v5891_v48 = vld [vmem:[%s11021_s10 + $0x260] sm:$0xff]  ;;  %v5892_v49 = vld [vmem:[%s11021_s10 + $0x268] sm:$0xff] }
 0xea9   : > { %8058 = vmatpush3.bf16.msra.mxu1 %v8057_v51  ;;  %v3118_v51 = vld [vmem:[%s11029_s18 + $0x10] sm:$0xff] }
 0xeaa   : > { %8060 = vmatprep.subr.bf16.mxu1 %v8059_v56 }
 0xf77   : > { %v2871_v52 = vpop.f32.mrb[22].mxu1 }
 0xf78   : > { %v7231_v53 = vpop.f32.mrb[23].mxu1  ;;  %7241 = vmatmul.mubr.msk.f32.vlgmr.msra.gmra.mrb[24].mxu1 %vm1213_vm2, %v2871_v52  ;;  %v3119_v52 = vld [vmem:[%s11029_s18 + $0x18] sm:$0xff] }
 0xf79   : > { %3107 = vmatprep.mubr.f32.mxu1 %v8646_v1  ;;  %8062 = vmatpush1.bf16.msra.mxu1 %v8061_v59  ;;  %v3136_v53 = vld [vmem:[%s11029_s18 + $0xa0] sm:$0xff]  ;;  %v8097_v55 = vpack.c.bf16 %v3119_v52, %v3118_v51  ;;  %v3138_v59 = vld [vmem:[%s11029_s18 + $0xb0] sm:$0xff]  ;;  %v3147_v52 = vld [vmem:[%s11029_s18 + $0xf8] sm:$0xff] }
 0xf7a   : > { %8064 = vmatprep.subr.bf16.mxu1 %v8063_v62  ;;  %v8099_v56 = vpack.c.bf16 %v3137_v54, %v3136_v53  ;;  %v8103_v62 = vpack.c.bf16 %v3139_v60, %v3138_v59  ;;  %v3146_v51 = vld [vmem:[%s11029_s18 + $0xf0] sm:$0xff]  ;;  %v3035_v59 = vsub.s32 0, %v9897_v58  ;;  %v3031_v60 = vld [vmem:[%s11028_s17] sm:$0x3] }
 0xf7b   : > { %8098 = vmatpush3.bf16.msra.mxu0 %v8097_v55  ;;  %v8119_v53 = vpack.c.bf16 %v3147_v52, %v3146_v51  ;;  %v3130_v54 = vld [vmem:[%s11029_s18 + $0x70] sm:$0xff]  ;;  %v3131_v55 = vld [vmem:[%s11029_s18 + $0x78] sm:$0xff] }
 0xf7c   : > { %8100 = vmatprep.subr.bf16.mxu0 %v8099_v56  ;;  %v8121_v56 = vpack.c.bf16 %v3131_v55, %v3130_v54  ;;  %v5877_v51 = vld [vmem:[%s11020_s9 + $0x270] sm:$0xff]  ;;  %v5878_v52 = vld [vmem:[%s11020_s9 + $0x278] sm:$0xff] }
 0xf7d   : > { %8066 = vmatpush1.bf16.msra.mxu1 %v8065_v2  ;;  %v3140_v2 = vld [vmem:[%s11029_s18 + $0xc0] sm:$0xff]  ;;  %v5893_v54 = vld [vmem:[%s11021_s10 + $0x270] sm:$0xff]  ;;  %v5894_v55 = vld [vmem:[%s11021_s10 + $0x278] sm:$0xff] }
 0xf7e   : > { %8068 = vmatprep.subr.bf16.mxu1 %v8067_v5  ;;  %v8107_v5 = vpack.c.bf16 %v3141_v3, %v3140_v2 }
 0xf7f   : > { %8102 = vmatpush3.bf16.msra.mxu0 %v8101_v61  ;;  %v3039_v61 = vsub.s32 1, %v9897_v58 }
 0xf80   : > { %8104 = vmatprep.subr.bf16.mxu0 %v8103_v62  ;;  %v3036_v62 = vrot.slane %v3031_v60, %v3035_v59 }
 0xf81   : > { %8070 = vmatpush1.bf16.msra.mxu1 %v8069_v10  ;;  %v3142_v10 = vld [vmem:[%s11029_s18 + $0xd0] sm:$0xff]  ;;  %v3040_v63 = vrot.slane %v3031_v60, %v3039_v61  ;;  %v5860_v60 = vld [vmem:[%s11030_s19] ss:$0 sm:$0xff] }
 0xf82   : > { %8072 = vmatprep.subr.bf16.mxu1 %v8071_v15  ;;  %v8111_v15 = vpack.c.bf16 %v3143_v12, %v3142_v10  ;;  %v5864_v10 = vld [vmem:[%s11020_s9 + $0x208] sm:$0xff] }
 0xf83   : > { %8106 = vmatpush3.bf16.msra.mxu0 %v8105_v4  ;;  %v8124_v12 = vpack.c.bf16 %v5864_v10, %v5863_v9 }
 0xf84   : > { %8108 = vmatprep.subr.bf16.mxu0 %v8107_v5 }
 0xf85   : > { %8074 = vmatpush1.bf16.msra.mxu1 %v8073_v18  ;;  %v3144_v18 = vld [vmem:[%s11029_s18 + $0xe0] sm:$0xff] }
 0xf86   : > { %8076 = vmatprep.subr.bf16.mxu1 %v8075_v37  ;;  %v8115_v37 = vpack.c.bf16 %v3145_v11, %v3144_v18  ;;  %v5866_v18 = vld [vmem:[%s11020_s9 + $0x218] sm:$0xff] }
 0xf87   : > { %8110 = vmatpush3.bf16.msra.mxu0 %v8109_v14  ;;  %v5879_v14 = vld [vmem:[%s11021_s10 + $0x200] sm:$0xff]  ;;  %v8127_v11 = vpack.c.bf16 %v5866_v18, %v5865_v17 }
 0xf88   : > { %8112 = vmatprep.subr.bf16.mxu0 %v8111_v15  ;;  %v5880_v15 = vld [vmem:[%s11021_s10 + $0x208] sm:$0xff] }
 0xf89   : > { %8078 = vmatpush1.bf16.msra.mxu1 %v8077_v22  ;;  %v8148_v16 = vpack.c.bf16 %v5880_v15, %v5879_v14 }
 0xf8a   : > { %8080 = vmatprep.subr.bf16.mxu1 %v8079_v25 }
 0xf8b   : > { %8114 = vmatpush3.bf16.msra.mxu0 %v8113_v19  ;;  %v5881_v19 = vld [vmem:[%s11021_s10 + $0x210] sm:$0xff] }
 0xf8c   : > { %8116 = vmatprep.subr.bf16.mxu0 %v8115_v37  ;;  %v5882_v37 = vld [vmem:[%s11021_s10 + $0x218] sm:$0xff] }
 0xf8d   : > { %8082 = vmatpush1.bf16.msra.mxu1 %v8081_v29 }
 0xf8e   : > { %8084 = vmatprep.subr.bf16.mxu1 %v8083_v32 }
 0xf8f   : > { %8118 = vmatpush3.bf16.msra.mxu0 %v8117_v50  ;;  %v8166_v50 = vpack.c.bf16 %v5892_v49, %v5891_v48  ;;  %v5909_v48 = vld [vmem:[%s11022_s11 + $0x270] sm:$0xff]  ;;  %v5910_v49 = vld [vmem:[%s11022_s11 + $0x278] sm:$0xff] }
 0xf90   : > { %8120 = vmatprep.subr.bf16.mxu0 %v8119_v53  ;;  %v8145_v53 = vpack.c.bf16 %v5878_v52, %v5877_v51  ;;  %v5934_v51 = vld [vmem:[%s11021_s10 + $0x280] sm:$0xff]  ;;  %v5935_v52 = vld [vmem:[%s11021_s10 + $0x288] sm:$0xff] }
 0xf91   : > { %8086 = vmatpush1.bf16.msra.mxu1 %v8085_v35 }
 0xf92   : > { %8088 = vmatprep.subr.bf16.mxu1 %v8087_v13 }
 0xf93   : > { %8122 = vmatpush3.bf16.msra.mxu0 %v8121_v56  ;;  %v8169_v56 = vpack.c.bf16 %v5894_v55, %v5893_v54  ;;  %v5936_v54 = vld [vmem:[%s11021_s10 + $0x290] sm:$0xff]  ;;  %v5937_v55 = vld [vmem:[%s11021_s10 + $0x298] sm:$0xff] }
 0xf94   : > { %8147 = vmatprep.subr.bf16.mxu0 %v8648_v6 }
 0xf95   : > { %8090 = vmatpush1.bf16.msra.mxu1 %v8089_v41 }
 0xf96   : > { %8123 = vmatprep.subr.bf16.mxu1 %v8648_v6 }
0x104b   : > { %v2949_v20 = vpop.f32.mrb[24].mxu1 }
0x104c   : > { %v2953_v22 = vadd.f32 %v2949_v20, %v9661_v28  ;;  %v7242_v23 = vpop.f32.mrb[25].mxu1  ;;  %v8151_v20 = vpack.c.bf16 %v5882_v37, %v5881_v19 }
0x104e   : > { %v2961_v24 = vadd.f32 %v5857_v21, %v2953_v22  ;;  %v5867_v21 = vld [vmem:[%s11020_s9 + $0x220] sm:$0xff]  ;;  %v5868_v22 = vld [vmem:[%s11020_s9 + $0x228] sm:$0xff] }
0x104f   : > { %v8130_v23 = vpack.c.bf16 %v5868_v22, %v5867_v21 }
0x1050   : > { %v2962_v25 = vadd.f32 %v9611_v7, %v2961_v24  ;;  %v5858_v7 = vld [vmem:[%s11025_s14] ss:$0 sm:$0xff] }
0x1051   : > { %v5883_v24 = vld [vmem:[%s11021_s10 + $0x220] sm:$0xff] }
0x1052   : > { %v2965_v26 = vrot.slane %v2962_v25, 4 }
0x1054   : > { %v2966_v27 = vadd.f32 %v2965_v26, %v2962_v25 }
0x1056   : > { %v2967_v29 = vrot.slane %v2966_v27, 2 }
0x1058   : > { %v2968_v30 = vadd.f32 %v2967_v29, %v2966_v27  ;;  %v5869_v27 = vld [vmem:[%s11020_s9 + $0x230] sm:$0xff]  ;;  %v5870_v29 = vld [vmem:[%s11020_s9 + $0x238] sm:$0xff] }
0x105a   : > { %v2969_v31 = vrot.slane %v2968_v30, 1 }
0x105c   : > { %v2970_v32 = vadd.f32 %v2969_v31, %v2968_v30  ;;  %v8133_v30 = vpack.c.bf16 %v5870_v29, %v5869_v27  ;;  %v5885_v31 = vld [vmem:[%s11021_s10 + $0x230] sm:$0xff] }
0x105e   : > { %v2972_v33 = vmul.f32 0.125, %v2970_v32  ;;  %v5886_v32 = vld [vmem:[%s11021_s10 + $0x238] sm:$0xff] }
0x1060   : > { %v2973_v34 = vsub.f32 %v2962_v25, %v2972_v33  ;;  %v5884_v25 = vld [vmem:[%s11021_s10 + $0x228] sm:$0xff]  ;;  %v8157_v33 = vpack.c.bf16 %v5886_v32, %v5885_v31  ;;  %v5897_v31 = vld [vmem:[%s11022_s11 + $0x210] sm:$0xff]  ;;  %v5898_v32 = vld [vmem:[%s11022_s11 + $0x218] sm:$0xff] }
0x1061   : > { %v8154_v26 = vpack.c.bf16 %v5884_v25, %v5883_v24  ;;  %v5895_v24 = vld [vmem:[%s11022_s11 + $0x200] sm:$0xff]  ;;  %v5896_v25 = vld [vmem:[%s11022_s11 + $0x208] sm:$0xff] }
0x1062   : > { %v2974_v35 = vmul.f32 %v2973_v34, %v2973_v34  ;;  %v8172_v29 = vpack.c.bf16 %v5896_v25, %v5895_v24 }
0x1064   : > { %v2975_v36 = vrot.slane %v2974_v35, 4 }
0x1066   : > { %v2976_v38 = vadd.f32 %v2975_v36, %v2974_v35  ;;  %v5872_v35 = vld [vmem:[%s11020_s9 + $0x248] sm:$0xff] }
0x1068   : > { %v2977_v13 = vrot.slane %v2976_v38, 2 }
0x106a   : > { %v2978_v39 = vadd.f32 %v2977_v13, %v2976_v38  ;;  %v5887_v38 = vld [vmem:[%s11021_s10 + $0x240] sm:$0xff]  ;;  %v5888_v13 = vld [vmem:[%s11021_s10 + $0x248] sm:$0xff] }
0x106c   : > { %v2979_v40 = vrot.slane %v2978_v39, 1 }
0x106e   : > { %v2980_v41 = vadd.f32 %v2979_v40, %v2978_v39  ;;  %v8160_v39 = vpack.c.bf16 %v5888_v13, %v5887_v38  ;;  %v5873_v40 = vld [vmem:[%s11020_s9 + $0x250] sm:$0xff]  ;;  %v5902_v13 = vld [vmem:[%s11022_s11 + $0x238] sm:$0xff] }
0x106f   : > { %v5901_v38 = vld [vmem:[%s11022_s11 + $0x230] sm:$0xff] }
0x1070   : > { %v2981_v28 = vmul.f32 0.125, %v2980_v41  ;;  %v5874_v41 = vld [vmem:[%s11020_s9 + $0x258] sm:$0xff] }
0x1072   : > { %v2982_v42 = vadd.f32 1e-05, %v2981_v28  ;;  %v8139_v28 = vpack.c.bf16 %v5874_v41, %v5873_v40  ;;  %v5903_v40 = vld [vmem:[%s11022_s11 + $0x240] sm:$0xff]  ;;  %v5904_v41 = vld [vmem:[%s11022_s11 + $0x248] sm:$0xff] }
0x1074   : > { %8557 = vrsqrt.f32 %v2982_v42  ;;  %v5889_v42 = vld [vmem:[%s11021_s10 + $0x250] sm:$0xff] }
0x107e   : > { %v8558_v43 = vpop.eup %8557 }
0x107f   : > { %v2984_v44 = vmul.f32 %v8558_v43, %v2973_v34  ;;  %v5871_v34 = vld [vmem:[%s11020_s9 + $0x240] sm:$0xff]  ;;  %v5890_v43 = vld [vmem:[%s11021_s10 + $0x258] sm:$0xff] }
0x1080   : > { %v8136_v36 = vpack.c.bf16 %v5872_v35, %v5871_v34  ;;  %v5899_v34 = vld [vmem:[%s11022_s11 + $0x220] sm:$0xff]  ;;  %v5900_v35 = vld [vmem:[%s11022_s11 + $0x228] sm:$0xff] }
0x1081   : > { %v2991_v46 = vmul.f32 %v5858_v7, %v2984_v44  ;;  %v8163_v7 = vpack.c.bf16 %v5890_v43, %v5889_v42  ;;  %v5875_v44 = vld [vmem:[%s11020_s9 + $0x260] sm:$0xff]  ;;  %v5905_v42 = vld [vmem:[%s11022_s11 + $0x250] sm:$0xff]  ;;  %v5906_v43 = vld [vmem:[%s11022_s11 + $0x258] sm:$0xff] }
0x1083   : > { %v9873_v47 = vadd.f32 %v5859_v45, %v2991_v46  ;;  %v5876_v45 = vld [vmem:[%s11020_s9 + $0x268] sm:$0xff] }
0x1084   : > { %v8142_v46 = vpack.c.bf16 %v5876_v45, %v5875_v44  ;;  %v5907_v44 = vld [vmem:[%s11022_s11 + $0x260] sm:$0xff]  ;;  %v5908_v45 = vld [vmem:[%s11022_s11 + $0x268] sm:$0xff] }
0x1085   : > { %3108 = vmatmul.mubr.f32.vlgmr.msra.gmra.mrb[26].mxu1 %v9873_v47 }
0x1086   : > { %7275 = vmatprep.mubr.msk.f32.mxu1 %vm8647_vm0, %v8646_v1  ;;  %8125 = vmatpush3.bf16.msra.mxu1 %v8124_v12 }
0x1087   : > { %8126 = vmatprep.subr.bf16.mxu1 %v8648_v6 }
0x108a   : > { %8128 = vmatpush3.bf16.msra.mxu1 %v8127_v11 }
0x108b   : > { %8129 = vmatprep.subr.bf16.mxu1 %v8648_v6 }
0x108e   : > { %8131 = vmatpush3.bf16.msra.mxu1 %v8130_v23 }
0x108f   : > { %8132 = vmatprep.subr.bf16.mxu1 %v8648_v6 }
0x1092   : > { %8134 = vmatpush3.bf16.msra.mxu1 %v8133_v30 }
0x1093   : > { %8135 = vmatprep.subr.bf16.mxu1 %v8648_v6 }
0x1096   : > { %8137 = vmatpush3.bf16.msra.mxu1 %v8136_v36  ;;  %v8178_v36 = vpack.c.bf16 %v5900_v35, %v5899_v34 }
0x1097   : > { %8138 = vmatprep.subr.bf16.mxu1 %v8648_v6 }
0x109a   : > { %8140 = vmatpush3.bf16.msra.mxu1 %v8139_v28  ;;  %v8184_v28 = vpack.c.bf16 %v5904_v41, %v5903_v40  ;;  %v5920_v41 = vld [vmem:[%s11020_s9 + $0x290] sm:$0xff] }
0x109b   : > { %8141 = vmatprep.subr.bf16.mxu1 %v8648_v6 }
0x109e   : > { %8143 = vmatpush3.bf16.msra.mxu1 %v8142_v46  ;;  %v8190_v46 = vpack.c.bf16 %v5908_v45, %v5907_v44  ;;  %v5924_v45 = vld [vmem:[%s11020_s9 + $0x2b0] sm:$0xff] }
0x109f   : > { %8144 = vmatprep.subr.bf16.mxu1 %v8648_v6 }
0x10a2   : > { %8146 = vmatpush3.bf16.msra.mxu1 %v8145_v53  ;;  %v8220_v53 = vpack.c.bf16 %v5935_v52, %v5934_v51  ;;  %v5928_v52 = vld [vmem:[%s11020_s9 + $0x2d0] sm:$0xff] }
0x10a3   : > { %8171 = vmatprep.subr.bf16.mxu1 %v8648_v6 }
0x1158   : > { %v3109_v0 = vpop.f32.mrb[26].mxu1 }
0x1159   : > { %v3110_v2 = vadd.f32 %v3109_v0, %v3036_v62  ;;  %v3111_v3 = vpop.f32.mrb[27].mxu1 }
0x115a   : > { %v3112_v4 = vadd.f32 %v3111_v3, %v3040_v63 }
0x115b   : > { %v3114_v8 = vmax.f32 %v3110_v2, 0.0 }
0x115c   : > { %v3115_v5 = vmax.f32 %v3112_v4, 0.0 }
0x115e   : > { %3219 = vmatprep.mubr.f32.mxu0 %v3115_v5 }
0x115f   : > { %3220 = vmatmul.mubr.f32.vlgmr.msra.gmra.mrb[28].mxu0 %v3114_v8 }
0x1160   : > { %7310 = vmatprep.mubr.msk.f32.mxu0 %vm8647_vm0, %v8646_v1  ;;  %8149 = vmatpush3.bf16.msra.mxu0 %v8148_v16 }
0x1161   : > { %8150 = vmatprep.subr.bf16.mxu0 %v8648_v6 }
0x1164   : > { %8152 = vmatpush3.bf16.msra.mxu0 %v8151_v20 }
0x1165   : > { %8153 = vmatprep.subr.bf16.mxu0 %v8648_v6 }
0x1168   : > { %8155 = vmatpush3.bf16.msra.mxu0 %v8154_v26  ;;  %v5862_v26 = vld [vmem:[%s11032_s21] ss:$0 sm:$0xff] }
0x1169   : > { %8156 = vmatprep.subr.bf16.mxu0 %v8648_v6 }
0x116c   : > { %8158 = vmatpush3.bf16.msra.mxu0 %v8157_v33  ;;  %v8175_v33 = vpack.c.bf16 %v5898_v32, %v5897_v31 }
0x116d   : > { %8159 = vmatprep.subr.bf16.mxu0 %v8648_v6 }
0x1170   : > { %8161 = vmatpush3.bf16.msra.mxu0 %v8160_v39  ;;  %v8181_v39 = vpack.c.bf16 %v5902_v13, %v5901_v38  ;;  %v5919_v38 = vld [vmem:[%s11020_s9 + $0x288] sm:$0xff] }
0x1171   : > { %8162 = vmatprep.subr.bf16.mxu0 %v8648_v6 }
0x1174   : > { %8164 = vmatpush3.bf16.msra.mxu0 %v8163_v7  ;;  %v8187_v7 = vpack.c.bf16 %v5906_v43, %v5905_v42  ;;  %v5922_v43 = vld [vmem:[%s11020_s9 + $0x2a0] sm:$0xff] }
0x1175   : > { %8165 = vmatprep.subr.bf16.mxu0 %v8648_v6 }
0x1178   : > { %8167 = vmatpush3.bf16.msra.mxu0 %v8166_v50  ;;  %v8193_v50 = vpack.c.bf16 %v5910_v49, %v5909_v48  ;;  %v5926_v49 = vld [vmem:[%s11020_s9 + $0x2c0] sm:$0xff] }
0x1179   : > { %8168 = vmatprep.subr.bf16.mxu0 %v8648_v6 }
0x117c   : > { %8170 = vmatpush3.bf16.msra.mxu0 %v8169_v56  ;;  %v8223_v56 = vpack.c.bf16 %v5937_v55, %v5936_v54  ;;  %v5930_v55 = vld [vmem:[%s11020_s9 + $0x2e0] sm:$0xff] }
0x117d   : > { %7348 = vmatprep.subr.mxu0 %v8646_v1 }
0x1232   : > { %v6446_v57 = vpop.f32.mrb[28].mxu0 }
0x1233   : > { %v6447_v62 = vpop.f32.mrb[29].mxu0 }
0x1234   : > { %v6448_v63 = vadd.f32 %v6447_v62, %v6446_v57  ;;  %v5938_v57 = vld [vmem:[%s11021_s10 + $0x2a0] sm:$0xff] }
0x1236   : > { %v3222_v0 = vadd.f32 %v6448_v63, %v5860_v60  ;;  %v5939_v60 = vld [vmem:[%s11021_s10 + $0x2a8] sm:$0xff]  ;;  %v5940_v63 = vld [vmem:[%s11021_s10 + $0x2b0] sm:$0xff] }
0x1237   : > { %v8226_v62 = vpack.c.bf16 %v5939_v60, %v5938_v57  ;;  %v5932_v60 = vld [vmem:[%s11020_s9 + $0x2f0] sm:$0xff] }
0x1238   : > { %v3225_v2 = vadd.f32 %v3222_v0, %v9873_v47  ;;  %v5861_v47 = vld [vmem:[%s11031_s20] ss:$0 sm:$0xff]  ;;  %v5941_v0 = vld [vmem:[%s11021_s10 + $0x2b8] sm:$0xff] }
0x123a   : > { %v3228_v3 = vrot.slane %v3225_v2, 4 }
0x123c   : > { %v3229_v4 = vadd.f32 %v3228_v3, %v3225_v2  ;;  %v5942_v3 = vld [vmem:[%s11021_s10 + $0x2c0] sm:$0xff] }
0x123e   : > { %v3230_v5 = vrot.slane %v3229_v4, 2 }
0x1240   : > { %v3231_v8 = vadd.f32 %v3230_v5, %v3229_v4  ;;  %v5943_v4 = vld [vmem:[%s11021_s10 + $0x2c8] sm:$0xff] }
0x1241   : > { %v8232_v5 = vpack.c.bf16 %v5943_v4, %v5942_v3  ;;  %v5952_v4 = vld [vmem:[%s11022_s11 + $0x290] sm:$0xff] }
0x1242   : > { %v3232_v9 = vrot.slane %v3231_v8, 1 }
0x1244   : > { %v3233_v10 = vadd.f32 %v3232_v9, %v3231_v8  ;;  %v5944_v8 = vld [vmem:[%s11021_s10 + $0x2d0] sm:$0xff]  ;;  %v5945_v9 = vld [vmem:[%s11021_s10 + $0x2d8] sm:$0xff] }
0x1246   : > { %v3234_v12 = vmul.f32 0.125, %v3233_v10  ;;  %v8235_v10 = vpack.c.bf16 %v5945_v9, %v5944_v8  ;;  %v5954_v9 = vld [vmem:[%s11022_s11 + $0x2a0] sm:$0xff] }
0x1248   : > { %v3235_v14 = vsub.f32 %v3225_v2, %v3234_v12  ;;  %v8229_v2 = vpack.c.bf16 %v5941_v0, %v5940_v63  ;;  %v5946_v12 = vld [vmem:[%s11021_s10 + $0x2e0] sm:$0xff] }
0x1249   : > { %v5950_v0 = vld [vmem:[%s11022_s11 + $0x280] sm:$0xff] }
0x124a   : > { %v3236_v15 = vmul.f32 %v3235_v14, %v3235_v14 }
0x124c   : > { %v3237_v16 = vrot.slane %v3236_v15, 4 }
0x124e   : > { %v3238_v17 = vadd.f32 %v3237_v16, %v3236_v15  ;;  %v5948_v16 = vld [vmem:[%s11021_s10 + $0x2f0] sm:$0xff] }
0x1250   : > { %v3239_v18 = vrot.slane %v3238_v17, 2 }
0x1252   : > { %v3240_v11 = vadd.f32 %v3239_v18, %v3238_v17  ;;  %v5949_v17 = vld [vmem:[%s11021_s10 + $0x2f8] sm:$0xff] }
0x1253   : > { %v8241_v18 = vpack.c.bf16 %v5949_v17, %v5948_v16  ;;  %v5958_v17 = vld [vmem:[%s11022_s11 + $0x2c0] sm:$0xff] }
0x1254   : > { %v3241_v19 = vrot.slane %v3240_v11, 1 }
0x1256   : > { %v3242_v37 = vadd.f32 %v3241_v19, %v3240_v11 }
0x1258   : > { %v3243_v20 = vmul.f32 0.125, %v3242_v37 }
0x125a   : > { %v3244_v21 = vadd.f32 1e-05, %v3243_v20 }
0x125c   : > { %8559 = vrsqrt.f32 %v3244_v21 }
0x1266   : > { %v8560_v22 = vpop.eup %8559 }
0x1267   : > { %v3246_v23 = vmul.f32 %v8560_v22, %v3235_v14  ;;  %v5947_v14 = vld [vmem:[%s11021_s10 + $0x2e8] sm:$0xff] }
0x1268   : > { %v8238_v15 = vpack.c.bf16 %v5947_v14, %v5946_v12  ;;  %v5956_v14 = vld [vmem:[%s11022_s11 + $0x2b0] sm:$0xff] }
0x1269   : > { %v3253_v27 = vmul.f32 %v5861_v47, %v3246_v23 }
0x126b   : > { %v10038_v30 = vadd.f32 %v5862_v26, %v3253_v27 }
0x126d   : > { %7276 = vmatmul.mubr.f32.vlgmr.msra.gmra.mrb[28].mxu1 %v10038_v30  ;;  %7311 = vmatmul.mubr.f32.vlgmr.msra.gmra.mrb[30].mxu0 %v10038_v30 }
0x126e   : > { %8173 = vmatpush3.bf16.msra.mxu1 %v8172_v29  ;;  %7345 = vmatprep.mubr.msk.f32.mxu1 %vm8647_vm0, %v8646_v1 }
0x126f   : > { %8174 = vmatprep.subr.bf16.mxu1 %v8648_v6  ;;  %7350 = vmatprep.mubr.msk.f32.mxu0 %vm8647_vm0, %v8646_v1 }
0x1272   : > { %8176 = vmatpush3.bf16.msra.mxu1 %v8175_v33 }
0x1273   : > { %8177 = vmatprep.subr.bf16.mxu1 %v8648_v6 }
0x1276   : > { %8179 = vmatpush3.bf16.msra.mxu1 %v8178_v36  ;;  %v5918_v36 = vld [vmem:[%s11020_s9 + $0x280] sm:$0xff] }
0x1277   : > { %8180 = vmatprep.subr.bf16.mxu1 %v8648_v6 }
0x127a   : > { %8182 = vmatpush3.bf16.msra.mxu1 %v8181_v39  ;;  %v8196_v39 = vpack.c.bf16 %v5919_v38, %v5918_v36  ;;  %v5993_v38 = vld [vmem:[%s11021_s10 + $0x310] sm:$0xff] }
0x127b   : > { %8183 = vmatprep.subr.bf16.mxu1 %v8648_v6 }
0x127e   : > { %8185 = vmatpush3.bf16.msra.mxu1 %v8184_v28  ;;  %v5921_v28 = vld [vmem:[%s11020_s9 + $0x298] sm:$0xff] }
0x127f   : > { %8186 = vmatprep.subr.bf16.mxu1 %v8648_v6  ;;  %v8199_v42 = vpack.c.bf16 %v5921_v28, %v5920_v41  ;;  %v5995_v28 = vld [vmem:[%s11021_s10 + $0x320] sm:$0xff] }
0x1282   : > { %8188 = vmatpush3.bf16.msra.mxu1 %v8187_v7  ;;  %v5923_v7 = vld [vmem:[%s11020_s9 + $0x2a8] sm:$0xff] }
0x1283   : > { %8189 = vmatprep.subr.bf16.mxu1 %v8648_v6  ;;  %v8202_v44 = vpack.c.bf16 %v5923_v7, %v5922_v43  ;;  %v5997_v7 = vld [vmem:[%s11021_s10 + $0x330] sm:$0xff] }
0x1286   : > { %8191 = vmatpush3.bf16.msra.mxu1 %v8190_v46  ;;  %v5925_v46 = vld [vmem:[%s11020_s9 + $0x2b8] sm:$0xff] }
0x1287   : > { %8192 = vmatprep.subr.bf16.mxu1 %v8648_v6  ;;  %v8205_v48 = vpack.c.bf16 %v5925_v46, %v5924_v45  ;;  %v5999_v46 = vld [vmem:[%s11021_s10 + $0x340] sm:$0xff] }
0x128a   : > { %8194 = vmatpush3.bf16.msra.mxu1 %v8193_v50  ;;  %v5927_v50 = vld [vmem:[%s11020_s9 + $0x2c8] sm:$0xff] }
0x128b   : > { %8219 = vmatprep.subr.bf16.mxu1 %v8648_v6  ;;  %v8208_v51 = vpack.c.bf16 %v5927_v50, %v5926_v49  ;;  %v6001_v50 = vld [vmem:[%s11021_s10 + $0x350] sm:$0xff] }
0x128d   : > { %7346 = vmatmul.mubr.f32.vlgmr.msra.gmra.mrb[30].mxu1 %v10038_v30 }
0x128e   : > { %8221 = vmatpush3.bf16.msra.mxu1 %v8220_v53  ;;  %7425 = vmatprep.mubr.msk.f32.mxu1 %vm8647_vm0, %v8646_v1  ;;  %v5929_v53 = vld [vmem:[%s11020_s9 + $0x2d8] sm:$0xff] }
0x128f   : > { %8222 = vmatprep.subr.bf16.mxu1 %v8648_v6  ;;  %v8211_v54 = vpack.c.bf16 %v5929_v53, %v5928_v52  ;;  %v6003_v53 = vld [vmem:[%s11021_s10 + $0x360] sm:$0xff] }
0x1292   : > { %8224 = vmatpush3.bf16.msra.mxu1 %v8223_v56  ;;  %v5931_v56 = vld [vmem:[%s11020_s9 + $0x2e8] sm:$0xff] }
0x1293   : > { %8225 = vmatprep.subr.bf16.mxu1 %v8648_v6  ;;  %v8214_v57 = vpack.c.bf16 %v5931_v56, %v5930_v55  ;;  %v6005_v56 = vld [vmem:[%s11021_s10 + $0x370] sm:$0xff] }
0x1296   : > { %8227 = vmatpush3.bf16.msra.mxu1 %v8226_v62  ;;  %v5933_v62 = vld [vmem:[%s11020_s9 + $0x2f8] sm:$0xff] }
0x1297   : > { %8228 = vmatprep.subr.bf16.mxu1 %v8648_v6  ;;  %v8217_v63 = vpack.c.bf16 %v5933_v62, %v5932_v60 }
0x129a   : > { %8230 = vmatpush3.bf16.msra.mxu1 %v8229_v2  ;;  %v5951_v2 = vld [vmem:[%s11022_s11 + $0x288] sm:$0xff] }
0x129b   : > { %8231 = vmatprep.subr.bf16.mxu1 %v8648_v6  ;;  %v8244_v3 = vpack.c.bf16 %v5951_v2, %v5950_v0 }
0x129e   : > { %8233 = vmatpush3.bf16.msra.mxu1 %v8232_v5  ;;  %v5953_v5 = vld [vmem:[%s11022_s11 + $0x298] sm:$0xff] }
0x129f   : > { %8234 = vmatprep.subr.bf16.mxu1 %v8648_v6  ;;  %v8247_v8 = vpack.c.bf16 %v5953_v5, %v5952_v4 }
0x12a2   : > { %8236 = vmatpush3.bf16.msra.mxu1 %v8235_v10  ;;  %v5955_v10 = vld [vmem:[%s11022_s11 + $0x2a8] sm:$0xff] }
0x12a3   : > { %8237 = vmatprep.subr.bf16.mxu1 %v8648_v6  ;;  %v8250_v12 = vpack.c.bf16 %v5955_v10, %v5954_v9 }
0x12a6   : > { %8239 = vmatpush3.bf16.msra.mxu1 %v8238_v15  ;;  %v5957_v15 = vld [vmem:[%s11022_s11 + $0x2b8] sm:$0xff] }
0x12a7   : > { %8240 = vmatprep.subr.bf16.mxu1 %v8648_v6  ;;  %v8253_v16 = vpack.c.bf16 %v5957_v15, %v5956_v14 }
0x12aa   : > { %8242 = vmatpush3.bf16.msra.mxu1 %v8241_v18  ;;  %v5959_v18 = vld [vmem:[%s11022_s11 + $0x2c8] sm:$0xff] }
0x12ab   : > { %7463 = vmatprep.subr.mxu1 %v8646_v1 }
0x12ad   : > { %7426 = vmatmul.mubr.f32.vlgmr.msra.gmra.mrb[32].mxu1 %v10038_v30 }
0x12ae   : > { %7465 = vmatprep.mubr.msk.f32.mxu1 %vm8647_vm0, %v8646_v1 }
0x1340   : > { %v3344_v11 = vpop.f32.mrb[28].mxu1  ;;  %v3431_v19 = vpop.f32.mrb[30].mxu0 }
0x1341   : > { %v7277_v37 = vpop.f32.mrb[29].mxu1  ;;  %v7312_v20 = vpop.f32.mrb[31].mxu0  ;;  %7349 = vmatpush3.xpose.msk.msra.mxu0 %vm1213_vm2, %v3431_v19  ;;  %v5960_v19 = vld [vmem:[%s11022_s11 + $0x2d0] sm:$0xff] }
0x1342   : > { %7353 = vmatprep.subr.mxu0 %v8646_v1  ;;  %v5961_v37 = vld [vmem:[%s11022_s11 + $0x2d8] sm:$0xff] }
0x1343   : > { %v8259_v20 = vpack.c.bf16 %v5961_v37, %v5960_v19  ;;  %v5969_v37 = vld [vmem:[%s11023_s12 + $0xa0] sm:$0xff] }
0x1344   : > { %7351 = vmatmul.mubr.msk.f32.vlgmr.msra.gmra.mrb[32].mxu0 %vm1213_vm2, %v3344_v11  ;;  %v8256_v11 = vpack.c.bf16 %v5959_v18, %v5958_v17 }
0x1345   : > { %7355 = vmatprep.mubr.msk.f32.mxu0 %vm8647_vm0, %v8646_v1 }
0x1360   : > { %v3518_v21 = vpop.f32.mrb[30].mxu1 }
0x1361   : > { %v7347_v22 = vpop.f32.mrb[31].mxu1  ;;  %7354 = vmatpush3.msra.mxu0 %v3518_v21  ;;  %v5962_v21 = vld [vmem:[%s11022_s11 + $0x2e0] sm:$0xff] }
0x1362   : > { %8195 = vmatprep.subr.bf16.mxu0 %v8648_v6  ;;  %v5963_v22 = vld [vmem:[%s11022_s11 + $0x2e8] sm:$0xff] }
0x1380   : > { %v3858_v47 = vpop.f32.mrb[32].mxu1 }
0x1381   : > { %v7427_v23 = vpop.f32.mrb[33].mxu1  ;;  %7464 = vmatpush3.xpose.msk.msra.mxu1 %vm1213_vm2, %v3858_v47  ;;  %v8262_v47 = vpack.c.bf16 %v5963_v22, %v5962_v21 }
0x1382   : > { %7468 = vmatprep.subr.mxu1 %v8646_v1  ;;  %v5964_v23 = vld [vmem:[%s11022_s11 + $0x2f0] sm:$0xff] }
0x1417   : > { %v3594_v24 = vpop.f32.mrb[32].mxu0 }
0x1418   : > { %v3598_v25 = vmul.f32 0.17677669, %v3594_v24  ;;  %v7352_v26 = vpop.f32.mrb[33].mxu0  ;;  %v5965_v24 = vld [vmem:[%s11022_s11 + $0x2f8] sm:$0xff] }
0x1419   : > { %v5914_v26 = vld [vmem:[%s11023_s12 + $0x80] sm:$0xff] }
0x141a   : > { %v3599_v27 = vsel %vm713_vm1, %v3598_v25, -inf }
0x141b   : > { %3600 = vmax.xlane.f32.xlu0 %v3599_v27  ;;  %v5915_v27 = vld [vmem:[%s11023_s12 + $0x88] sm:$0xff] }
0x14a8   : > { %v3601_v29 = vpop.xlane.xlu0 %3600 }
0x14a9   : > { %v3602_v31 = vsub.f32 %v3598_v25, %v3601_v29  ;;  %v8265_v25 = vpack.c.bf16 %v5965_v24, %v5964_v23  ;;  %v8274_v29 = vpack.c.bf16 %v5915_v27, %v5914_v26  ;;  %v5971_v23 = vld [vmem:[%s11023_s12 + $0xb0] sm:$0xff]  ;;  %v5972_v24 = vld [vmem:[%s11023_s12 + $0xb8] sm:$0xff]  ;;  %v5975_v26 = vld [vmem:[%s11020_s9 + $0x300] sm:$0xff] }
0x14aa   : > { %v5976_v27 = vld [vmem:[%s11020_s9 + $0x308] sm:$0xff] }
0x14ab   : > { %v3603_v32 = vmul.f32 1.442695, %v3602_v31  ;;  %v5916_v31 = vld [vmem:[%s11023_s12 + $0x90] sm:$0xff] }
0x14ad   : > { %8561 = vpow2.f32 %v3603_v32  ;;  %v5917_v32 = vld [vmem:[%s11023_s12 + $0x98] sm:$0xff] }
0x14b7   : > { %v8562_v33 = vpop.eup %8561 }
0x14b8   : > { %v3605_v34 = vsel %vm713_vm1, %v8562_v33, 0.0 }
0x14b9   : > { %3606 = vadd.xlane.f32.xlu1 %v3605_v34  ;;  %v5991_v34 = vld [vmem:[%s11021_s10 + $0x300] sm:$0xff] }
0x1546   : > { %v3607_v35 = vpop.xlane.xlu1 %3606 }
0x1547   : > { %8563 = vrcp.f32 %v3607_v35  ;;  %v5992_v35 = vld [vmem:[%s11021_s10 + $0x308] sm:$0xff] }
0x1548   : > { %v8304_v36 = vpack.c.bf16 %v5992_v35, %v5991_v34 }
0x1551   : > { %v8564_v13 = vpop.eup %8563 }
0x1552   : > { %v3609_v40 = vmul.f32 %v8564_v13, %v8562_v33  ;;  %v8277_v33 = vpack.c.bf16 %v5917_v32, %v5916_v31  ;;  %v5994_v13 = vld [vmem:[%s11021_s10 + $0x318] sm:$0xff]  ;;  %v5977_v31 = vld [vmem:[%s11020_s9 + $0x310] sm:$0xff] }
0x1553   : > { %v8307_v41 = vpack.c.bf16 %v5994_v13, %v5993_v38  ;;  %v5978_v32 = vld [vmem:[%s11020_s9 + $0x318] sm:$0xff]  ;;  %v5980_v38 = vld [vmem:[%s11020_s9 + $0x328] sm:$0xff] }
0x1554   : > { %7356 = vmatmul.mubr.msk.f32.vlgmr.msra.gmra.mrb[34].mxu0 %vm713_vm1, %v3609_v40  ;;  %v8283_v35 = vpack.c.bf16 %v5978_v32, %v5977_v31  ;;  %v6054_v31 = vld [vmem:[%s11021_s10 + $0x3b8] sm:$0xff] }
0x1555   : > { %8197 = vmatpush3.bf16.msra.mxu0 %v8196_v39  ;;  %7390 = vmatprep.mubr.msk.f32.mxu0 %vm8647_vm0, %v8646_v1 }
0x1556   : > { %8198 = vmatprep.subr.bf16.mxu0 %v8648_v6 }
0x1559   : > { %8200 = vmatpush3.bf16.msra.mxu0 %v8199_v42  ;;  %v5996_v42 = vld [vmem:[%s11021_s10 + $0x328] sm:$0xff] }
0x155a   : > { %8201 = vmatprep.subr.bf16.mxu0 %v8648_v6  ;;  %v8310_v43 = vpack.c.bf16 %v5996_v42, %v5995_v28  ;;  %v5983_v28 = vld [vmem:[%s11020_s9 + $0x340] sm:$0xff]  ;;  %v5984_v42 = vld [vmem:[%s11020_s9 + $0x348] sm:$0xff] }
0x155d   : > { %8203 = vmatpush3.bf16.msra.mxu0 %v8202_v44  ;;  %v5998_v44 = vld [vmem:[%s11021_s10 + $0x338] sm:$0xff] }
0x155e   : > { %8204 = vmatprep.subr.bf16.mxu0 %v8648_v6  ;;  %v8313_v45 = vpack.c.bf16 %v5998_v44, %v5997_v7  ;;  %v5985_v7 = vld [vmem:[%s11020_s9 + $0x350] sm:$0xff]  ;;  %v5986_v44 = vld [vmem:[%s11020_s9 + $0x358] sm:$0xff] }
0x1561   : > { %8206 = vmatpush3.bf16.msra.mxu0 %v8205_v48  ;;  %v6000_v48 = vld [vmem:[%s11021_s10 + $0x348] sm:$0xff] }
0x1562   : > { %8207 = vmatprep.subr.bf16.mxu0 %v8648_v6  ;;  %v8316_v49 = vpack.c.bf16 %v6000_v48, %v5999_v46  ;;  %v5987_v46 = vld [vmem:[%s11020_s9 + $0x360] sm:$0xff]  ;;  %v5988_v48 = vld [vmem:[%s11020_s9 + $0x368] sm:$0xff] }
0x1565   : > { %8209 = vmatpush3.bf16.msra.mxu0 %v8208_v51  ;;  %v6002_v51 = vld [vmem:[%s11021_s10 + $0x358] sm:$0xff] }
0x1566   : > { %8210 = vmatprep.subr.bf16.mxu0 %v8648_v6  ;;  %v8319_v52 = vpack.c.bf16 %v6002_v51, %v6001_v50  ;;  %v5989_v50 = vld [vmem:[%s11020_s9 + $0x370] sm:$0xff]  ;;  %v5990_v51 = vld [vmem:[%s11020_s9 + $0x378] sm:$0xff] }
0x1569   : > { %8212 = vmatpush3.bf16.msra.mxu0 %v8211_v54  ;;  %v6004_v54 = vld [vmem:[%s11021_s10 + $0x368] sm:$0xff] }
0x156a   : > { %8213 = vmatprep.subr.bf16.mxu0 %v8648_v6  ;;  %v8322_v55 = vpack.c.bf16 %v6004_v54, %v6003_v53  ;;  %v6007_v53 = vld [vmem:[%s11022_s11 + $0x300] sm:$0xff]  ;;  %v6008_v54 = vld [vmem:[%s11022_s11 + $0x308] sm:$0xff] }
0x156d   : > { %8215 = vmatpush3.bf16.msra.mxu0 %v8214_v57  ;;  %v6006_v57 = vld [vmem:[%s11021_s10 + $0x378] sm:$0xff] }
0x156e   : > { %8216 = vmatprep.subr.bf16.mxu0 %v8648_v6  ;;  %v8325_v60 = vpack.c.bf16 %v6006_v57, %v6005_v56  ;;  %v6009_v56 = vld [vmem:[%s11022_s11 + $0x310] sm:$0xff]  ;;  %v6010_v57 = vld [vmem:[%s11022_s11 + $0x318] sm:$0xff] }
0x1571   : > { %8218 = vmatpush3.bf16.msra.mxu0 %v8217_v63 }
0x1572   : > { %8243 = vmatprep.subr.bf16.mxu0 %v8648_v6 }
0x1574   : > { %7391 = vmatmul.mubr.f32.vlgmr.msra.gmra.mrb[36].mxu0 %v10038_v30 }
0x1575   : > { %8245 = vmatpush3.bf16.msra.mxu0 %v8244_v3  ;;  %7460 = vmatprep.mubr.msk.f32.mxu0 %vm8647_vm0, %v8646_v1 }
0x1576   : > { %8246 = vmatprep.subr.bf16.mxu0 %v8648_v6 }
0x1579   : > { %8248 = vmatpush3.bf16.msra.mxu0 %v8247_v8 }
0x157a   : > { %8249 = vmatprep.subr.bf16.mxu0 %v8648_v6 }
0x157d   : > { %8251 = vmatpush3.bf16.msra.mxu0 %v8250_v12 }
0x157e   : > { %8252 = vmatprep.subr.bf16.mxu0 %v8648_v6 }
0x1581   : > { %8254 = vmatpush3.bf16.msra.mxu0 %v8253_v16 }
0x1582   : > { %8255 = vmatprep.subr.bf16.mxu0 %v8648_v6 }
0x1585   : > { %8257 = vmatpush3.bf16.msra.mxu0 %v8256_v11 }
0x1586   : > { %8258 = vmatprep.subr.bf16.mxu0 %v8648_v6 }
0x1589   : > { %8260 = vmatpush3.bf16.msra.mxu0 %v8259_v20  ;;  %v5970_v20 = vld [vmem:[%s11023_s12 + $0xa8] sm:$0xff] }
0x158a   : > { %8261 = vmatprep.subr.bf16.mxu0 %v8648_v6  ;;  %v8268_v22 = vpack.c.bf16 %v5970_v20, %v5969_v37  ;;  %v6047_v20 = vld [vmem:[%s11021_s10 + $0x380] sm:$0xff] }
0x158d   : > { %8263 = vmatpush3.bf16.msra.mxu0 %v8262_v47 }
0x158e   : > { %8264 = vmatprep.subr.bf16.mxu0 %v8648_v6 }
0x1591   : > { %8266 = vmatpush3.bf16.msra.mxu0 %v8265_v25  ;;  %v8271_v25 = vpack.c.bf16 %v5972_v24, %v5971_v23  ;;  %v6050_v23 = vld [vmem:[%s11021_s10 + $0x398] sm:$0xff] }
0x1592   : > { %8273 = vmatprep.subr.bf16.mxu0 %v8648_v6 }
0x1594   : > { %7461 = vmatmul.mubr.f32.vlgmr.msra.gmra.mrb[38].mxu0 %v10038_v30 }
0x1595   : > { %8275 = vmatpush3.bf16.msra.mxu0 %v8274_v29  ;;  %7492 = vmatprep.mubr.msk.f32.mxu0 %vm8647_vm0, %v8646_v1  ;;  %v8280_v29 = vpack.c.bf16 %v5976_v27, %v5975_v26  ;;  %v6052_v26 = vld [vmem:[%s11021_s10 + $0x3a8] sm:$0xff] }
0x1596   : > { %8276 = vmatprep.subr.bf16.mxu0 %v8648_v6 }
0x1599   : > { %8278 = vmatpush3.bf16.msra.mxu0 %v8277_v33 }
0x159a   : > { %8303 = vmatprep.subr.bf16.mxu0 %v8648_v6 }
0x1627   : > { %v3679_v39 = vpop.f32.mrb[34].mxu0 }
0x1628   : > { %v7357_v40 = vpop.f32.mrb[35].mxu0  ;;  %7493 = vmatmul.mubr.msk.f32.vlgmr.msra.gmra.mrb[40].mxu0 %vm1213_vm2, %v3679_v39  ;;  %v5981_v39 = vld [vmem:[%s11020_s9 + $0x330] sm:$0xff] }
0x1629   : > { %8305 = vmatpush3.bf16.msra.mxu0 %v8304_v36  ;;  %7562 = vmatprep.mubr.msk.f32.mxu0 %vm8647_vm0, %v8646_v1  ;;  %v5979_v36 = vld [vmem:[%s11020_s9 + $0x320] sm:$0xff]  ;;  %v5982_v40 = vld [vmem:[%s11020_s9 + $0x338] sm:$0xff] }
0x162a   : > { %8306 = vmatprep.subr.bf16.mxu0 %v8648_v6  ;;  %v8286_v13 = vpack.c.bf16 %v5980_v38, %v5979_v36  ;;  %v6057_v36 = vld [vmem:[%s11021_s10 + $0x3d0] sm:$0xff]  ;;  %v6058_v38 = vld [vmem:[%s11021_s10 + $0x3d8] sm:$0xff] }
0x162d   : > { %8308 = vmatpush3.bf16.msra.mxu0 %v8307_v41  ;;  %v8289_v41 = vpack.c.bf16 %v5982_v40, %v5981_v39  ;;  %v6059_v39 = vld [vmem:[%s11021_s10 + $0x3e0] sm:$0xff]  ;;  %v6060_v40 = vld [vmem:[%s11021_s10 + $0x3e8] sm:$0xff] }
0x162e   : > { %8309 = vmatprep.subr.bf16.mxu0 %v8648_v6 }
0x1631   : > { %8311 = vmatpush3.bf16.msra.mxu0 %v8310_v43  ;;  %v8292_v43 = vpack.c.bf16 %v5984_v42, %v5983_v28  ;;  %v6061_v28 = vld [vmem:[%s11021_s10 + $0x3f0] sm:$0xff]  ;;  %v6062_v42 = vld [vmem:[%s11021_s10 + $0x3f8] sm:$0xff] }
0x1632   : > { %8312 = vmatprep.subr.bf16.mxu0 %v8648_v6 }
0x1635   : > { %8314 = vmatpush3.bf16.msra.mxu0 %v8313_v45  ;;  %v8295_v45 = vpack.c.bf16 %v5986_v44, %v5985_v7 }
0x1636   : > { %8315 = vmatprep.subr.bf16.mxu0 %v8648_v6 }
0x1639   : > { %8317 = vmatpush3.bf16.msra.mxu0 %v8316_v49  ;;  %v8298_v49 = vpack.c.bf16 %v5988_v48, %v5987_v46 }
0x163a   : > { %8318 = vmatprep.subr.bf16.mxu0 %v8648_v6 }
0x163d   : > { %8320 = vmatpush3.bf16.msra.mxu0 %v8319_v52  ;;  %v8301_v52 = vpack.c.bf16 %v5990_v51, %v5989_v50 }
0x163e   : > { %8321 = vmatprep.subr.bf16.mxu0 %v8648_v6 }
0x1641   : > { %8323 = vmatpush3.bf16.msra.mxu0 %v8322_v55  ;;  %v8328_v55 = vpack.c.bf16 %v6008_v54, %v6007_v53 }
0x1642   : > { %8324 = vmatprep.subr.bf16.mxu0 %v8648_v6 }
0x1645   : > { %8326 = vmatpush3.bf16.msra.mxu0 %v8325_v60  ;;  %v8331_v60 = vpack.c.bf16 %v6010_v57, %v6009_v56 }
0x1646   : > { %7600 = vmatprep.subr.mxu0 %v8646_v1 }
0x1647   : > { %v3771_v62 = vpop.f32.mrb[36].mxu0 }
0x1648   : > { %v7392_v63 = vpop.f32.mrb[37].mxu0  ;;  %7466 = vmatmul.mubr.msk.f32.vlgmr.msra.gmra.mrb[34].mxu1 %vm1213_vm2, %v3771_v62  ;;  %7563 = vmatmul.mubr.f32.vlgmr.msra.gmra.mrb[42].mxu0 %v10038_v30  ;;  %v6011_v62 = vld [vmem:[%s11022_s11 + $0x320] sm:$0xff] }
0x1649   : > { %7470 = vmatprep.mubr.msk.f32.mxu1 %vm8647_vm0, %v8646_v1  ;;  %7602 = vmatprep.mubr.msk.f32.mxu0 %vm8647_vm0, %v8646_v1  ;;  %v6012_v63 = vld [vmem:[%s11022_s11 + $0x328] sm:$0xff] }
0x1667   : > { %v3945_v0 = vpop.f32.mrb[38].mxu0 }
0x1668   : > { %v7462_v2 = vpop.f32.mrb[39].mxu0  ;;  %7469 = vmatpush3.msra.mxu1 %v3945_v0  ;;  %v8334_v0 = vpack.c.bf16 %v6012_v63, %v6011_v62 }
0x1669   : > { %8267 = vmatprep.subr.bf16.mxu1 %v8648_v6  ;;  %v6013_v2 = vld [vmem:[%s11022_s11 + $0x330] sm:$0xff] }
0x16fb   : > { %v10369_v3 = vpop.f32.mrb[40].mxu0 }
0x16fc   : > { %v7494_v4 = vpop.f32.mrb[41].mxu0 }
0x16fd   : > { %v6014_v4 = vld [vmem:[%s11022_s11 + $0x338] sm:$0xff] }
0x171b   : > { %v4021_v5 = vpop.f32.mrb[34].mxu1  ;;  %v4431_v8 = vpop.f32.mrb[42].mxu0 }
0x171c   : > { %v4025_v9 = vmul.f32 0.17677669, %v4021_v5  ;;  %v7467_v10 = vpop.f32.mrb[35].mxu1  ;;  %v7564_v12 = vpop.f32.mrb[43].mxu0  ;;  %7601 = vmatpush3.xpose.msk.msra.mxu0 %vm1213_vm2, %v4431_v8  ;;  %v8337_v5 = vpack.c.bf16 %v6014_v4, %v6013_v2  ;;  %v6015_v8 = vld [vmem:[%s11022_s11 + $0x340] sm:$0xff]  ;;  %v6027_v4 = vld [vmem:[%s11023_s12 + $0xc8] sm:$0xff] }
0x171d   : > { %7605 = vmatprep.subr.mxu0 %v8646_v1  ;;  %v6017_v12 = vld [vmem:[%s11022_s11 + $0x350] sm:$0xff]  ;;  %v6026_v2 = vld [vmem:[%s11023_s12 + $0xc0] sm:$0xff] }
0x171e   : > { %v4026_v14 = vsel %vm713_vm1, %v4025_v9, -inf }
0x171f   : > { %4027 = vmax.xlane.f32.xlu0 %v4026_v14  ;;  %v6018_v14 = vld [vmem:[%s11022_s11 + $0x358] sm:$0xff] }
0x17ac   : > { %v4028_v15 = vpop.xlane.xlu0 %4027 }
0x17ad   : > { %v4029_v16 = vsub.f32 %v4025_v9, %v4028_v15  ;;  %v6016_v9 = vld [vmem:[%s11022_s11 + $0x348] sm:$0xff]  ;;  %v8343_v15 = vpack.c.bf16 %v6018_v14, %v6017_v12  ;;  %v6029_v12 = vld [vmem:[%s11023_s12 + $0xd8] sm:$0xff] }
0x17ae   : > { %v8340_v10 = vpack.c.bf16 %v6016_v9, %v6015_v8  ;;  %v8352_v8 = vpack.c.bf16 %v6027_v4, %v6026_v2 }
0x17af   : > { %v4030_v17 = vmul.f32 1.442695, %v4029_v16  ;;  %v6019_v16 = vld [vmem:[%s11022_s11 + $0x360] sm:$0xff] }
0x17b1   : > { %8565 = vpow2.f32 %v4030_v17  ;;  %v6020_v17 = vld [vmem:[%s11022_s11 + $0x368] sm:$0xff] }
0x17bb   : > { %v8566_v18 = vpop.eup %8565 }
0x17bc   : > { %v4032_v11 = vsel %vm713_vm1, %v8566_v18, 0.0 }
0x17bd   : > { %4033 = vadd.xlane.f32.xlu1 %v4032_v11  ;;  %v6021_v11 = vld [vmem:[%s11022_s11 + $0x370] sm:$0xff] }
0x184a   : > { %v4034_v19 = vpop.xlane.xlu1 %4033 }
0x184b   : > { %8567 = vrcp.f32 %v4034_v19  ;;  %v6022_v19 = vld [vmem:[%s11022_s11 + $0x378] sm:$0xff] }
0x184c   : > { %v8349_v37 = vpack.c.bf16 %v6022_v19, %v6021_v11  ;;  %v6034_v11 = vld [vmem:[%s11020_s9 + $0x398] sm:$0xff] }
0x1855   : > { %v8568_v21 = vpop.eup %8567 }
0x1856   : > { %v4036_v47 = vmul.f32 %v8568_v21, %v8566_v18  ;;  %v8346_v18 = vpack.c.bf16 %v6020_v17, %v6019_v16  ;;  %v6048_v21 = vld [vmem:[%s11021_s10 + $0x388] sm:$0xff] }
0x1857   : > { %v6032_v16 = vld [vmem:[%s11020_s9 + $0x388] sm:$0xff] }
0x1858   : > { %7471 = vmatmul.mubr.msk.f32.vlgmr.msra.gmra.mrb[36].mxu1 %vm713_vm1, %v4036_v47  ;;  %v6049_v47 = vld [vmem:[%s11021_s10 + $0x390] sm:$0xff] }
0x1859   : > { %8269 = vmatpush3.bf16.msra.mxu1 %v8268_v22  ;;  %7481 = vmatprep.mubr.msk.f32.mxu1 %vm8647_vm0, %v8646_v1  ;;  %v8382_v22 = vpack.c.bf16 %v6048_v21, %v6047_v20  ;;  %v8385_v24 = vpack.c.bf16 %v6050_v23, %v6049_v47  ;;  %v6035_v21 = vld [vmem:[%s11020_s9 + $0x3a0] sm:$0xff]  ;;  %v6037_v23 = vld [vmem:[%s11020_s9 + $0x3b0] sm:$0xff] }
0x185a   : > { %8270 = vmatprep.subr.bf16.mxu1 %v8648_v6 }
0x185d   : > { %8272 = vmatpush3.bf16.msra.mxu1 %v8271_v25  ;;  %v6051_v25 = vld [vmem:[%s11021_s10 + $0x3a0] sm:$0xff] }
0x185e   : > { %8279 = vmatprep.subr.bf16.mxu1 %v8648_v6  ;;  %v8388_v27 = vpack.c.bf16 %v6052_v26, %v6051_v25  ;;  %v6039_v26 = vld [vmem:[%s11020_s9 + $0x3c0] sm:$0xff] }
0x192b   : > { %v4106_v33 = vpop.f32.mrb[36].mxu1 }
0x192c   : > { %v7472_v34 = vpop.f32.mrb[37].mxu1  ;;  %7482 = vmatmul.mubr.msk.f32.vlgmr.msra.gmra.mrb[38].mxu1 %vm1213_vm2, %v4106_v33  ;;  %v6055_v33 = vld [vmem:[%s11021_s10 + $0x3c0] sm:$0xff] }
0x192d   : > { %8281 = vmatpush3.bf16.msra.mxu1 %v8280_v29  ;;  %7527 = vmatprep.mubr.msk.f32.mxu1 %vm8647_vm0, %v8646_v1  ;;  %v6053_v29 = vld [vmem:[%s11021_s10 + $0x3b0] sm:$0xff]  ;;  %v6056_v34 = vld [vmem:[%s11021_s10 + $0x3c8] sm:$0xff] }
0x192e   : > { %8282 = vmatprep.subr.bf16.mxu1 %v8648_v6  ;;  %v8391_v32 = vpack.c.bf16 %v6054_v31, %v6053_v29  ;;  %v6041_v31 = vld [vmem:[%s11020_s9 + $0x3d0] sm:$0xff] }
0x1931   : > { %8284 = vmatpush3.bf16.msra.mxu1 %v8283_v35  ;;  %v8394_v35 = vpack.c.bf16 %v6056_v34, %v6055_v33  ;;  %v6043_v34 = vld [vmem:[%s11020_s9 + $0x3e0] sm:$0xff] }
0x1932   : > { %8285 = vmatprep.subr.bf16.mxu1 %v8648_v6 }
0x1935   : > { %8287 = vmatpush3.bf16.msra.mxu1 %v8286_v13  ;;  %v8397_v13 = vpack.c.bf16 %v6058_v38, %v6057_v36  ;;  %v6045_v38 = vld [vmem:[%s11020_s9 + $0x3f0] sm:$0xff] }
0x1936   : > { %8288 = vmatprep.subr.bf16.mxu1 %v8648_v6 }
0x1939   : > { %8290 = vmatpush3.bf16.msra.mxu1 %v8289_v41  ;;  %v8400_v41 = vpack.c.bf16 %v6060_v40, %v6059_v39  ;;  %v6063_v40 = vld [vmem:[%s11022_s11 + $0x380] sm:$0xff] }
0x193a   : > { %8291 = vmatprep.subr.bf16.mxu1 %v8648_v6 }
0x193d   : > { %8293 = vmatpush3.bf16.msra.mxu1 %v8292_v43  ;;  %v8403_v43 = vpack.c.bf16 %v6062_v42, %v6061_v28  ;;  %v6065_v42 = vld [vmem:[%s11022_s11 + $0x390] sm:$0xff] }
0x193e   : > { %8294 = vmatprep.subr.bf16.mxu1 %v8648_v6 }
0x1941   : > { %8296 = vmatpush3.bf16.msra.mxu1 %v8295_v45 }
0x1942   : > { %8297 = vmatprep.subr.bf16.mxu1 %v8648_v6 }
0x1945   : > { %8299 = vmatpush3.bf16.msra.mxu1 %v8298_v49 }
0x1946   : > { %8300 = vmatprep.subr.bf16.mxu1 %v8648_v6 }
0x1949   : > { %8302 = vmatpush3.bf16.msra.mxu1 %v8301_v52 }
0x194a   : > { %8327 = vmatprep.subr.bf16.mxu1 %v8648_v6 }
0x194c   : > { %7528 = vmatmul.mubr.f32.vlgmr.msra.gmra.mrb[40].mxu1 %v10038_v30 }
0x194d   : > { %8329 = vmatpush3.bf16.msra.mxu1 %v8328_v55  ;;  %7597 = vmatprep.mubr.msk.f32.mxu1 %vm8647_vm0, %v8646_v1 }
0x194e   : > { %8330 = vmatprep.subr.bf16.mxu1 %v8648_v6 }
0x1951   : > { %8332 = vmatpush3.bf16.msra.mxu1 %v8331_v60 }
0x1952   : > { %8333 = vmatprep.subr.bf16.mxu1 %v8648_v6 }
0x1955   : > { %8335 = vmatpush3.bf16.msra.mxu1 %v8334_v0 }
0x1956   : > { %8336 = vmatprep.subr.bf16.mxu1 %v8648_v6 }
0x1959   : > { %8338 = vmatpush3.bf16.msra.mxu1 %v8337_v5 }
0x195a   : > { %8339 = vmatprep.subr.bf16.mxu1 %v8648_v6 }
0x195d   : > { %8341 = vmatpush3.bf16.msra.mxu1 %v8340_v10  ;;  %v6028_v10 = vld [vmem:[%s11023_s12 + $0xd0] sm:$0xff] }
0x195e   : > { %8342 = vmatprep.subr.bf16.mxu1 %v8648_v6  ;;  %v8355_v14 = vpack.c.bf16 %v6029_v12, %v6028_v10 }
0x1961   : > { %8344 = vmatpush3.bf16.msra.mxu1 %v8343_v15  ;;  %v6031_v15 = vld [vmem:[%s11020_s9 + $0x380] sm:$0xff] }
0x1962   : > { %8345 = vmatprep.subr.bf16.mxu1 %v8648_v6  ;;  %v8358_v17 = vpack.c.bf16 %v6032_v16, %v6031_v15 }
0x1965   : > { %8347 = vmatpush3.bf16.msra.mxu1 %v8346_v18  ;;  %v6033_v18 = vld [vmem:[%s11020_s9 + $0x390] sm:$0xff] }
0x1966   : > { %8348 = vmatprep.subr.bf16.mxu1 %v8648_v6  ;;  %v8361_v20 = vpack.c.bf16 %v6034_v11, %v6033_v18 }
0x1969   : > { %8350 = vmatpush3.bf16.msra.mxu1 %v8349_v37 }
0x196a   : > { %8381 = vmatprep.subr.bf16.mxu1 %v8648_v6 }
0x196c   : > { %7598 = vmatmul.mubr.f32.vlgmr.msra.gmra.mrb[42].mxu1 %v10038_v30 }
0x196d   : > { %8383 = vmatpush3.bf16.msra.mxu1 %v8382_v22  ;;  %7688 = vmatprep.mubr.msk.f32.mxu1 %vm8647_vm0, %v8646_v1  ;;  %v6036_v22 = vld [vmem:[%s11020_s9 + $0x3a8] sm:$0xff] }
0x196e   : > { %8384 = vmatprep.subr.bf16.mxu1 %v8648_v6  ;;  %v8364_v47 = vpack.c.bf16 %v6036_v22, %v6035_v21  ;;  %v6082_v22 = vld [vmem:[%s11023_s12 + $0xe0] sm:$0xff] }
0x1971   : > { %8386 = vmatpush3.bf16.msra.mxu1 %v8385_v24  ;;  %v6038_v24 = vld [vmem:[%s11020_s9 + $0x3b8] sm:$0xff] }
0x1972   : > { %8387 = vmatprep.subr.bf16.mxu1 %v8648_v6  ;;  %v8367_v25 = vpack.c.bf16 %v6038_v24, %v6037_v23 }
0x1975   : > { %8389 = vmatpush3.bf16.msra.mxu1 %v8388_v27  ;;  %v6040_v27 = vld [vmem:[%s11020_s9 + $0x3c8] sm:$0xff] }
0x1976   : > { %8390 = vmatprep.subr.bf16.mxu1 %v8648_v6  ;;  %v8370_v29 = vpack.c.bf16 %v6040_v27, %v6039_v26  ;;  %v6084_v26 = vld [vmem:[%s11023_s12 + $0xf0] sm:$0xff]  ;;  %v6085_v27 = vld [vmem:[%s11023_s12 + $0xf8] sm:$0xff] }
0x1979   : > { %8392 = vmatpush3.bf16.msra.mxu1 %v8391_v32  ;;  %v6042_v32 = vld [vmem:[%s11020_s9 + $0x3d8] sm:$0xff] }
0x197a   : > { %8393 = vmatprep.subr.bf16.mxu1 %v8648_v6  ;;  %v8373_v33 = vpack.c.bf16 %v6042_v32, %v6041_v31 }
0x197d   : > { %8395 = vmatpush3.bf16.msra.mxu1 %v8394_v35  ;;  %v6044_v35 = vld [vmem:[%s11020_s9 + $0x3e8] sm:$0xff] }
0x197e   : > { %8396 = vmatprep.subr.bf16.mxu1 %v8648_v6  ;;  %v8376_v36 = vpack.c.bf16 %v6044_v35, %v6043_v34  ;;  %v6096_v34 = vld [vmem:[%s11027_s16 + $0x118] sm:$0xff] }
0x1981   : > { %8398 = vmatpush3.bf16.msra.mxu1 %v8397_v13  ;;  %v6046_v13 = vld [vmem:[%s11020_s9 + $0x3f8] sm:$0xff] }
0x1982   : > { %8399 = vmatprep.subr.bf16.mxu1 %v8648_v6  ;;  %v8379_v39 = vpack.c.bf16 %v6046_v13, %v6045_v38  ;;  %v6100_v13 = vld [vmem:[%s11027_s16 + $0x138] sm:$0xff] }
0x1985   : > { %8401 = vmatpush3.bf16.msra.mxu1 %v8400_v41  ;;  %v6064_v41 = vld [vmem:[%s11022_s11 + $0x388] sm:$0xff] }
0x1986   : > { %8402 = vmatprep.subr.bf16.mxu1 %v8648_v6  ;;  %v8406_v28 = vpack.c.bf16 %v6064_v41, %v6063_v40  ;;  %v6097_v40 = vld [vmem:[%s11027_s16 + $0x120] sm:$0xff]  ;;  %v6099_v41 = vld [vmem:[%s11027_s16 + $0x130] sm:$0xff] }
0x1989   : > { %8404 = vmatpush3.bf16.msra.mxu1 %v8403_v43  ;;  %v6066_v43 = vld [vmem:[%s11022_s11 + $0x398] sm:$0xff] }
0x198a   : > { %7726 = vmatprep.subr.mxu1 %v8646_v1 }
0x198c   : > { %7689 = vmatmul.mubr.f32.vlgmr.msra.gmra.mrb[44].mxu1 %v10038_v30 }
0x198d   : > { %7728 = vmatprep.mubr.msk.f32.mxu1 %vm8647_vm0, %v8646_v1 }
0x19ff   : > { %v4184_v7 = vpop.f32.mrb[38].mxu1 }
0x1a00   : > { %v10573_v44 = vadd.f32 %v10369_v3, %v4184_v7  ;;  %v7483_v45 = vpop.f32.mrb[39].mxu1  ;;  %v8409_v7 = vpack.c.bf16 %v6066_v43, %v6065_v42  ;;  %v6102_v42 = vld [vmem:[%s11027_s16 + $0x148] sm:$0xff]  ;;  %v6104_v43 = vld [vmem:[%s11027_s16 + $0x158] sm:$0xff] }
0x1a01   : > { %v6067_v45 = vld [vmem:[%s11022_s11 + $0x3a0] sm:$0xff] }
0x1a1f   : > { %v4344_v46 = vpop.f32.mrb[40].mxu1 }
0x1a20   : > { %v7529_v48 = vpop.f32.mrb[41].mxu1  ;;  %7603 = vmatmul.mubr.msk.f32.vlgmr.msra.gmra.mrb[44].mxu0 %vm1213_vm2, %v4344_v46  ;;  %v6068_v46 = vld [vmem:[%s11022_s11 + $0x3a8] sm:$0xff] }
0x1a21   : > { %7607 = vmatprep.mubr.msk.f32.mxu0 %vm8647_vm0, %v8646_v1  ;;  %v8412_v48 = vpack.c.bf16 %v6068_v46, %v6067_v45  ;;  %v6101_v45 = vld [vmem:[%s11027_s16 + $0x140] sm:$0xff]  ;;  %v6103_v46 = vld [vmem:[%s11027_s16 + $0x150] sm:$0xff] }
0x1a3f   : > { %v4518_v49 = vpop.f32.mrb[42].mxu1 }
0x1a40   : > { %v7599_v50 = vpop.f32.mrb[43].mxu1  ;;  %7606 = vmatpush3.msra.mxu0 %v4518_v49  ;;  %v6069_v49 = vld [vmem:[%s11022_s11 + $0x3b0] sm:$0xff] }
0x1a41   : > { %8351 = vmatprep.subr.bf16.mxu0 %v8648_v6  ;;  %v6070_v50 = vld [vmem:[%s11022_s11 + $0x3b8] sm:$0xff] }
0x1a5f   : > { %v4932_v51 = vpop.f32.mrb[44].mxu1 }
0x1a60   : > { %v7690_v52 = vpop.f32.mrb[45].mxu1  ;;  %7727 = vmatpush3.xpose.msk.msra.mxu1 %vm1213_vm2, %v4932_v51  ;;  %v8415_v51 = vpack.c.bf16 %v6070_v50, %v6069_v49  ;;  %v6106_v49 = vld [vmem:[%s11027_s16 + $0x168] sm:$0xff]  ;;  %v6108_v50 = vld [vmem:[%s11027_s16 + $0x178] sm:$0xff] }
0x1a61   : > { %7731 = vmatprep.subr.mxu1 %v8646_v1  ;;  %v6071_v52 = vld [vmem:[%s11022_s11 + $0x3c0] sm:$0xff] }
0x1af3   : > { %v4594_v3 = vpop.f32.mrb[44].mxu0 }
0x1af4   : > { %v4598_v53 = vmul.f32 0.17677669, %v4594_v3  ;;  %v7604_v54 = vpop.f32.mrb[45].mxu0  ;;  %v6072_v3 = vld [vmem:[%s11022_s11 + $0x3c8] sm:$0xff] }
0x1af5   : > { %v6073_v54 = vld [vmem:[%s11022_s11 + $0x3d0] sm:$0xff] }
0x1af6   : > { %v4599_v55 = vsel %vm713_vm1, %v4598_v53, -inf }
0x1af7   : > { %4600 = vmax.xlane.f32.xlu0 %v4599_v55  ;;  %v6074_v55 = vld [vmem:[%s11022_s11 + $0x3d8] sm:$0xff] }
0x1b84   : > { %v4601_v56 = vpop.xlane.xlu0 %4600 }
0x1b85   : > { %v4602_v57 = vsub.f32 %v4598_v53, %v4601_v56  ;;  %v8418_v53 = vpack.c.bf16 %v6072_v3, %v6071_v52  ;;  %v8421_v56 = vpack.c.bf16 %v6074_v55, %v6073_v54  ;;  %v6105_v52 = vld [vmem:[%s11027_s16 + $0x160] sm:$0xff]  ;;  %v6107_v3 = vld [vmem:[%s11027_s16 + $0x170] sm:$0xff]  ;;  %v6110_v54 = vld [vmem:[%s11027_s16 + $0x188] sm:$0xff] }
0x1b86   : > { %v6112_v55 = vld [vmem:[%s11027_s16 + $0x198] sm:$0xff] }
0x1b87   : > { %v4603_v60 = vmul.f32 1.442695, %v4602_v57  ;;  %v6075_v57 = vld [vmem:[%s11022_s11 + $0x3e0] sm:$0xff] }
0x1b89   : > { %8569 = vpow2.f32 %v4603_v60  ;;  %v6076_v60 = vld [vmem:[%s11022_s11 + $0x3e8] sm:$0xff] }
0x1b93   : > { %v8570_v62 = vpop.eup %8569 }
0x1b94   : > { %v4605_v63 = vsel %vm713_vm1, %v8570_v62, 0.0 }
0x1b95   : > { %4606 = vadd.xlane.f32.xlu1 %v4605_v63  ;;  %v6077_v63 = vld [vmem:[%s11022_s11 + $0x3f0] sm:$0xff] }
0x1c22   : > { %v4607_v0 = vpop.xlane.xlu1 %4606 }
0x1c23   : > { %8571 = vrcp.f32 %v4607_v0  ;;  %v6078_v0 = vld [vmem:[%s11022_s11 + $0x3f8] sm:$0xff] }
0x1c24   : > { %v8427_v2 = vpack.c.bf16 %v6078_v0, %v6077_v63  ;;  %v6114_v63 = vld [vmem:[%s11027_s16 + $0x1a8] sm:$0xff]  ;;  %v6116_v0 = vld [vmem:[%s11027_s16 + $0x1b8] sm:$0xff] }
0x1c2d   : > { %v8572_v5 = vpop.eup %8571 }
0x1c2e   : > { %v4609_v9 = vmul.f32 %v8572_v5, %v8570_v62  ;;  %v8424_v62 = vpack.c.bf16 %v6076_v60, %v6075_v57  ;;  %v6109_v57 = vld [vmem:[%s11027_s16 + $0x180] sm:$0xff]  ;;  %v6111_v60 = vld [vmem:[%s11027_s16 + $0x190] sm:$0xff] }
0x1c30   : > { %7608 = vmatmul.mubr.msk.f32.vlgmr.msra.gmra.mrb[46].mxu0 %vm713_vm1, %v4609_v9 }
0x1c31   : > { %8353 = vmatpush3.bf16.msra.mxu0 %v8352_v8  ;;  %7618 = vmatprep.mubr.msk.f32.mxu0 %vm8647_vm0, %v8646_v1 }
0x1c32   : > { %8354 = vmatprep.subr.bf16.mxu0 %v8648_v6 }
0x1c35   : > { %8356 = vmatpush3.bf16.msra.mxu0 %v8355_v14 }
0x1c36   : > { %8357 = vmatprep.subr.bf16.mxu0 %v8648_v6 }
0x1d03   : > { %v4679_v19 = vpop.f32.mrb[46].mxu0 }
0x1d04   : > { %v7609_v37 = vpop.f32.mrb[47].mxu0  ;;  %7619 = vmatmul.mubr.msk.f32.vlgmr.msra.gmra.mrb[48].mxu0 %vm1213_vm2, %v4679_v19 }
0x1d05   : > { %8359 = vmatpush3.bf16.msra.mxu0 %v8358_v17  ;;  %7653 = vmatprep.mubr.msk.f32.mxu0 %vm8647_vm0, %v8646_v1 }
0x1d06   : > { %8360 = vmatprep.subr.bf16.mxu0 %v8648_v6 }
0x1d09   : > { %8362 = vmatpush3.bf16.msra.mxu0 %v8361_v20 }
0x1d0a   : > { %8363 = vmatprep.subr.bf16.mxu0 %v8648_v6 }
0x1d0d   : > { %8365 = vmatpush3.bf16.msra.mxu0 %v8364_v47  ;;  %v6083_v47 = vld [vmem:[%s11023_s12 + $0xe8] sm:$0xff] }
0x1d0e   : > { %8366 = vmatprep.subr.bf16.mxu0 %v8648_v6  ;;  %v8430_v24 = vpack.c.bf16 %v6083_v47, %v6082_v22  ;;  %v6143_v22 = vld [vmem:[%s11029_s18 + $0x188] sm:$0xff]  ;;  %v6126_v47 = vld [vmem:[%s11029_s18 + $0x100] sm:$0xff] }
0x1d11   : > { %8368 = vmatpush3.bf16.msra.mxu0 %v8367_v25 }
0x1d12   : > { %8369 = vmatprep.subr.bf16.mxu0 %v8648_v6 }
0x1d15   : > { %8371 = vmatpush3.bf16.msra.mxu0 %v8370_v29  ;;  %v8433_v29 = vpack.c.bf16 %v6085_v27, %v6084_v26  ;;  %v6145_v26 = vld [vmem:[%s11029_s18 + $0x198] sm:$0xff] }
0x1d16   : > { %8372 = vmatprep.subr.bf16.mxu0 %v8648_v6 }
0x1d19   : > { %8374 = vmatpush3.bf16.msra.mxu0 %v8373_v33  ;;  %v6094_v33 = vld [vmem:[%s11027_s16 + $0x108] sm:$0xff] }
0x1d1a   : > { %8375 = vmatprep.subr.bf16.mxu0 %v8648_v6  ;;  %v8435_v35 = vpack.c.bf16 %v6096_v34, %v6094_v33  ;;  %v6146_v33 = vld [vmem:[%s11029_s18 + $0x1a0] sm:$0xff]  ;;  %v6147_v34 = vld [vmem:[%s11029_s18 + $0x1a8] sm:$0xff] }
0x1d1d   : > { %8377 = vmatpush3.bf16.msra.mxu0 %v8376_v36  ;;  %v6095_v36 = vld [vmem:[%s11027_s16 + $0x110] sm:$0xff] }
0x1d1e   : > { %8378 = vmatprep.subr.bf16.mxu0 %v8648_v6 }
0x1d21   : > { %8380 = vmatpush3.bf16.msra.mxu0 %v8379_v39 }
0x1d22   : > { %8405 = vmatprep.subr.bf16.mxu0 %v8648_v6 }
0x1d24   : > { %7654 = vmatmul.mubr.f32.vlgmr.msra.gmra.mrb[50].mxu0 %v10038_v30 }
0x1d25   : > { %8407 = vmatpush3.bf16.msra.mxu0 %v8406_v28  ;;  %7723 = vmatprep.mubr.msk.f32.mxu0 %vm8647_vm0, %v8646_v1  ;;  %v8441_v28 = vpack.c.bf16 %v6099_v41, %v6097_v40  ;;  %v6132_v41 = vld [vmem:[%s11029_s18 + $0x130] sm:$0xff] }
0x1d26   : > { %8408 = vmatprep.subr.bf16.mxu0 %v8648_v6 }
0x1d29   : > { %8410 = vmatpush3.bf16.msra.mxu0 %v8409_v7  ;;  %v8443_v7 = vpack.c.bf16 %v6104_v43, %v6102_v42  ;;  %v6150_v42 = vld [vmem:[%s11029_s18 + $0x1c0] sm:$0xff]  ;;  %v6151_v43 = vld [vmem:[%s11029_s18 + $0x1c8] sm:$0xff] }
0x1d2a   : > { %8411 = vmatprep.subr.bf16.mxu0 %v8648_v6 }
0x1d2d   : > { %8413 = vmatpush3.bf16.msra.mxu0 %v8412_v48  ;;  %v8445_v48 = vpack.c.bf16 %v6103_v46, %v6101_v45  ;;  %v8483_v45 = vpack.c.bf16 %v6151_v43, %v6150_v42  ;;  %v6134_v46 = vld [vmem:[%s11029_s18 + $0x140] sm:$0xff] }
0x1d2e   : > { %8414 = vmatprep.subr.bf16.mxu0 %v8648_v6 }
0x1d31   : > { %8416 = vmatpush3.bf16.msra.mxu0 %v8415_v51  ;;  %v8447_v51 = vpack.c.bf16 %v6108_v50, %v6106_v49  ;;  %v6152_v49 = vld [vmem:[%s11029_s18 + $0x1d0] sm:$0xff]  ;;  %v6153_v50 = vld [vmem:[%s11029_s18 + $0x1d8] sm:$0xff] }
0x1d32   : > { %8417 = vmatprep.subr.bf16.mxu0 %v8648_v6 }
0x1d35   : > { %8419 = vmatpush3.bf16.msra.mxu0 %v8418_v53  ;;  %v8449_v53 = vpack.c.bf16 %v6107_v3, %v6105_v52  ;;  %v8487_v52 = vpack.c.bf16 %v6153_v50, %v6152_v49  ;;  %v6136_v3 = vld [vmem:[%s11029_s18 + $0x150] sm:$0xff] }
0x1d36   : > { %8420 = vmatprep.subr.bf16.mxu0 %v8648_v6 }
0x1d39   : > { %8422 = vmatpush3.bf16.msra.mxu0 %v8421_v56  ;;  %v8451_v56 = vpack.c.bf16 %v6112_v55, %v6110_v54  ;;  %v6154_v54 = vld [vmem:[%s11029_s18 + $0x1e0] sm:$0xff]  ;;  %v6155_v55 = vld [vmem:[%s11029_s18 + $0x1e8] sm:$0xff] }
0x1d3a   : > { %8423 = vmatprep.subr.bf16.mxu0 %v8648_v6 }
0x1d3d   : > { %8425 = vmatpush3.bf16.msra.mxu0 %v8424_v62  ;;  %v8453_v62 = vpack.c.bf16 %v6111_v60, %v6109_v57  ;;  %v8491_v57 = vpack.c.bf16 %v6155_v55, %v6154_v54 }
0x1d3e   : > { %8426 = vmatprep.subr.bf16.mxu0 %v8648_v6 }
0x1d41   : > { %8428 = vmatpush3.bf16.msra.mxu0 %v8427_v2  ;;  %v8455_v2 = vpack.c.bf16 %v6116_v0, %v6114_v63 }
0x1d44   : > { %7724 = vmatmul.mubr.f32.vlgmr.msra.gmra.mrb[52].mxu0 %v10038_v30 }
0x1dd7   : > { %v4757_v4 = vpop.f32.mrb[48].mxu0 }
0x1dd8   : > { %v10719_v5 = vadd.f32 %v4757_v4, %v10573_v44  ;;  %v7620_v8 = vpop.f32.mrb[49].mxu0  ;;  %v6113_v4 = vld [vmem:[%s11027_s16 + $0x1a0] sm:$0xff] }
0x1dd9   : > { %v6115_v8 = vld [vmem:[%s11027_s16 + $0x1b0] sm:$0xff] }
0x1df7   : > { %v4845_v9 = vpop.f32.mrb[50].mxu0 }
0x1df8   : > { %v7655_v10 = vpop.f32.mrb[51].mxu0  ;;  %7729 = vmatmul.mubr.msk.f32.vlgmr.msra.gmra.mrb[46].mxu1 %vm1213_vm2, %v4845_v9  ;;  %v8457_v9 = vpack.c.bf16 %v6115_v8, %v6113_v4 }
0x1df9   : > { %7733 = vmatprep.mubr.msk.f32.mxu1 %vm8647_vm0, %v8646_v1  ;;  %v6118_v10 = vld [vmem:[%s11027_s16 + $0x1c8] sm:$0xff] }
0x1e17   : > { %v5019_v12 = vpop.f32.mrb[52].mxu0 }
0x1e18   : > { %v7725_v14 = vpop.f32.mrb[53].mxu0  ;;  %7732 = vmatpush3.msra.mxu1 %v5019_v12  ;;  %v6120_v12 = vld [vmem:[%s11027_s16 + $0x1d8] sm:$0xff] }
0x1e19   : > { %8429 = vmatprep.subr.bf16.mxu1 %v8648_v6  ;;  %v8459_v14 = vpack.c.bf16 %v6120_v12, %v6118_v10 }
0x1ecb   : > { %v5095_v15 = vpop.f32.mrb[46].mxu1 }
0x1ecc   : > { %v5099_v16 = vmul.f32 0.17677669, %v5095_v15  ;;  %v7730_v17 = vpop.f32.mrb[47].mxu1  ;;  %v6117_v15 = vld [vmem:[%s11027_s16 + $0x1c0] sm:$0xff] }
0x1ece   : > { %v5100_v18 = vsel %vm713_vm1, %v5099_v16, -inf }
0x1ecf   : > { %5101 = vmax.xlane.f32.xlu0 %v5100_v18  ;;  %v6122_v18 = vld [vmem:[%s11027_s16 + $0x1e8] sm:$0xff] }
0x1f5c   : > { %v5102_v44 = vpop.xlane.xlu0 %5101 }
0x1f5d   : > { %v5103_v11 = vsub.f32 %v5099_v16, %v5102_v44  ;;  %v6119_v16 = vld [vmem:[%s11027_s16 + $0x1d0] sm:$0xff]  ;;  %v6124_v44 = vld [vmem:[%s11027_s16 + $0x1f8] sm:$0xff] }
0x1f5e   : > { %v8461_v17 = vpack.c.bf16 %v6119_v16, %v6117_v15 }
0x1f5f   : > { %v5104_v19 = vmul.f32 1.442695, %v5103_v11  ;;  %v8463_v11 = vpack.c.bf16 %v6124_v44, %v6122_v18 }
0x1f61   : > { %8573 = vpow2.f32 %v5104_v19  ;;  %v6121_v19 = vld [vmem:[%s11027_s16 + $0x1e0] sm:$0xff] }
0x1f6b   : > { %v8574_v37 = vpop.eup %8573 }
0x1f6c   : > { %v5106_v20 = vsel %vm713_vm1, %v8574_v37, 0.0 }
0x1f6d   : > { %5107 = vadd.xlane.f32.xlu1 %v5106_v20 }
0x1ffa   : > { %v5108_v21 = vpop.xlane.xlu1 %5107 }
0x1ffb   : > { %8575 = vrcp.f32 %v5108_v21  ;;  %v6142_v21 = vld [vmem:[%s11029_s18 + $0x180] sm:$0xff] }
0x2005   : > { %v8576_v23 = vpop.eup %8575 }
0x2006   : > { %v5110_v25 = vmul.f32 %v8576_v23, %v8574_v37  ;;  %v6123_v37 = vld [vmem:[%s11027_s16 + $0x1f0] sm:$0xff]  ;;  %v8467_v23 = vpack.c.bf16 %v6143_v22, %v6142_v21 }
0x2007   : > { %v8465_v20 = vpack.c.bf16 %v6123_v37, %v6121_v19 }
0x2008   : > { %7734 = vmatmul.mubr.msk.f32.vlgmr.msra.gmra.mrb[48].mxu1 %vm713_vm1, %v5110_v25  ;;  %v6144_v25 = vld [vmem:[%s11029_s18 + $0x190] sm:$0xff]  ;;  %8468 = vmatprep.subr.bf16.mxu0 %v8467_v23 }
0x2009   : > { %8431 = vmatpush3.bf16.msra.mxu1 %v8430_v24  ;;  %7744 = vmatprep.mubr.msk.f32.mxu1 %vm8647_vm0, %v8646_v1  ;;  %v6127_v24 = vld [vmem:[%s11029_s18 + $0x108] sm:$0xff] }
0x200a   : > { %8432 = vmatprep.subr.bf16.mxu1 %v8648_v6  ;;  %v6093_v6 = vld [vmem:[%s11027_s16 + $0x100] sm:$0xff]  ;;  %v8469_v27 = vpack.c.bf16 %v6127_v24, %v6126_v47 }
0x200b   : > { %v8437_v38 = vpack.c.bf16 %v6095_v36, %v6093_v6  ;;  %v8475_v6 = vpack.c.bf16 %v6147_v34, %v6146_v33  ;;  %v6130_v36 = vld [vmem:[%s11029_s18 + $0x120] sm:$0xff]  ;;  %v6157_v33 = vld [vmem:[%s11029_s18 + $0x1f8] sm:$0xff] }
0x200c   : > { %8470 = vmatpush3.bf16.msra.mxu0 %v8469_v27  ;;  %v6092_v24 = vld [vmem:[%s11026_s15 + $0x1] ss:$0 sm:$0xff] }
0x200d   : > { %8434 = vmatpush3.bf16.msra.mxu1 %v8433_v29  ;;  %v8471_v29 = vpack.c.bf16 %v6145_v26, %v6144_v25  ;;  %v6138_v27 = vld [vmem:[%s11029_s18 + $0x160] sm:$0xff] }
0x200e   : > { %8436 = vmatprep.subr.bf16.mxu1 %v8435_v35 }
0x200f   : > { %8472 = vmatprep.subr.bf16.mxu0 %v8471_v29  ;;  %v6139_v29 = vld [vmem:[%s11029_s18 + $0x168] sm:$0xff] }
0x20db   : > { %v5180_v31 = vpop.f32.mrb[48].mxu1 }
0x20dc   : > { %v7735_v32 = vpop.f32.mrb[49].mxu1  ;;  %7745 = vmatmul.mubr.msk.f32.vlgmr.msra.gmra.mrb[50].mxu1 %vm1213_vm2, %v5180_v31  ;;  %v6128_v31 = vld [vmem:[%s11029_s18 + $0x110] sm:$0xff] }
0x20dd   : > { %5420 = vmatprep.mubr.f32.mxu1 %v8646_v1  ;;  %8438 = vmatpush1.bf16.msra.mxu1 %v8437_v38  ;;  %v6098_v1 = vld [vmem:[%s11027_s16 + $0x128] sm:$0xff]  ;;  %v6129_v32 = vld [vmem:[%s11029_s18 + $0x118] sm:$0xff] }
0x20de   : > { %v8439_v39 = vpack.c.bf16 %v6100_v13, %v6098_v1  ;;  %v8473_v35 = vpack.c.bf16 %v6129_v32, %v6128_v31  ;;  %v6131_v38 = vld [vmem:[%s11029_s18 + $0x128] sm:$0xff]  ;;  %v6148_v1 = vld [vmem:[%s11029_s18 + $0x1b0] sm:$0xff]  ;;  %v6149_v13 = vld [vmem:[%s11029_s18 + $0x1b8] sm:$0xff]  ;;  %v8493_v31 = vpack.c.bf16 %v6139_v29, %v6138_v27 }
0x20df   : > { %v8479_v40 = vpack.c.bf16 %v6149_v13, %v6148_v1  ;;  %v6156_v32 = vld [vmem:[%s11029_s18 + $0x1f0] sm:$0xff] }
0x20e0   : > { %8440 = vmatprep.subr.bf16.mxu1 %v8439_v39  ;;  %8474 = vmatpush3.bf16.msra.mxu0 %v8473_v35  ;;  %v8477_v39 = vpack.c.bf16 %v6131_v38, %v6130_v36  ;;  %v8495_v34 = vpack.c.bf16 %v6157_v33, %v6156_v32  ;;  %v6140_v35 = vld [vmem:[%s11029_s18 + $0x170] sm:$0xff]  ;;  %v6125_v38 = vld [vmem:[%s11028_s17 + $0x2] sm:$0x3] }
0x20e1   : > { %8442 = vmatpush1.bf16.msra.mxu1 %v8441_v28  ;;  %8476 = vmatprep.subr.bf16.mxu0 %v8475_v6  ;;  %v6133_v28 = vld [vmem:[%s11029_s18 + $0x138] sm:$0xff]  ;;  %v5349_v1 = vrot.slane %v6125_v38, %v3035_v59  ;;  %v5353_v13 = vrot.slane %v6125_v38, %v3039_v61 }
0x20e2   : > { %8444 = vmatprep.subr.bf16.mxu1 %v8443_v7  ;;  %v8481_v7 = vpack.c.bf16 %v6133_v28, %v6132_v41  ;;  %v6141_v6 = vld [vmem:[%s11029_s18 + $0x178] sm:$0xff] }
0x20e3   : > { %v8497_v36 = vpack.c.bf16 %v6141_v6, %v6140_v35 }
0x20e4   : > { %8478 = vmatpush3.bf16.msra.mxu0 %v8477_v39 }
0x20e5   : > { %8446 = vmatpush1.bf16.msra.mxu1 %v8445_v48  ;;  %8480 = vmatprep.subr.bf16.mxu0 %v8479_v40  ;;  %v6135_v48 = vld [vmem:[%s11029_s18 + $0x148] sm:$0xff] }
0x20e6   : > { %8448 = vmatprep.subr.bf16.mxu1 %v8447_v51  ;;  %v8485_v51 = vpack.c.bf16 %v6135_v48, %v6134_v46 }
0x20e8   : > { %8482 = vmatpush3.bf16.msra.mxu0 %v8481_v7 }
0x20e9   : > { %8450 = vmatpush1.bf16.msra.mxu1 %v8449_v53  ;;  %8484 = vmatprep.subr.bf16.mxu0 %v8483_v45  ;;  %v6137_v53 = vld [vmem:[%s11029_s18 + $0x158] sm:$0xff]  ;;  %v6159_v45 = vld [vmem:[%s11030_s19 + $0x1] ss:$0 sm:$0xff] }
0x20ea   : > { %8452 = vmatprep.subr.bf16.mxu1 %v8451_v56  ;;  %v8489_v56 = vpack.c.bf16 %v6137_v53, %v6136_v3 }
0x20ec   : > { %8486 = vmatpush3.bf16.msra.mxu0 %v8485_v51 }
0x20ed   : > { %8454 = vmatpush1.bf16.msra.mxu1 %v8453_v62  ;;  %8488 = vmatprep.subr.bf16.mxu0 %v8487_v52  ;;  %v6088_v62 = vld [vmem:[%s11024_s13 + $0x1] ss:$0 sm:$0xff] }
0x20ee   : > { %8456 = vmatprep.subr.bf16.mxu1 %v8455_v2 }
0x20f0   : > { %8490 = vmatpush3.bf16.msra.mxu0 %v8489_v56 }
0x20f1   : > { %8458 = vmatpush1.bf16.msra.mxu1 %v8457_v9  ;;  %8492 = vmatprep.subr.bf16.mxu0 %v8491_v57 }
0x20f2   : > { %8460 = vmatprep.subr.bf16.mxu1 %v8459_v14 }
0x20f4   : > { %8494 = vmatpush3.bf16.msra.mxu0 %v8493_v31 }
0x20f5   : > { %8462 = vmatpush1.bf16.msra.mxu1 %v8461_v17  ;;  %8496 = vmatprep.subr.bf16.mxu0 %v8495_v34 }
0x20f6   : > { %8464 = vmatprep.subr.bf16.mxu1 %v8463_v11 }
0x20f8   : > { %8498 = vmatpush3.bf16.msra.mxu0 %v8497_v36 }
0x20f9   : > { %8466 = vmatpush1.bf16.msra.mxu1 %v8465_v20 }
0x21af   : > { %v5258_v60 = vpop.f32.mrb[50].mxu1 }
0x21b0   : > { %v5262_v63 = vadd.f32 %v5258_v60, %v10719_v5  ;;  %v7746_v0 = vpop.f32.mrb[51].mxu1 }
0x21b2   : > { %v5271_v2 = vadd.f32 %v6088_v62, %v5262_v63 }
0x21b4   : > { %v5272_v4 = vadd.f32 %v5271_v2, %v10038_v30  ;;  %v6091_v30 = vld [vmem:[%s11025_s14 + $0x1] ss:$0 sm:$0xff] }
0x21b6   : > { %v5277_v8 = vrot.slane %v5272_v4, 4 }
0x21b8   : > { %v5278_v9 = vadd.f32 %v5277_v8, %v5272_v4 }
0x21ba   : > { %v5279_v10 = vrot.slane %v5278_v9, 2 }
0x21bc   : > { %v5280_v12 = vadd.f32 %v5279_v10, %v5278_v9  ;;  %v6162_v9 = vld [vmem:[%s11031_s20 + $0x1] ss:$0 sm:$0xff] }
0x21be   : > { %v5281_v14 = vrot.slane %v5280_v12, 1 }
0x21c0   : > { %v5282_v15 = vadd.f32 %v5281_v14, %v5280_v12  ;;  %v6163_v12 = vld [vmem:[%s11032_s21 + $0x1] ss:$0 sm:$0xff] }
0x21c2   : > { %v5283_v16 = vmul.f32 0.125, %v5282_v15 }
0x21c4   : > { %v5284_v17 = vsub.f32 %v5272_v4, %v5283_v16 }
0x21c6   : > { %v5285_v18 = vmul.f32 %v5284_v17, %v5284_v17 }
0x21c8   : > { %v5286_v44 = vrot.slane %v5285_v18, 4 }
0x21ca   : > { %v5287_v11 = vadd.f32 %v5286_v44, %v5285_v18 }
0x21cc   : > { %v5288_v19 = vrot.slane %v5287_v11, 2 }
0x21ce   : > { %v5289_v37 = vadd.f32 %v5288_v19, %v5287_v11 }
0x21d0   : > { %v5290_v20 = vrot.slane %v5289_v37, 1 }
0x21d2   : > { %v5291_v21 = vadd.f32 %v5290_v20, %v5289_v37 }
0x21d4   : > { %v5292_v5 = vmul.f32 0.125, %v5291_v21 }
0x21d6   : > { %v5293_v22 = vadd.f32 1e-05, %v5292_v5 }
0x21d8   : > { %8577 = vrsqrt.f32 %v5293_v22 }
0x21e2   : > { %v8578_v47 = vpop.eup %8577 }
0x21e3   : > { %v5295_v23 = vmul.f32 %v8578_v47, %v5284_v17 }
0x21e5   : > { %v5302_v25 = vmul.f32 %v6091_v30, %v5295_v23 }
0x21e7   : > { %v5309_v26 = vadd.f32 %v6092_v24, %v5302_v25 }
0x21e9   : > { %5421 = vmatmul.mubr.f32.vlgmr.msra.gmra.mrb[52].mxu1 %v5309_v26 }
0x22bc   : > { %v5422_v39 = vpop.f32.mrb[52].mxu1 }
0x22bd   : > { %v5423_v40 = vadd.f32 %v5422_v39, %v5349_v1  ;;  %v5424_v41 = vpop.f32.mrb[53].mxu1 }
0x22be   : > { %v5425_v28 = vadd.f32 %v5424_v41, %v5353_v13 }
0x22bf   : > { %v5427_v43 = vmax.f32 %v5423_v40, 0.0 }
0x22c0   : > { %v5428_v42 = vmax.f32 %v5425_v28, 0.0 }
0x22c2   : > { %5534 = vmatprep.mubr.f32.mxu0 %v5428_v42 }
0x22c3   : > { %5535 = vmatmul.mubr.f32.vlgmr.msra.gmra.mrb[54].mxu0 %v5427_v43 }
0x2396   : > { %v6721_v7 = vpop.f32.mrb[54].mxu0 }
0x2397   : > { %v6722_v46 = vpop.f32.mrb[55].mxu0 }
0x2398   : > { %v6723_v48 = vadd.f32 %v6722_v46, %v6721_v7 }
0x239a   : > { %v5537_v49 = vadd.f32 %v6723_v48, %v6159_v45 }
0x239c   : > { %v5540_v59 = vadd.f32 %v5537_v49, %v5309_v26 }
0x239e   : > { %v5545_v50 = vrot.slane %v5540_v59, 4 }
0x23a0   : > { %v5546_v58 = vadd.f32 %v5545_v50, %v5540_v59 }
0x23a2   : > { %v5547_v61 = vrot.slane %v5546_v58, 2 }
0x23a4   : > { %v5548_v51 = vadd.f32 %v5547_v61, %v5546_v58 }
0x23a6   : > { %v5549_v52 = vrot.slane %v5548_v51, 1 }
0x23a8   : > { %v5550_v3 = vadd.f32 %v5549_v52, %v5548_v51 }
0x23aa   : > { %v5551_v53 = vmul.f32 0.125, %v5550_v3 }
0x23ac   : > { %v5552_v54 = vsub.f32 %v5540_v59, %v5551_v53 }
0x23ae   : > { %v5553_v55 = vmul.f32 %v5552_v54, %v5552_v54 }
0x23b0   : > { %v5554_v56 = vrot.slane %v5553_v55, 4 }
0x23b2   : > { %v5555_v57 = vadd.f32 %v5554_v56, %v5553_v55 }
0x23b4   : > { %v5556_v60 = vrot.slane %v5555_v57, 2 }
0x23b6   : > { %v5557_v62 = vadd.f32 %v5556_v60, %v5555_v57 }
0x23b8   : > { %v5558_v63 = vrot.slane %v5557_v62, 1 }
0x23ba   : > { %v5559_v0 = vadd.f32 %v5558_v63, %v5557_v62 }
0x23bc   : > { %v5560_v2 = vmul.f32 0.125, %v5559_v0 }
0x23be   : > { %v5561_v4 = vadd.f32 1e-05, %v5560_v2 }
0x23c0   : > { %8579 = vrsqrt.f32 %v5561_v4 }
0x23ca   : > { %v8580_v8 = vpop.eup %8579 }
0x23cb   : > { %v5563_v10 = vmul.f32 %v8580_v8, %v5552_v54 }
0x23cd   : > { %v5570_v14 = vmul.f32 %v6162_v9, %v5563_v10 }
0x23cf   : > { %v5577_v15 = vadd.f32 %v6163_v12, %v5570_v14 }
0x23d1   : > { %5578 = vst [vmem:[%s698_s30] sm:$0xff] %v5577_v15 }
0x23d2   : > { %8595 = shalt.err (!%p8592_p3)
}
0x23d3   : > { %s8596_s29 = scalar_lea.hbm %s10969_s4, 128  ;;  %s8600_s24 = scalar_lea.hbm %s11073_s22, 256 }
0x23d4   : > { %p8597_p4 = scmp.ne.s32.totalorder %s10969_s4, %s8596_s29  ;;  %p8601_p9 = scmp.lt.u32.totalorder %s10969_s4, %s11073_s22 }
0x23d5   : > { %p8602_p10 = scmp.lt.u32.totalorder %s8600_s24, %s8596_s29  ;;  %p8604_p12 = scmp.lt.u32.totalorder %s8596_s29, %s10969_s4 }
0x23d6   : > { %p8598_p7 = pnand %p8597_p4, %p8803_p5 }
0x23d7   : > { %p8603_p11 = por %p8602_p10, %p8601_p9 }
0x23d8   : > { %p8599_p8 = pneg %p8598_p7 }
0x23d9   : > { %p8605_p13 = por %p8604_p12, %p8603_p11 }
0x23db   : > { %p8606_p0 = pnand %p8605_p13, %p8599_p8 }
0x23dd   : > { %8609 = shalt.err (!%p8606_p0)
}
0x23de   : > { %8499 = dma.vmem_to_hbm [thread:$0]  (%p8803_p5), %s10971_s26, 128, %s10969_s4, %s5580_s6  }
0x23df PF: > { %s11074_s7 = sld [smem:[#allocation8_spill]]  ;;  %s11075_s3 = sld [smem:[#allocation6_spill]] }
0x23e5   : > { %p8505_p1 = scmp.ge.s32.totalorder %s11074_s7, 2  ;;  %s5605_s2 = sand.u32 1, %s11075_s3  }
0x23e6   : > { %s5606_s25 = scalar_lea.sflag [#allocation4], %s5605_s2 }
0x23e7   : > { %p8502_p2 = pnand %p8505_p1, %p8807_p6 }
0x23e9   : > { %8627 = dma.done.wait (!%p8502_p2), %s5606_s25, 128  }
0x23ea   : > { %8629 = vsyncadd (!%p8502_p2), %s5606_s25, 4294967168  ;;  %s11077_s30 = sld [smem:[#allocation10_spill]]  ;;  %s11078_s29 = sld [smem:[#allocation7_spill]] }
0x23eb   : > { %s11079_s0 = sld [smem:[#allocation11_spill]]  ;;  %s11080_s3 = smov %s8636_s28 }
0x23f0   : > { %p32_p3 = scmp.ge.s32.totalorder %s11077_s30, 4   ;;  %s11081_s28 = smov %s11078_s29 }
0x23f1   : > { %s11082_s29 = smov %s11079_s0 }
0x23f2   :  { %34 = sbr.rel (!%p32_p3) target bundleno = 13 (0xd), region = 186 }
0x23f9   :  { %5611 = vsyncpa [#allocation4], 1 }
0x23fa   :  { %5613 = vsyncpa [#allocation4 + $0x1], 1 }

</bundles_post_ra>
